<compile_context>
chip_gen: v7x
topology: tpu7x:2x2x1
jax: 0.10.0
libtpu: 0.0.40
codegen_flags: <defaults>
</compile_context>

<pallas_src>
import jax
import jax.numpy as jnp
from jax import lax
from jax.experimental import pallas as pl
from jax.experimental.pallas import tpu as pltpu


# ----------------------------------------------------------------------------
# LeNet geometry / padding constants
# ----------------------------------------------------------------------------
IN_HW = 32            # input spatial size (LeNet needs 32x32x1)
KS = 5                # conv kernel size
C1, C2 = 6, 16        # conv1 / conv2 output channels
B1, B2 = 8, 16        # padded lane blocks for conv1 / conv2 channels
H1 = IN_HW - KS + 1   # 28  conv1 output spatial
P1 = H1 // 2          # 14  pool1 output spatial
H2 = P1 - KS + 1      # 10  conv2 output spatial
P2 = H2 // 2          # 5   pool2 output spatial
K1 = KS * IN_HW       # 160 conv1 deep-K (5 stacked row windows)
FC_PAD = 128          # lane padding for fc / output stages
NUM_CLASSES = 10


# ----------------------------------------------------------------------------
# The single fused Pallas kernel (one grid step = one batch block of BN samples)
# ----------------------------------------------------------------------------
def _lenet_kernel(xs_ref, w1_ref, b1_ref, d1e_ref, d1o_ref, s1e_ref, s1o_ref,
                  w2_ref, b2_ref, d2e_ref, d2o_ref, s2e_ref, s2o_ref,
                  wf1_ref, bf1_ref, wf2_ref, bf2_ref, wf3_ref, bf3_ref,
                  out_ref, p1_scr, p2_scr):
    f32 = jnp.float32
    bf16 = jnp.bfloat16
    bn = xs_ref.shape[0]          # samples in this grid step (small, unrolled)

    def mm(a, b):                 # bf16 MXU matmul, f32 accumulation
        return jnp.dot(a, b, preferred_element_type=f32)

    # ---------------- conv / pool stage: per sample, values stay in vregs ----
    for s in range(bn):
        # conv1 + ReLU: ONE deep-K matmul; input is already K-stacked + bf16.
        y1 = jnp.maximum(mm(xs_ref[s], w1_ref[...]) + b1_ref[...], 0.0)   # (28,224) f32

        # pool1 (2x2): even/odd row selection + even/odd column selection
        # matmuls on the register value (no scratch round trip).
        y1b = y1.astype(bf16)
        r1 = jnp.maximum(mm(d1e_ref[...], y1b), mm(d1o_ref[...], y1b))    # (14,224)
        r1b = r1.astype(bf16)
        p1 = jnp.maximum(mm(r1b, s1e_ref[...]), mm(r1b, s1o_ref[...]))    # (14,112)
        p1_scr[s] = p1            # conv2 needs 5 shifted row windows of this

        # conv2 + ReLU: KS banded matmuls over shifted row windows (K=112).
        acc2 = mm(p1_scr[s, 0:H2, :].astype(bf16), w2_ref[0])
        for di in range(1, KS):
            acc2 = acc2 + mm(p1_scr[s, di:di + H2, :].astype(bf16), w2_ref[di])
        y2 = jnp.maximum(acc2 + b2_ref[...], 0.0)                          # (10,160)

        # pool2 (2x2): same selection-matmul scheme, value stays in vregs.
        y2b = y2.astype(bf16)
        r2 = jnp.maximum(mm(d2e_ref[...], y2b), mm(d2o_ref[...], y2b))     # (5,160)
        r2b = r2.astype(bf16)
        p2 = jnp.maximum(mm(r2b, s2e_ref[...]), mm(r2b, s2o_ref[...]))     # (5,80)

        # Batch-gather point for the FC stage: sample s occupies rows
        # [s*P2, s*P2 + P2) of the flat pool2 scratch.
        p2_scr[pl.ds(s * P2, P2), :] = p2

    # ---------------- FC stage: batch folded into matmul M (one pass) --------
    # fc1: sum_i  p2[:, row i, :] @ wf1[i]   with  (BN,80)@(80,128) matmuls.
    acc = mm(p2_scr[pl.ds(0, bn, stride=P2), :].astype(bf16), wf1_ref[0])
    for i in range(1, P2):
        acc = acc + mm(p2_scr[pl.ds(i, bn, stride=P2), :].astype(bf16), wf1_ref[i])
    h1 = jnp.maximum(acc + bf1_ref[...], 0.0)                              # (bn,128)

    # fc2 + ReLU, fc3 (padded logits)
    h2 = jnp.maximum(mm(h1.astype(bf16), wf2_ref[...]) + bf2_ref[...], 0.0)
    logits = mm(h2.astype(bf16), wf3_ref[...]) + bf3_ref[...]              # (bn,128)

    # softmax over the 10 real classes (padded lanes masked to -inf),
    # exact normalization so rows sum to 1.
    lane = lax.broadcasted_iota(jnp.int32, logits.shape, 1)
    z = jnp.where(lane < NUM_CLASSES, logits, -jnp.inf)
    m = jnp.max(z, axis=-1, keepdims=True)
    e = jnp.exp(z - m)
    probs = e / jnp.sum(e, axis=-1, keepdims=True)
    out_ref[...] = probs.astype(out_ref.dtype)                             # dense (bn,128) store


# ----------------------------------------------------------------------------
# One-time parameter packing (outside the hot path)
# ----------------------------------------------------------------------------
def _banded_conv_matrix(w, in_w, out_w, cin_pad, cout_pad):
    """Pack a (Cout, Cin, K, K) conv weight into K banded matmul matrices.

    Result[di, n*cin_pad + ci, j*cout_pad + co] = w[co, ci, di, n - j]
    whenever 0 <= n - j < K (zero elsewhere / in padded channel slots), so
        conv_out[i, j*cout_pad + co] = sum_di (act[i+di, :] @ Result[di])[...]
    """
    cout, cin, kh, kw = w.shape
    dj = jnp.arange(kw)
    j_out = jnp.arange(out_w)
    j_in = jnp.arange(in_w)
    onehot = (j_in[None, None, :] == (j_out[None, :, None] + dj[:, None, None])
              ).astype(jnp.float32)                           # (kw, out_w, in_w)
    r = jnp.einsum("ajn,oida->dnijo", onehot, w.astype(jnp.float32))
    r = jnp.pad(r, ((0, 0), (0, 0), (0, cin_pad - cin), (0, 0), (0, cout_pad - cout)))
    return r.reshape(kh, in_w * cin_pad, out_w * cout_pad).astype(jnp.bfloat16)


def _pool_matrices(size_in, block):
    """0/1 matrices for 2x2 max-pool: even/odd row selectors (applied on the
    left) and even/odd column selectors (applied on the right)."""
    half = size_in // 2
    rows = jnp.arange(half)
    cols = jnp.arange(size_in)
    de = (cols[None, :] == 2 * rows[:, None]).astype(jnp.float32)      # (half, size_in)
    do = (cols[None, :] == 2 * rows[:, None] + 1).astype(jnp.float32)
    pe = (cols[:, None] == 2 * rows[None, :]).astype(jnp.float32)      # (size_in, half)
    po = (cols[:, None] == 2 * rows[None, :] + 1).astype(jnp.float32)
    eye = jnp.eye(block, dtype=jnp.float32)
    return (de.astype(jnp.bfloat16), do.astype(jnp.bfloat16),
            jnp.kron(pe, eye).astype(jnp.bfloat16),
            jnp.kron(po, eye).astype(jnp.bfloat16))


def prepare_params(p):
    """Pack PyTorch-layout parameters into kernel operands (done once)."""
    f32, bf16 = jnp.float32, jnp.bfloat16

    # conv1: banded matrices concatenated along K -> single (160, 224) matmul.
    b1m = _banded_conv_matrix(p["conv1_w"], IN_HW, H1, 1, B1)            # (5, 32, 224)
    w1 = b1m.reshape(K1, H1 * B1)                                        # (160, 224)
    b1 = jnp.tile(jnp.pad(p["conv1_b"], (0, B1 - C1)), H1).reshape(1, H1 * B1).astype(f32)
    d1e, d1o, s1e, s1o = _pool_matrices(H1, B1)                          # (14,28)x2, (224,112)x2

    # conv2: keep the per-di banded form (K=112 per matmul).
    w2 = _banded_conv_matrix(p["conv2_w"], P1, H2, B1, B2)               # (5, 112, 160)
    b2 = jnp.tile(jnp.pad(p["conv2_b"], (0, B2 - C2)), H2).reshape(1, H2 * B2).astype(f32)
    d2e, d2o, s2e, s2o = _pool_matrices(H2, B2)                          # (5,10)x2, (160,80)x2

    # fc1: PyTorch flatten order of (N, 16, 5, 5) is f = c*25 + i*5 + j.
    wf1 = p["fc1_w"].reshape(120, C2, P2, P2).transpose(2, 3, 1, 0)      # (i, j, c, h)
    wf1 = jnp.pad(wf1, ((0, 0), (0, 0), (0, 0), (0, FC_PAD - 120)))
    wf1 = wf1.reshape(P2, P2 * C2, FC_PAD).astype(bf16)                  # (5, 80, 128)
    bf1 = jnp.pad(p["fc1_b"], (0, FC_PAD - 120)).reshape(1, FC_PAD).astype(f32)

    wf2 = jnp.pad(p["fc2_w"].T, ((0, FC_PAD - 120), (0, FC_PAD - 84))).astype(bf16)
    bf2 = jnp.pad(p["fc2_b"], (0, FC_PAD - 84)).reshape(1, FC_PAD).astype(f32)
    wf3 = jnp.pad(p["fc3_w"].T, ((0, FC_PAD - 84), (0, FC_PAD - NUM_CLASSES))).astype(bf16)
    bf3 = jnp.pad(p["fc3_b"], (0, FC_PAD - NUM_CLASSES)).reshape(1, FC_PAD).astype(f32)

    return {"w1": w1, "b1": b1, "d1e": d1e, "d1o": d1o, "s1e": s1e, "s1o": s1o,
            "w2": w2, "b2": b2, "d2e": d2e, "d2o": d2o, "s2e": s2e, "s2o": s2o,
            "wf1": wf1, "bf1": bf1, "wf2": wf2, "bf2": bf2, "wf3": wf3, "bf3": bf3}


# ----------------------------------------------------------------------------
# Wrapper
# ----------------------------------------------------------------------------
def _const_spec(shape):
    zeros = (0,) * len(shape)
    return pl.BlockSpec(shape, lambda i, _z=zeros: _z)


def lenet2_forward(prep, x, *, block_n=8):
    n = x.shape[0]
    bn = min(block_n, n)                      # samples per grid step
    n_pad = ((n + bn - 1) // bn) * bn

    x2 = x.reshape(n, IN_HW, IN_HW).astype(jnp.float32)
    if n_pad != n:
        x2 = jnp.pad(x2, ((0, n_pad - n), (0, 0), (0, 0)))
    # Wrapper-side layout plumbing: lane-stack the KS shifted row windows so
    # conv1 becomes a single deep-K matmul; cast to bf16 once here.
    xs = jnp.concatenate([x2[:, di:di + H1, :] for di in range(KS)], axis=-1)
    xs = xs.astype(jnp.bfloat16)              # (n_pad, 28, 160)

    weights = (prep["w1"], prep["b1"], prep["d1e"], prep["d1o"], prep["s1e"], prep["s1o"],
               prep["w2"], prep["b2"], prep["d2e"], prep["d2o"], prep["s2e"], prep["s2o"],
               prep["wf1"], prep["bf1"], prep["wf2"], prep["bf2"], prep["wf3"], prep["bf3"])

    n_steps = n_pad // bn
    in_specs = [pl.BlockSpec((bn, H1, K1), lambda i: (i, 0, 0))]
    in_specs += [_const_spec(w.shape) for w in weights]
    out_specs = pl.BlockSpec((bn, FC_PAD), lambda i: (i, 0))

    # CostEstimate as a function of the (padded) batch size.
    weight_bytes = sum(int(w.size) * w.dtype.itemsize for w in weights)
    flops_per_sample = (
        2 * H1 * K1 * (H1 * B1)                                   # conv1
        + 2 * (2 * P1 * H1 * (H1 * B1))                           # pool1 rows
        + 2 * (2 * P1 * (H1 * B1) * (P1 * B1))                    # pool1 cols
        + KS * 2 * H2 * (P1 * B1) * (H2 * B2)                     # conv2
        + 2 * (2 * P2 * H2 * (H2 * B2))                           # pool2 rows
        + 2 * (2 * P2 * (H2 * B2) * (P2 * B2))                    # pool2 cols
        + 2 * (P2 * P2 * B2) * FC_PAD                             # fc1
        + 2 * 2 * FC_PAD * FC_PAD)                                # fc2 + fc3

    padded = pl.pallas_call(
        _lenet_kernel,
        out_shape=jax.ShapeDtypeStruct((n_pad, FC_PAD), jnp.float32),
        grid=(n_steps,),
        in_specs=in_specs,
        out_specs=out_specs,
        scratch_shapes=[
            pltpu.VMEM((bn, P1, P1 * B1), jnp.float32),      # pool1 (conv2 window source)
            pltpu.VMEM((bn * P2, P2 * B2), jnp.float32),     # pool2 flat (FC batch gather)
        ],
        compiler_params=pltpu.CompilerParams(
            dimension_semantics=("parallel",)),
        cost_estimate=pl.CostEstimate(
            flops=n_pad * flops_per_sample,
            transcendentals=n_pad * FC_PAD,
            bytes_accessed=int(xs.size) * 2 + n_pad * FC_PAD * 4 + weight_bytes * n_steps),
    )(xs, *weights)

    return padded[:n, :NUM_CLASSES]      # lane-dense store; slice real classes once


# ----------------------------------------------------------------------------
# Plain-XLA reference (for a wiring cross-check) and parameter init
# ----------------------------------------------------------------------------
def reference_forward(params, x):
    dn = ("NCHW", "OIHW", "NCHW")
    y = lax.conv_general_dilated(x, params["conv1_w"], (1, 1), "VALID", dimension_numbers=dn)
    y = jax.nn.relu(y + params["conv1_b"][None, :, None, None])
    y = lax.reduce_window(y, -jnp.inf, lax.max, (1, 1, 2, 2), (1, 1, 2, 2), "VALID")
    y = lax.conv_general_dilated(y, params["conv2_w"], (1, 1), "VALID", dimension_numbers=dn)
    y = jax.nn.relu(y + params["conv2_b"][None, :, None, None])
    y = lax.reduce_window(y, -jnp.inf, lax.max, (1, 1, 2, 2), (1, 1, 2, 2), "VALID")
    y = y.reshape(y.shape[0], -1)
    y = jax.nn.relu(y @ params["fc1_w"].T + params["fc1_b"])
    y = jax.nn.relu(y @ params["fc2_w"].T + params["fc2_b"])
    logits = y @ params["fc3_w"].T + params["fc3_b"]
    return jax.nn.softmax(logits, axis=1)


def init_params(key):
    def uni(k, shape, fan_in):
        bound = 1.0 / jnp.sqrt(float(fan_in))
        return jax.random.uniform(k, shape, jnp.float32, -bound, bound)

    ks = jax.random.split(key, 10)
    return {
        "conv1_w": uni(ks[0], (6, 1, 5, 5), 1 * 5 * 5),
        "conv1_b": uni(ks[1], (6,), 1 * 5 * 5),
        "conv2_w": uni(ks[2], (16, 6, 5, 5), 6 * 5 * 5),
        "conv2_b": uni(ks[3], (16,), 6 * 5 * 5),
        "fc1_w": uni(ks[4], (120, 400), 400),
        "fc1_b": uni(ks[5], (120,), 400),
        "fc2_w": uni(ks[6], (84, 120), 120),
        "fc2_b": uni(ks[7], (84,), 120),
        "fc3_w": uni(ks[8], (10, 84), 84),
        "fc3_b": uni(ks[9], (10,), 84),
    }


if __name__ == "__main__":
    key = jax.random.PRNGKey(0)
    k_params, k_x = jax.random.split(key)
    params = init_params(k_params)
    # LeNet geometry requires 32x32 single-channel inputs (16*5*5 = 400 after convs).
    x = jax.random.normal(k_x, (2, 1, 32, 32), dtype=jnp.float32)

    prep = prepare_params(params)            # one-time weight packing
    fwd = jax.jit(lenet2_forward)
    probs = jax.block_until_ready(fwd(prep, x))

    assert probs.shape == (2, NUM_CLASSES)
    assert bool(jnp.all(jnp.isfinite(probs)))
    # exact softmax normalization -> rows sum to 1 up to f32 rounding
    assert bool(jnp.allclose(jnp.sum(probs, axis=1), 1.0, atol=1e-4))

    # cross-check wiring against plain XLA (bf16 matmuls => loose tolerance)
    ref = jax.block_until_ready(reference_forward(params, x))
    assert bool(jnp.allclose(probs, ref, atol=2e-2)), "kernel/reference mismatch"

    print("KERNEL_OK")
</pallas_src>

<mosaic_0001>
module attributes {stable_mosaic.version = 11 : i64} {
  func.func @_lenet_kernel(%arg0: i32, %arg1: memref<2x28x160xbf16, #tpu.memory_space<vmem>>, %arg2: memref<160x224xbf16, #tpu.memory_space<vmem>>, %arg3: memref<1x224xf32, #tpu.memory_space<vmem>>, %arg4: memref<14x28xbf16, #tpu.memory_space<vmem>>, %arg5: memref<14x28xbf16, #tpu.memory_space<vmem>>, %arg6: memref<224x112xbf16, #tpu.memory_space<vmem>>, %arg7: memref<224x112xbf16, #tpu.memory_space<vmem>>, %arg8: memref<5x112x160xbf16, #tpu.memory_space<vmem>>, %arg9: memref<1x160xf32, #tpu.memory_space<vmem>>, %arg10: memref<5x10xbf16, #tpu.memory_space<vmem>>, %arg11: memref<5x10xbf16, #tpu.memory_space<vmem>>, %arg12: memref<160x80xbf16, #tpu.memory_space<vmem>>, %arg13: memref<160x80xbf16, #tpu.memory_space<vmem>>, %arg14: memref<5x80x128xbf16, #tpu.memory_space<vmem>>, %arg15: memref<1x128xf32, #tpu.memory_space<vmem>>, %arg16: memref<128x128xbf16, #tpu.memory_space<vmem>>, %arg17: memref<1x128xf32, #tpu.memory_space<vmem>>, %arg18: memref<128x128xbf16, #tpu.memory_space<vmem>>, %arg19: memref<1x128xf32, #tpu.memory_space<vmem>>, %arg20: memref<2x128xf32, #tpu.memory_space<vmem>>, %arg21: memref<2x14x112xf32, #tpu.memory_space<vmem>>, %arg22: memref<10x80xf32, #tpu.memory_space<vmem>>) attributes {dimension_semantics = [#tpu.dimension_semantics<parallel>], iteration_bounds = array<i64: 1>, scalar_prefetch = 0 : i64, scratch_operands = 2 : i64, tpu.core_type = #tpu.core_type<tc>, window_params = [{transform_indices = @transform_0, window_bounds = array<i64: 2, 28, 160>}, {pipeline_mode = #tpu.pipeline_mode<synchronous>, transform_indices = @transform_1, window_bounds = array<i64: 160, 224>}, {pipeline_mode = #tpu.pipeline_mode<synchronous>, transform_indices = @transform_2, window_bounds = array<i64: 1, 224>}, {pipeline_mode = #tpu.pipeline_mode<synchronous>, transform_indices = @transform_3, window_bounds = array<i64: 14, 28>}, {pipeline_mode = #tpu.pipeline_mode<synchronous>, transform_indices = @transform_4, window_bounds = array<i64: 14, 28>}, {pipeline_mode = #tpu.pipeline_mode<synchronous>, transform_indices = @transform_5, window_bounds = array<i64: 224, 112>}, {pipeline_mode = #tpu.pipeline_mode<synchronous>, transform_indices = @transform_6, window_bounds = array<i64: 224, 112>}, {pipeline_mode = #tpu.pipeline_mode<synchronous>, transform_indices = @transform_7, window_bounds = array<i64: 5, 112, 160>}, {pipeline_mode = #tpu.pipeline_mode<synchronous>, transform_indices = @transform_8, window_bounds = array<i64: 1, 160>}, {pipeline_mode = #tpu.pipeline_mode<synchronous>, transform_indices = @transform_9, window_bounds = array<i64: 5, 10>}, {pipeline_mode = #tpu.pipeline_mode<synchronous>, transform_indices = @transform_10, window_bounds = array<i64: 5, 10>}, {pipeline_mode = #tpu.pipeline_mode<synchronous>, transform_indices = @transform_11, window_bounds = array<i64: 160, 80>}, {pipeline_mode = #tpu.pipeline_mode<synchronous>, transform_indices = @transform_12, window_bounds = array<i64: 160, 80>}, {pipeline_mode = #tpu.pipeline_mode<synchronous>, transform_indices = @transform_13, window_bounds = array<i64: 5, 80, 128>}, {pipeline_mode = #tpu.pipeline_mode<synchronous>, transform_indices = @transform_14, window_bounds = array<i64: 1, 128>}, {pipeline_mode = #tpu.pipeline_mode<synchronous>, transform_indices = @transform_15, window_bounds = array<i64: 128, 128>}, {pipeline_mode = #tpu.pipeline_mode<synchronous>, transform_indices = @transform_16, window_bounds = array<i64: 1, 128>}, {pipeline_mode = #tpu.pipeline_mode<synchronous>, transform_indices = @transform_17, window_bounds = array<i64: 128, 128>}, {pipeline_mode = #tpu.pipeline_mode<synchronous>, transform_indices = @transform_18, window_bounds = array<i64: 1, 128>}, {transform_indices = @transform_19, window_bounds = array<i64: 2, 128>}]} {
    %c0 = arith.constant 0 : index
    %c0_0 = arith.constant 0 : index
    %c0_1 = arith.constant 0 : index
    %0 = vector.load %arg1[%c0, %c0_0, %c0_1] : memref<2x28x160xbf16, #tpu.memory_space<vmem>>, vector<1x28x160xbf16>
    %1 = vector.shape_cast %0 : vector<1x28x160xbf16> to vector<28x160xbf16>
    %c0_2 = arith.constant 0 : index
    %c0_3 = arith.constant 0 : index
    %2 = vector.load %arg2[%c0_2, %c0_3] : memref<160x224xbf16, #tpu.memory_space<vmem>>, vector<160x224xbf16>
    %cst = arith.constant dense<0.000000e+00> : vector<28x224xf32>
    %3 = tpu.matmul %1, %2, %cst {dimension_numbers = #tpu.dot_dimension_numbers<[1], [0], [0], [1], [0, 0, 1, 1], [], []>} : vector<28x160xbf16>, vector<160x224xbf16>, vector<28x224xf32> -> vector<28x224xf32>
    %c0_4 = arith.constant 0 : index
    %c0_5 = arith.constant 0 : index
    %4 = vector.load %arg3[%c0_4, %c0_5] : memref<1x224xf32, #tpu.memory_space<vmem>>, vector<1x224xf32>
    %5 = vector.broadcast %4 : vector<1x224xf32> to vector<28x224xf32>
    %6 = arith.addf %3, %5 : vector<28x224xf32>
    %cst_6 = arith.constant 0.000000e+00 : f32
    %7 = vector.broadcast %cst_6 : f32 to vector<28x224xf32>
    %8 = arith.maximumf %6, %7 : vector<28x224xf32>
    %9 = arith.truncf %8 : vector<28x224xf32> to vector<28x224xbf16>
    %c0_7 = arith.constant 0 : index
    %c0_8 = arith.constant 0 : index
    %10 = vector.load %arg4[%c0_7, %c0_8] : memref<14x28xbf16, #tpu.memory_space<vmem>>, vector<14x28xbf16>
    %cst_9 = arith.constant dense<0.000000e+00> : vector<14x224xf32>
    %11 = tpu.matmul %10, %9, %cst_9 {dimension_numbers = #tpu.dot_dimension_numbers<[1], [0], [0], [1], [0, 0, 1, 1], [], []>} : vector<14x28xbf16>, vector<28x224xbf16>, vector<14x224xf32> -> vector<14x224xf32>
    %c0_10 = arith.constant 0 : index
    %c0_11 = arith.constant 0 : index
    %12 = vector.load %arg5[%c0_10, %c0_11] : memref<14x28xbf16, #tpu.memory_space<vmem>>, vector<14x28xbf16>
    %cst_12 = arith.constant dense<0.000000e+00> : vector<14x224xf32>
    %13 = tpu.matmul %12, %9, %cst_12 {dimension_numbers = #tpu.dot_dimension_numbers<[1], [0], [0], [1], [0, 0, 1, 1], [], []>} : vector<14x28xbf16>, vector<28x224xbf16>, vector<14x224xf32> -> vector<14x224xf32>
    %14 = arith.maximumf %11, %13 : vector<14x224xf32>
    %15 = arith.truncf %14 : vector<14x224xf32> to vector<14x224xbf16>
    %c0_13 = arith.constant 0 : index
    %c0_14 = arith.constant 0 : index
    %16 = vector.load %arg6[%c0_13, %c0_14] : memref<224x112xbf16, #tpu.memory_space<vmem>>, vector<224x112xbf16>
    %cst_15 = arith.constant dense<0.000000e+00> : vector<14x112xf32>
    %17 = tpu.matmul %15, %16, %cst_15 {dimension_numbers = #tpu.dot_dimension_numbers<[1], [0], [0], [1], [0, 0, 1, 1], [], []>} : vector<14x224xbf16>, vector<224x112xbf16>, vector<14x112xf32> -> vector<14x112xf32>
    %c0_16 = arith.constant 0 : index
    %c0_17 = arith.constant 0 : index
    %18 = vector.load %arg7[%c0_16, %c0_17] : memref<224x112xbf16, #tpu.memory_space<vmem>>, vector<224x112xbf16>
    %cst_18 = arith.constant dense<0.000000e+00> : vector<14x112xf32>
    %19 = tpu.matmul %15, %18, %cst_18 {dimension_numbers = #tpu.dot_dimension_numbers<[1], [0], [0], [1], [0, 0, 1, 1], [], []>} : vector<14x224xbf16>, vector<224x112xbf16>, vector<14x112xf32> -> vector<14x112xf32>
    %20 = arith.maximumf %17, %19 : vector<14x112xf32>
    %c0_19 = arith.constant 0 : index
    %c0_20 = arith.constant 0 : index
    %c0_21 = arith.constant 0 : index
    %21 = vector.load %arg21[%c0_19, %c0_20, %c0_21] : memref<2x14x112xf32, #tpu.memory_space<vmem>>, vector<1x14x112xf32>
    %22 = vector.shape_cast %21 : vector<1x14x112xf32> to vector<14x112xf32>
    %23 = vector.shape_cast %20 : vector<14x112xf32> to vector<1x14x112xf32>
    tpu.vector_store %arg21[%c0_19, %c0_20, %c0_21], %23 {strides = array<i32>} : memref<2x14x112xf32, #tpu.memory_space<vmem>>, vector<1x14x112xf32>,
    %c0_22 = arith.constant 0 : index
    %c0_23 = arith.constant 0 : index
    %c0_24 = arith.constant 0 : index
    %24 = vector.load %arg21[%c0_22, %c0_23, %c0_24] : memref<2x14x112xf32, #tpu.memory_space<vmem>>, vector<1x10x112xf32>
    %25 = vector.shape_cast %24 : vector<1x10x112xf32> to vector<10x112xf32>
    %26 = arith.truncf %25 : vector<10x112xf32> to vector<10x112xbf16>
    %c0_25 = arith.constant 0 : index
    %c0_26 = arith.constant 0 : index
    %c0_27 = arith.constant 0 : index
    %27 = vector.load %arg8[%c0_25, %c0_26, %c0_27] : memref<5x112x160xbf16, #tpu.memory_space<vmem>>, vector<1x112x160xbf16>
    %28 = vector.shape_cast %27 : vector<1x112x160xbf16> to vector<112x160xbf16>
    %cst_28 = arith.constant dense<0.000000e+00> : vector<10x160xf32>
    %29 = tpu.matmul %26, %28, %cst_28 {dimension_numbers = #tpu.dot_dimension_numbers<[1], [0], [0], [1], [0, 0, 1, 1], [], []>} : vector<10x112xbf16>, vector<112x160xbf16>, vector<10x160xf32> -> vector<10x160xf32>
    %c0_29 = arith.constant 0 : index
    %c1 = arith.constant 1 : index
    %c0_30 = arith.constant 0 : index
    %30 = vector.load %arg21[%c0_29, %c1, %c0_30] : memref<2x14x112xf32, #tpu.memory_space<vmem>>, vector<1x10x112xf32>
    %31 = vector.shape_cast %30 : vector<1x10x112xf32> to vector<10x112xf32>
    %32 = arith.truncf %31 : vector<10x112xf32> to vector<10x112xbf16>
    %c1_31 = arith.constant 1 : index
    %c0_32 = arith.constant 0 : index
    %c0_33 = arith.constant 0 : index
    %33 = vector.load %arg8[%c1_31, %c0_32, %c0_33] : memref<5x112x160xbf16, #tpu.memory_space<vmem>>, vector<1x112x160xbf16>
    %34 = vector.shape_cast %33 : vector<1x112x160xbf16> to vector<112x160xbf16>
    %cst_34 = arith.constant dense<0.000000e+00> : vector<10x160xf32>
    %35 = tpu.matmul %32, %34, %cst_34 {dimension_numbers = #tpu.dot_dimension_numbers<[1], [0], [0], [1], [0, 0, 1, 1], [], []>} : vector<10x112xbf16>, vector<112x160xbf16>, vector<10x160xf32> -> vector<10x160xf32>
    %36 = arith.addf %29, %35 : vector<10x160xf32>
    %c0_35 = arith.constant 0 : index
    %c2 = arith.constant 2 : index
    %c0_36 = arith.constant 0 : index
    %37 = vector.load %arg21[%c0_35, %c2, %c0_36] : memref<2x14x112xf32, #tpu.memory_space<vmem>>, vector<1x10x112xf32>
    %38 = vector.shape_cast %37 : vector<1x10x112xf32> to vector<10x112xf32>
    %39 = arith.truncf %38 : vector<10x112xf32> to vector<10x112xbf16>
    %c2_37 = arith.constant 2 : index
    %c0_38 = arith.constant 0 : index
    %c0_39 = arith.constant 0 : index
    %40 = vector.load %arg8[%c2_37, %c0_38, %c0_39] : memref<5x112x160xbf16, #tpu.memory_space<vmem>>, vector<1x112x160xbf16>
    %41 = vector.shape_cast %40 : vector<1x112x160xbf16> to vector<112x160xbf16>
    %cst_40 = arith.constant dense<0.000000e+00> : vector<10x160xf32>
    %42 = tpu.matmul %39, %41, %cst_40 {dimension_numbers = #tpu.dot_dimension_numbers<[1], [0], [0], [1], [0, 0, 1, 1], [], []>} : vector<10x112xbf16>, vector<112x160xbf16>, vector<10x160xf32> -> vector<10x160xf32>
    %43 = arith.addf %36, %42 : vector<10x160xf32>
    %c0_41 = arith.constant 0 : index
    %c3 = arith.constant 3 : index
    %c0_42 = arith.constant 0 : index
    %44 = vector.load %arg21[%c0_41, %c3, %c0_42] : memref<2x14x112xf32, #tpu.memory_space<vmem>>, vector<1x10x112xf32>
    %45 = vector.shape_cast %44 : vector<1x10x112xf32> to vector<10x112xf32>
    %46 = arith.truncf %45 : vector<10x112xf32> to vector<10x112xbf16>
    %c3_43 = arith.constant 3 : index
    %c0_44 = arith.constant 0 : index
    %c0_45 = arith.constant 0 : index
    %47 = vector.load %arg8[%c3_43, %c0_44, %c0_45] : memref<5x112x160xbf16, #tpu.memory_space<vmem>>, vector<1x112x160xbf16>
    %48 = vector.shape_cast %47 : vector<1x112x160xbf16> to vector<112x160xbf16>
    %cst_46 = arith.constant dense<0.000000e+00> : vector<10x160xf32>
    %49 = tpu.matmul %46, %48, %cst_46 {dimension_numbers = #tpu.dot_dimension_numbers<[1], [0], [0], [1], [0, 0, 1, 1], [], []>} : vector<10x112xbf16>, vector<112x160xbf16>, vector<10x160xf32> -> vector<10x160xf32>
    %50 = arith.addf %43, %49 : vector<10x160xf32>
    %c0_47 = arith.constant 0 : index
    %c4 = arith.constant 4 : index
    %c0_48 = arith.constant 0 : index
    %51 = vector.load %arg21[%c0_47, %c4, %c0_48] : memref<2x14x112xf32, #tpu.memory_space<vmem>>, vector<1x10x112xf32>
    %52 = vector.shape_cast %51 : vector<1x10x112xf32> to vector<10x112xf32>
    %53 = arith.truncf %52 : vector<10x112xf32> to vector<10x112xbf16>
    %c4_49 = arith.constant 4 : index
    %c0_50 = arith.constant 0 : index
    %c0_51 = arith.constant 0 : index
    %54 = vector.load %arg8[%c4_49, %c0_50, %c0_51] : memref<5x112x160xbf16, #tpu.memory_space<vmem>>, vector<1x112x160xbf16>
    %55 = vector.shape_cast %54 : vector<1x112x160xbf16> to vector<112x160xbf16>
    %cst_52 = arith.constant dense<0.000000e+00> : vector<10x160xf32>
    %56 = tpu.matmul %53, %55, %cst_52 {dimension_numbers = #tpu.dot_dimension_numbers<[1], [0], [0], [1], [0, 0, 1, 1], [], []>} : vector<10x112xbf16>, vector<112x160xbf16>, vector<10x160xf32> -> vector<10x160xf32>
    %57 = arith.addf %50, %56 : vector<10x160xf32>
    %c0_53 = arith.constant 0 : index
    %c0_54 = arith.constant 0 : index
    %58 = vector.load %arg9[%c0_53, %c0_54] : memref<1x160xf32, #tpu.memory_space<vmem>>, vector<1x160xf32>
    %59 = vector.broadcast %58 : vector<1x160xf32> to vector<10x160xf32>
    %60 = arith.addf %57, %59 : vector<10x160xf32>
    %cst_55 = arith.constant 0.000000e+00 : f32
    %61 = vector.broadcast %cst_55 : f32 to vector<10x160xf32>
    %62 = arith.maximumf %60, %61 : vector<10x160xf32>
    %63 = arith.truncf %62 : vector<10x160xf32> to vector<10x160xbf16>
    %c0_56 = arith.constant 0 : index
    %c0_57 = arith.constant 0 : index
    %64 = vector.load %arg10[%c0_56, %c0_57] : memref<5x10xbf16, #tpu.memory_space<vmem>>, vector<5x10xbf16>
    %cst_58 = arith.constant dense<0.000000e+00> : vector<5x160xf32>
    %65 = tpu.matmul %64, %63, %cst_58 {dimension_numbers = #tpu.dot_dimension_numbers<[1], [0], [0], [1], [0, 0, 1, 1], [], []>} : vector<5x10xbf16>, vector<10x160xbf16>, vector<5x160xf32> -> vector<5x160xf32>
    %c0_59 = arith.constant 0 : index
    %c0_60 = arith.constant 0 : index
    %66 = vector.load %arg11[%c0_59, %c0_60] : memref<5x10xbf16, #tpu.memory_space<vmem>>, vector<5x10xbf16>
    %cst_61 = arith.constant dense<0.000000e+00> : vector<5x160xf32>
    %67 = tpu.matmul %66, %63, %cst_61 {dimension_numbers = #tpu.dot_dimension_numbers<[1], [0], [0], [1], [0, 0, 1, 1], [], []>} : vector<5x10xbf16>, vector<10x160xbf16>, vector<5x160xf32> -> vector<5x160xf32>
    %68 = arith.maximumf %65, %67 : vector<5x160xf32>
    %69 = arith.truncf %68 : vector<5x160xf32> to vector<5x160xbf16>
    %c0_62 = arith.constant 0 : index
    %c0_63 = arith.constant 0 : index
    %70 = vector.load %arg12[%c0_62, %c0_63] : memref<160x80xbf16, #tpu.memory_space<vmem>>, vector<160x80xbf16>
    %cst_64 = arith.constant dense<0.000000e+00> : vector<5x80xf32>
    %71 = tpu.matmul %69, %70, %cst_64 {dimension_numbers = #tpu.dot_dimension_numbers<[1], [0], [0], [1], [0, 0, 1, 1], [], []>} : vector<5x160xbf16>, vector<160x80xbf16>, vector<5x80xf32> -> vector<5x80xf32>
    %c0_65 = arith.constant 0 : index
    %c0_66 = arith.constant 0 : index
    %72 = vector.load %arg13[%c0_65, %c0_66] : memref<160x80xbf16, #tpu.memory_space<vmem>>, vector<160x80xbf16>
    %cst_67 = arith.constant dense<0.000000e+00> : vector<5x80xf32>
    %73 = tpu.matmul %69, %72, %cst_67 {dimension_numbers = #tpu.dot_dimension_numbers<[1], [0], [0], [1], [0, 0, 1, 1], [], []>} : vector<5x160xbf16>, vector<160x80xbf16>, vector<5x80xf32> -> vector<5x80xf32>
    %74 = arith.maximumf %71, %73 : vector<5x80xf32>
    %c0_68 = arith.constant 0 : index
    %c0_69 = arith.constant 0 : index
    %75 = vector.load %arg22[%c0_68, %c0_69] : memref<10x80xf32, #tpu.memory_space<vmem>>, vector<5x80xf32>
    tpu.vector_store %arg22[%c0_68, %c0_69], %74 {strides = array<i32>} : memref<10x80xf32, #tpu.memory_space<vmem>>, vector<5x80xf32>,
    %c1_70 = arith.constant 1 : index
    %c0_71 = arith.constant 0 : index
    %c0_72 = arith.constant 0 : index
    %76 = vector.load %arg1[%c1_70, %c0_71, %c0_72] : memref<2x28x160xbf16, #tpu.memory_space<vmem>>, vector<1x28x160xbf16>
    %77 = vector.shape_cast %76 : vector<1x28x160xbf16> to vector<28x160xbf16>
    %c0_73 = arith.constant 0 : index
    %c0_74 = arith.constant 0 : index
    %78 = vector.load %arg2[%c0_73, %c0_74] : memref<160x224xbf16, #tpu.memory_space<vmem>>, vector<160x224xbf16>
    %cst_75 = arith.constant dense<0.000000e+00> : vector<28x224xf32>
    %79 = tpu.matmul %77, %78, %cst_75 {dimension_numbers = #tpu.dot_dimension_numbers<[1], [0], [0], [1], [0, 0, 1, 1], [], []>} : vector<28x160xbf16>, vector<160x224xbf16>, vector<28x224xf32> -> vector<28x224xf32>
    %c0_76 = arith.constant 0 : index
    %c0_77 = arith.constant 0 : index
    %80 = vector.load %arg3[%c0_76, %c0_77] : memref<1x224xf32, #tpu.memory_space<vmem>>, vector<1x224xf32>
    %81 = vector.broadcast %80 : vector<1x224xf32> to vector<28x224xf32>
    %82 = arith.addf %79, %81 : vector<28x224xf32>
    %cst_78 = arith.constant 0.000000e+00 : f32
    %83 = vector.broadcast %cst_78 : f32 to vector<28x224xf32>
    %84 = arith.maximumf %82, %83 : vector<28x224xf32>
    %85 = arith.truncf %84 : vector<28x224xf32> to vector<28x224xbf16>
    %c0_79 = arith.constant 0 : index
    %c0_80 = arith.constant 0 : index
    %86 = vector.load %arg4[%c0_79, %c0_80] : memref<14x28xbf16, #tpu.memory_space<vmem>>, vector<14x28xbf16>
    %cst_81 = arith.constant dense<0.000000e+00> : vector<14x224xf32>
    %87 = tpu.matmul %86, %85, %cst_81 {dimension_numbers = #tpu.dot_dimension_numbers<[1], [0], [0], [1], [0, 0, 1, 1], [], []>} : vector<14x28xbf16>, vector<28x224xbf16>, vector<14x224xf32> -> vector<14x224xf32>
    %c0_82 = arith.constant 0 : index
    %c0_83 = arith.constant 0 : index
    %88 = vector.load %arg5[%c0_82, %c0_83] : memref<14x28xbf16, #tpu.memory_space<vmem>>, vector<14x28xbf16>
    %cst_84 = arith.constant dense<0.000000e+00> : vector<14x224xf32>
    %89 = tpu.matmul %88, %85, %cst_84 {dimension_numbers = #tpu.dot_dimension_numbers<[1], [0], [0], [1], [0, 0, 1, 1], [], []>} : vector<14x28xbf16>, vector<28x224xbf16>, vector<14x224xf32> -> vector<14x224xf32>
    %90 = arith.maximumf %87, %89 : vector<14x224xf32>
    %91 = arith.truncf %90 : vector<14x224xf32> to vector<14x224xbf16>
    %c0_85 = arith.constant 0 : index
    %c0_86 = arith.constant 0 : index
    %92 = vector.load %arg6[%c0_85, %c0_86] : memref<224x112xbf16, #tpu.memory_space<vmem>>, vector<224x112xbf16>
    %cst_87 = arith.constant dense<0.000000e+00> : vector<14x112xf32>
    %93 = tpu.matmul %91, %92, %cst_87 {dimension_numbers = #tpu.dot_dimension_numbers<[1], [0], [0], [1], [0, 0, 1, 1], [], []>} : vector<14x224xbf16>, vector<224x112xbf16>, vector<14x112xf32> -> vector<14x112xf32>
    %c0_88 = arith.constant 0 : index
    %c0_89 = arith.constant 0 : index
    %94 = vector.load %arg7[%c0_88, %c0_89] : memref<224x112xbf16, #tpu.memory_space<vmem>>, vector<224x112xbf16>
    %cst_90 = arith.constant dense<0.000000e+00> : vector<14x112xf32>
    %95 = tpu.matmul %91, %94, %cst_90 {dimension_numbers = #tpu.dot_dimension_numbers<[1], [0], [0], [1], [0, 0, 1, 1], [], []>} : vector<14x224xbf16>, vector<224x112xbf16>, vector<14x112xf32> -> vector<14x112xf32>
    %96 = arith.maximumf %93, %95 : vector<14x112xf32>
    %c1_91 = arith.constant 1 : index
    %c0_92 = arith.constant 0 : index
    %c0_93 = arith.constant 0 : index
    %97 = vector.load %arg21[%c1_91, %c0_92, %c0_93] : memref<2x14x112xf32, #tpu.memory_space<vmem>>, vector<1x14x112xf32>
    %98 = vector.shape_cast %97 : vector<1x14x112xf32> to vector<14x112xf32>
    %99 = vector.shape_cast %96 : vector<14x112xf32> to vector<1x14x112xf32>
    tpu.vector_store %arg21[%c1_91, %c0_92, %c0_93], %99 {strides = array<i32>} : memref<2x14x112xf32, #tpu.memory_space<vmem>>, vector<1x14x112xf32>,
    %c1_94 = arith.constant 1 : index
    %c0_95 = arith.constant 0 : index
    %c0_96 = arith.constant 0 : index
    %100 = vector.load %arg21[%c1_94, %c0_95, %c0_96] : memref<2x14x112xf32, #tpu.memory_space<vmem>>, vector<1x10x112xf32>
    %101 = vector.shape_cast %100 : vector<1x10x112xf32> to vector<10x112xf32>
    %102 = arith.truncf %101 : vector<10x112xf32> to vector<10x112xbf16>
    %c0_97 = arith.constant 0 : index
    %c0_98 = arith.constant 0 : index
    %c0_99 = arith.constant 0 : index
    %103 = vector.load %arg8[%c0_97, %c0_98, %c0_99] : memref<5x112x160xbf16, #tpu.memory_space<vmem>>, vector<1x112x160xbf16>
    %104 = vector.shape_cast %103 : vector<1x112x160xbf16> to vector<112x160xbf16>
    %cst_100 = arith.constant dense<0.000000e+00> : vector<10x160xf32>
    %105 = tpu.matmul %102, %104, %cst_100 {dimension_numbers = #tpu.dot_dimension_numbers<[1], [0], [0], [1], [0, 0, 1, 1], [], []>} : vector<10x112xbf16>, vector<112x160xbf16>, vector<10x160xf32> -> vector<10x160xf32>
    %c1_101 = arith.constant 1 : index
    %c1_102 = arith.constant 1 : index
    %c0_103 = arith.constant 0 : index
    %106 = vector.load %arg21[%c1_101, %c1_102, %c0_103] : memref<2x14x112xf32, #tpu.memory_space<vmem>>, vector<1x10x112xf32>
    %107 = vector.shape_cast %106 : vector<1x10x112xf32> to vector<10x112xf32>
    %108 = arith.truncf %107 : vector<10x112xf32> to vector<10x112xbf16>
    %c1_104 = arith.constant 1 : index
    %c0_105 = arith.constant 0 : index
    %c0_106 = arith.constant 0 : index
    %109 = vector.load %arg8[%c1_104, %c0_105, %c0_106] : memref<5x112x160xbf16, #tpu.memory_space<vmem>>, vector<1x112x160xbf16>
    %110 = vector.shape_cast %109 : vector<1x112x160xbf16> to vector<112x160xbf16>
    %cst_107 = arith.constant dense<0.000000e+00> : vector<10x160xf32>
    %111 = tpu.matmul %108, %110, %cst_107 {dimension_numbers = #tpu.dot_dimension_numbers<[1], [0], [0], [1], [0, 0, 1, 1], [], []>} : vector<10x112xbf16>, vector<112x160xbf16>, vector<10x160xf32> -> vector<10x160xf32>
    %112 = arith.addf %105, %111 : vector<10x160xf32>
    %c1_108 = arith.constant 1 : index
    %c2_109 = arith.constant 2 : index
    %c0_110 = arith.constant 0 : index
    %113 = vector.load %arg21[%c1_108, %c2_109, %c0_110] : memref<2x14x112xf32, #tpu.memory_space<vmem>>, vector<1x10x112xf32>
    %114 = vector.shape_cast %113 : vector<1x10x112xf32> to vector<10x112xf32>
    %115 = arith.truncf %114 : vector<10x112xf32> to vector<10x112xbf16>
    %c2_111 = arith.constant 2 : index
    %c0_112 = arith.constant 0 : index
    %c0_113 = arith.constant 0 : index
    %116 = vector.load %arg8[%c2_111, %c0_112, %c0_113] : memref<5x112x160xbf16, #tpu.memory_space<vmem>>, vector<1x112x160xbf16>
    %117 = vector.shape_cast %116 : vector<1x112x160xbf16> to vector<112x160xbf16>
    %cst_114 = arith.constant dense<0.000000e+00> : vector<10x160xf32>
    %118 = tpu.matmul %115, %117, %cst_114 {dimension_numbers = #tpu.dot_dimension_numbers<[1], [0], [0], [1], [0, 0, 1, 1], [], []>} : vector<10x112xbf16>, vector<112x160xbf16>, vector<10x160xf32> -> vector<10x160xf32>
    %119 = arith.addf %112, %118 : vector<10x160xf32>
    %c1_115 = arith.constant 1 : index
    %c3_116 = arith.constant 3 : index
    %c0_117 = arith.constant 0 : index
    %120 = vector.load %arg21[%c1_115, %c3_116, %c0_117] : memref<2x14x112xf32, #tpu.memory_space<vmem>>, vector<1x10x112xf32>
    %121 = vector.shape_cast %120 : vector<1x10x112xf32> to vector<10x112xf32>
    %122 = arith.truncf %121 : vector<10x112xf32> to vector<10x112xbf16>
    %c3_118 = arith.constant 3 : index
    %c0_119 = arith.constant 0 : index
    %c0_120 = arith.constant 0 : index
    %123 = vector.load %arg8[%c3_118, %c0_119, %c0_120] : memref<5x112x160xbf16, #tpu.memory_space<vmem>>, vector<1x112x160xbf16>
    %124 = vector.shape_cast %123 : vector<1x112x160xbf16> to vector<112x160xbf16>
    %cst_121 = arith.constant dense<0.000000e+00> : vector<10x160xf32>
    %125 = tpu.matmul %122, %124, %cst_121 {dimension_numbers = #tpu.dot_dimension_numbers<[1], [0], [0], [1], [0, 0, 1, 1], [], []>} : vector<10x112xbf16>, vector<112x160xbf16>, vector<10x160xf32> -> vector<10x160xf32>
    %126 = arith.addf %119, %125 : vector<10x160xf32>
    %c1_122 = arith.constant 1 : index
    %c4_123 = arith.constant 4 : index
    %c0_124 = arith.constant 0 : index
    %127 = vector.load %arg21[%c1_122, %c4_123, %c0_124] : memref<2x14x112xf32, #tpu.memory_space<vmem>>, vector<1x10x112xf32>
    %128 = vector.shape_cast %127 : vector<1x10x112xf32> to vector<10x112xf32>
    %129 = arith.truncf %128 : vector<10x112xf32> to vector<10x112xbf16>
    %c4_125 = arith.constant 4 : index
    %c0_126 = arith.constant 0 : index
    %c0_127 = arith.constant 0 : index
    %130 = vector.load %arg8[%c4_125, %c0_126, %c0_127] : memref<5x112x160xbf16, #tpu.memory_space<vmem>>, vector<1x112x160xbf16>
    %131 = vector.shape_cast %130 : vector<1x112x160xbf16> to vector<112x160xbf16>
    %cst_128 = arith.constant dense<0.000000e+00> : vector<10x160xf32>
    %132 = tpu.matmul %129, %131, %cst_128 {dimension_numbers = #tpu.dot_dimension_numbers<[1], [0], [0], [1], [0, 0, 1, 1], [], []>} : vector<10x112xbf16>, vector<112x160xbf16>, vector<10x160xf32> -> vector<10x160xf32>
    %133 = arith.addf %126, %132 : vector<10x160xf32>
    %c0_129 = arith.constant 0 : index
    %c0_130 = arith.constant 0 : index
    %134 = vector.load %arg9[%c0_129, %c0_130] : memref<1x160xf32, #tpu.memory_space<vmem>>, vector<1x160xf32>
    %135 = vector.broadcast %134 : vector<1x160xf32> to vector<10x160xf32>
    %136 = arith.addf %133, %135 : vector<10x160xf32>
    %cst_131 = arith.constant 0.000000e+00 : f32
    %137 = vector.broadcast %cst_131 : f32 to vector<10x160xf32>
    %138 = arith.maximumf %136, %137 : vector<10x160xf32>
    %139 = arith.truncf %138 : vector<10x160xf32> to vector<10x160xbf16>
    %c0_132 = arith.constant 0 : index
    %c0_133 = arith.constant 0 : index
    %140 = vector.load %arg10[%c0_132, %c0_133] : memref<5x10xbf16, #tpu.memory_space<vmem>>, vector<5x10xbf16>
    %cst_134 = arith.constant dense<0.000000e+00> : vector<5x160xf32>
    %141 = tpu.matmul %140, %139, %cst_134 {dimension_numbers = #tpu.dot_dimension_numbers<[1], [0], [0], [1], [0, 0, 1, 1], [], []>} : vector<5x10xbf16>, vector<10x160xbf16>, vector<5x160xf32> -> vector<5x160xf32>
    %c0_135 = arith.constant 0 : index
    %c0_136 = arith.constant 0 : index
    %142 = vector.load %arg11[%c0_135, %c0_136] : memref<5x10xbf16, #tpu.memory_space<vmem>>, vector<5x10xbf16>
    %cst_137 = arith.constant dense<0.000000e+00> : vector<5x160xf32>
    %143 = tpu.matmul %142, %139, %cst_137 {dimension_numbers = #tpu.dot_dimension_numbers<[1], [0], [0], [1], [0, 0, 1, 1], [], []>} : vector<5x10xbf16>, vector<10x160xbf16>, vector<5x160xf32> -> vector<5x160xf32>
    %144 = arith.maximumf %141, %143 : vector<5x160xf32>
    %145 = arith.truncf %144 : vector<5x160xf32> to vector<5x160xbf16>
    %c0_138 = arith.constant 0 : index
    %c0_139 = arith.constant 0 : index
    %146 = vector.load %arg12[%c0_138, %c0_139] : memref<160x80xbf16, #tpu.memory_space<vmem>>, vector<160x80xbf16>
    %cst_140 = arith.constant dense<0.000000e+00> : vector<5x80xf32>
    %147 = tpu.matmul %145, %146, %cst_140 {dimension_numbers = #tpu.dot_dimension_numbers<[1], [0], [0], [1], [0, 0, 1, 1], [], []>} : vector<5x160xbf16>, vector<160x80xbf16>, vector<5x80xf32> -> vector<5x80xf32>
    %c0_141 = arith.constant 0 : index
    %c0_142 = arith.constant 0 : index
    %148 = vector.load %arg13[%c0_141, %c0_142] : memref<160x80xbf16, #tpu.memory_space<vmem>>, vector<160x80xbf16>
    %cst_143 = arith.constant dense<0.000000e+00> : vector<5x80xf32>
    %149 = tpu.matmul %145, %148, %cst_143 {dimension_numbers = #tpu.dot_dimension_numbers<[1], [0], [0], [1], [0, 0, 1, 1], [], []>} : vector<5x160xbf16>, vector<160x80xbf16>, vector<5x80xf32> -> vector<5x80xf32>
    %150 = arith.maximumf %147, %149 : vector<5x80xf32>
    %c5 = arith.constant 5 : index
    %c0_144 = arith.constant 0 : index
    %151 = vector.load %arg22[%c5, %c0_144] : memref<10x80xf32, #tpu.memory_space<vmem>>, vector<5x80xf32>
    tpu.vector_store %arg22[%c5, %c0_144], %150 {strides = array<i32>} : memref<10x80xf32, #tpu.memory_space<vmem>>, vector<5x80xf32>,
    %c0_145 = arith.constant 0 : index
    %c0_146 = arith.constant 0 : index
    %152 = tpu.strided_load %arg22[%c0_145, %c0_146] {strides = array<i32: 5, 1>} : memref<10x80xf32, #tpu.memory_space<vmem>>, vector<2x80xf32>
    %153 = arith.truncf %152 : vector<2x80xf32> to vector<2x80xbf16>
    %c0_147 = arith.constant 0 : index
    %c0_148 = arith.constant 0 : index
    %c0_149 = arith.constant 0 : index
    %154 = vector.load %arg14[%c0_147, %c0_148, %c0_149] : memref<5x80x128xbf16, #tpu.memory_space<vmem>>, vector<1x80x128xbf16>
    %155 = vector.shape_cast %154 : vector<1x80x128xbf16> to vector<80x128xbf16>
    %cst_150 = arith.constant dense<0.000000e+00> : vector<2x128xf32>
    %156 = tpu.matmul %153, %155, %cst_150 {dimension_numbers = #tpu.dot_dimension_numbers<[1], [0], [0], [1], [0, 0, 1, 1], [], []>} : vector<2x80xbf16>, vector<80x128xbf16>, vector<2x128xf32> -> vector<2x128xf32>
    %c1_151 = arith.constant 1 : index
    %c0_152 = arith.constant 0 : index
    %157 = tpu.strided_load %arg22[%c1_151, %c0_152] {strides = array<i32: 5, 1>} : memref<10x80xf32, #tpu.memory_space<vmem>>, vector<2x80xf32>
    %158 = arith.truncf %157 : vector<2x80xf32> to vector<2x80xbf16>
    %c1_153 = arith.constant 1 : index
    %c0_154 = arith.constant 0 : index
    %c0_155 = arith.constant 0 : index
    %159 = vector.load %arg14[%c1_153, %c0_154, %c0_155] : memref<5x80x128xbf16, #tpu.memory_space<vmem>>, vector<1x80x128xbf16>
    %160 = vector.shape_cast %159 : vector<1x80x128xbf16> to vector<80x128xbf16>
    %cst_156 = arith.constant dense<0.000000e+00> : vector<2x128xf32>
    %161 = tpu.matmul %158, %160, %cst_156 {dimension_numbers = #tpu.dot_dimension_numbers<[1], [0], [0], [1], [0, 0, 1, 1], [], []>} : vector<2x80xbf16>, vector<80x128xbf16>, vector<2x128xf32> -> vector<2x128xf32>
    %162 = arith.addf %156, %161 : vector<2x128xf32>
    %c2_157 = arith.constant 2 : index
    %c0_158 = arith.constant 0 : index
    %163 = tpu.strided_load %arg22[%c2_157, %c0_158] {strides = array<i32: 5, 1>} : memref<10x80xf32, #tpu.memory_space<vmem>>, vector<2x80xf32>
    %164 = arith.truncf %163 : vector<2x80xf32> to vector<2x80xbf16>
    %c2_159 = arith.constant 2 : index
    %c0_160 = arith.constant 0 : index
    %c0_161 = arith.constant 0 : index
    %165 = vector.load %arg14[%c2_159, %c0_160, %c0_161] : memref<5x80x128xbf16, #tpu.memory_space<vmem>>, vector<1x80x128xbf16>
    %166 = vector.shape_cast %165 : vector<1x80x128xbf16> to vector<80x128xbf16>
    %cst_162 = arith.constant dense<0.000000e+00> : vector<2x128xf32>
    %167 = tpu.matmul %164, %166, %cst_162 {dimension_numbers = #tpu.dot_dimension_numbers<[1], [0], [0], [1], [0, 0, 1, 1], [], []>} : vector<2x80xbf16>, vector<80x128xbf16>, vector<2x128xf32> -> vector<2x128xf32>
    %168 = arith.addf %162, %167 : vector<2x128xf32>
    %c3_163 = arith.constant 3 : index
    %c0_164 = arith.constant 0 : index
    %169 = tpu.strided_load %arg22[%c3_163, %c0_164] {strides = array<i32: 5, 1>} : memref<10x80xf32, #tpu.memory_space<vmem>>, vector<2x80xf32>
    %170 = arith.truncf %169 : vector<2x80xf32> to vector<2x80xbf16>
    %c3_165 = arith.constant 3 : index
    %c0_166 = arith.constant 0 : index
    %c0_167 = arith.constant 0 : index
    %171 = vector.load %arg14[%c3_165, %c0_166, %c0_167] : memref<5x80x128xbf16, #tpu.memory_space<vmem>>, vector<1x80x128xbf16>
    %172 = vector.shape_cast %171 : vector<1x80x128xbf16> to vector<80x128xbf16>
    %cst_168 = arith.constant dense<0.000000e+00> : vector<2x128xf32>
    %173 = tpu.matmul %170, %172, %cst_168 {dimension_numbers = #tpu.dot_dimension_numbers<[1], [0], [0], [1], [0, 0, 1, 1], [], []>} : vector<2x80xbf16>, vector<80x128xbf16>, vector<2x128xf32> -> vector<2x128xf32>
    %174 = arith.addf %168, %173 : vector<2x128xf32>
    %c4_169 = arith.constant 4 : index
    %c0_170 = arith.constant 0 : index
    %175 = tpu.strided_load %arg22[%c4_169, %c0_170] {strides = array<i32: 5, 1>} : memref<10x80xf32, #tpu.memory_space<vmem>>, vector<2x80xf32>
    %176 = arith.truncf %175 : vector<2x80xf32> to vector<2x80xbf16>
    %c4_171 = arith.constant 4 : index
    %c0_172 = arith.constant 0 : index
    %c0_173 = arith.constant 0 : index
    %177 = vector.load %arg14[%c4_171, %c0_172, %c0_173] : memref<5x80x128xbf16, #tpu.memory_space<vmem>>, vector<1x80x128xbf16>
    %178 = vector.shape_cast %177 : vector<1x80x128xbf16> to vector<80x128xbf16>
    %cst_174 = arith.constant dense<0.000000e+00> : vector<2x128xf32>
    %179 = tpu.matmul %176, %178, %cst_174 {dimension_numbers = #tpu.dot_dimension_numbers<[1], [0], [0], [1], [0, 0, 1, 1], [], []>} : vector<2x80xbf16>, vector<80x128xbf16>, vector<2x128xf32> -> vector<2x128xf32>
    %180 = arith.addf %174, %179 : vector<2x128xf32>
    %c0_175 = arith.constant 0 : index
    %c0_176 = arith.constant 0 : index
    %181 = vector.load %arg15[%c0_175, %c0_176] : memref<1x128xf32, #tpu.memory_space<vmem>>, vector<1x128xf32>
    %182 = vector.broadcast %181 : vector<1x128xf32> to vector<2x128xf32>
    %183 = arith.addf %180, %182 : vector<2x128xf32>
    %cst_177 = arith.constant 0.000000e+00 : f32
    %184 = vector.broadcast %cst_177 : f32 to vector<2x128xf32>
    %185 = arith.maximumf %183, %184 : vector<2x128xf32>
    %186 = arith.truncf %185 : vector<2x128xf32> to vector<2x128xbf16>
    %c0_178 = arith.constant 0 : index
    %c0_179 = arith.constant 0 : index
    %187 = vector.load %arg16[%c0_178, %c0_179] : memref<128x128xbf16, #tpu.memory_space<vmem>>, vector<128x128xbf16>
    %cst_180 = arith.constant dense<0.000000e+00> : vector<2x128xf32>
    %188 = tpu.matmul %186, %187, %cst_180 {dimension_numbers = #tpu.dot_dimension_numbers<[1], [0], [0], [1], [0, 0, 1, 1], [], []>} : vector<2x128xbf16>, vector<128x128xbf16>, vector<2x128xf32> -> vector<2x128xf32>
    %c0_181 = arith.constant 0 : index
    %c0_182 = arith.constant 0 : index
    %189 = vector.load %arg17[%c0_181, %c0_182] : memref<1x128xf32, #tpu.memory_space<vmem>>, vector<1x128xf32>
    %190 = vector.broadcast %189 : vector<1x128xf32> to vector<2x128xf32>
    %191 = arith.addf %188, %190 : vector<2x128xf32>
    %cst_183 = arith.constant 0.000000e+00 : f32
    %192 = vector.broadcast %cst_183 : f32 to vector<2x128xf32>
    %193 = arith.maximumf %191, %192 : vector<2x128xf32>
    %194 = arith.truncf %193 : vector<2x128xf32> to vector<2x128xbf16>
    %c0_184 = arith.constant 0 : index
    %c0_185 = arith.constant 0 : index
    %195 = vector.load %arg18[%c0_184, %c0_185] : memref<128x128xbf16, #tpu.memory_space<vmem>>, vector<128x128xbf16>
    %cst_186 = arith.constant dense<0.000000e+00> : vector<2x128xf32>
    %196 = tpu.matmul %194, %195, %cst_186 {dimension_numbers = #tpu.dot_dimension_numbers<[1], [0], [0], [1], [0, 0, 1, 1], [], []>} : vector<2x128xbf16>, vector<128x128xbf16>, vector<2x128xf32> -> vector<2x128xf32>
    %c0_187 = arith.constant 0 : index
    %c0_188 = arith.constant 0 : index
    %197 = vector.load %arg19[%c0_187, %c0_188] : memref<1x128xf32, #tpu.memory_space<vmem>>, vector<1x128xf32>
    %198 = vector.broadcast %197 : vector<1x128xf32> to vector<2x128xf32>
    %199 = arith.addf %196, %198 : vector<2x128xf32>
    %200 = tpu.iota {dimensions = array<i32: 1>} : vector<2x128xi32>
    %c10_i32 = arith.constant 10 : i32
    %201 = vector.broadcast %c10_i32 : i32 to vector<2x128xi32>
    %202 = arith.cmpi slt, %200, %201 : vector<2x128xi32>
    %cst_189 = arith.constant 0xFF800000 : f32
    %203 = vector.broadcast %cst_189 : f32 to vector<2x128xf32>
    %204 = arith.select %202, %199, %203 : vector<2x128xi1>, vector<2x128xf32>
    %cst_190 = arith.constant dense<0xFF800000> : vector<2xf32>
    %205 = vector.multi_reduction <maximumf>, %204, %cst_190 [1] : vector<2x128xf32> to vector<2xf32>
    %206 = vector.shape_cast %205 : vector<2xf32> to vector<2x1xf32>
    %207 = vector.broadcast %206 : vector<2x1xf32> to vector<2x128xf32>
    %208 = arith.subf %204, %207 : vector<2x128xf32>
    %209 = math.exp %208 : vector<2x128xf32>
    %cst_191 = arith.constant dense<0.000000e+00> : vector<2xf32>
    %210 = vector.multi_reduction <add>, %209, %cst_191 [1] : vector<2x128xf32> to vector<2xf32>
    %211 = vector.shape_cast %210 : vector<2xf32> to vector<2x1xf32>
    %212 = vector.broadcast %211 : vector<2x1xf32> to vector<2x128xf32>
    %213 = arith.divf %209, %212 : vector<2x128xf32>
    %c0_192 = arith.constant 0 : index
    %c0_193 = arith.constant 0 : index
    %214 = vector.load %arg20[%c0_192, %c0_193] : memref<2x128xf32, #tpu.memory_space<vmem>>, vector<2x128xf32>
    tpu.vector_store %arg20[%c0_192, %c0_193], %213 {strides = array<i32>} : memref<2x128xf32, #tpu.memory_space<vmem>>, vector<2x128xf32>,
    return
  }
  func.func @transform_0(%arg0: i32) -> (i32, i32, i32) {
    %c0_i32 = arith.constant 0 : i32
    %c0_i32_0 = arith.constant 0 : i32
    %c0_i32_1 = arith.constant 0 : i32
    return %arg0, %c0_i32, %c0_i32_0 : i32, i32, i32
  }
  func.func @transform_1(%arg0: i32) -> (i32, i32) {
    %c0_i32 = arith.constant 0 : i32
    %c0_i32_0 = arith.constant 0 : i32
    %c0_i32_1 = arith.constant 0 : i32
    return %c0_i32, %c0_i32_0 : i32, i32
  }
  func.func @transform_2(%arg0: i32) -> (i32, i32) {
    %c0_i32 = arith.constant 0 : i32
    %c0_i32_0 = arith.constant 0 : i32
    %c0_i32_1 = arith.constant 0 : i32
    return %c0_i32, %c0_i32_0 : i32, i32
  }
  func.func @transform_3(%arg0: i32) -> (i32, i32) {
    %c0_i32 = arith.constant 0 : i32
    %c0_i32_0 = arith.constant 0 : i32
    %c0_i32_1 = arith.constant 0 : i32
    return %c0_i32, %c0_i32_0 : i32, i32
  }
  func.func @transform_4(%arg0: i32) -> (i32, i32) {
    %c0_i32 = arith.constant 0 : i32
    %c0_i32_0 = arith.constant 0 : i32
    %c0_i32_1 = arith.constant 0 : i32
    return %c0_i32, %c0_i32_0 : i32, i32
  }
  func.func @transform_5(%arg0: i32) -> (i32, i32) {
    %c0_i32 = arith.constant 0 : i32
    %c0_i32_0 = arith.constant 0 : i32
    %c0_i32_1 = arith.constant 0 : i32
    return %c0_i32, %c0_i32_0 : i32, i32
  }
  func.func @transform_6(%arg0: i32) -> (i32, i32) {
    %c0_i32 = arith.constant 0 : i32
    %c0_i32_0 = arith.constant 0 : i32
    %c0_i32_1 = arith.constant 0 : i32
    return %c0_i32, %c0_i32_0 : i32, i32
  }
  func.func @transform_7(%arg0: i32) -> (i32, i32, i32) {
    %c0_i32 = arith.constant 0 : i32
    %c0_i32_0 = arith.constant 0 : i32
    %c0_i32_1 = arith.constant 0 : i32
    %c0_i32_2 = arith.constant 0 : i32
    return %c0_i32, %c0_i32_0, %c0_i32_1 : i32, i32, i32
  }
  func.func @transform_8(%arg0: i32) -> (i32, i32) {
    %c0_i32 = arith.constant 0 : i32
    %c0_i32_0 = arith.constant 0 : i32
    %c0_i32_1 = arith.constant 0 : i32
    return %c0_i32, %c0_i32_0 : i32, i32
  }
  func.func @transform_9(%arg0: i32) -> (i32, i32) {
    %c0_i32 = arith.constant 0 : i32
    %c0_i32_0 = arith.constant 0 : i32
    %c0_i32_1 = arith.constant 0 : i32
    return %c0_i32, %c0_i32_0 : i32, i32
  }
  func.func @transform_10(%arg0: i32) -> (i32, i32) {
    %c0_i32 = arith.constant 0 : i32
    %c0_i32_0 = arith.constant 0 : i32
    %c0_i32_1 = arith.constant 0 : i32
    return %c0_i32, %c0_i32_0 : i32, i32
  }
  func.func @transform_11(%arg0: i32) -> (i32, i32) {
    %c0_i32 = arith.constant 0 : i32
    %c0_i32_0 = arith.constant 0 : i32
    %c0_i32_1 = arith.constant 0 : i32
    return %c0_i32, %c0_i32_0 : i32, i32
  }
  func.func @transform_12(%arg0: i32) -> (i32, i32) {
    %c0_i32 = arith.constant 0 : i32
    %c0_i32_0 = arith.constant 0 : i32
    %c0_i32_1 = arith.constant 0 : i32
    return %c0_i32, %c0_i32_0 : i32, i32
  }
  func.func @transform_13(%arg0: i32) -> (i32, i32, i32) {
    %c0_i32 = arith.constant 0 : i32
    %c0_i32_0 = arith.constant 0 : i32
    %c0_i32_1 = arith.constant 0 : i32
    %c0_i32_2 = arith.constant 0 : i32
    return %c0_i32, %c0_i32_0, %c0_i32_1 : i32, i32, i32
  }
  func.func @transform_14(%arg0: i32) -> (i32, i32) {
    %c0_i32 = arith.constant 0 : i32
    %c0_i32_0 = arith.constant 0 : i32
    %c0_i32_1 = arith.constant 0 : i32
    return %c0_i32, %c0_i32_0 : i32, i32
  }
  func.func @transform_15(%arg0: i32) -> (i32, i32) {
    %c0_i32 = arith.constant 0 : i32
    %c0_i32_0 = arith.constant 0 : i32
    %c0_i32_1 = arith.constant 0 : i32
    return %c0_i32, %c0_i32_0 : i32, i32
  }
  func.func @transform_16(%arg0: i32) -> (i32, i32) {
    %c0_i32 = arith.constant 0 : i32
    %c0_i32_0 = arith.constant 0 : i32
    %c0_i32_1 = arith.constant 0 : i32
    return %c0_i32, %c0_i32_0 : i32, i32
  }
  func.func @transform_17(%arg0: i32) -> (i32, i32) {
    %c0_i32 = arith.constant 0 : i32
    %c0_i32_0 = arith.constant 0 : i32
    %c0_i32_1 = arith.constant 0 : i32
    return %c0_i32, %c0_i32_0 : i32, i32
  }
  func.func @transform_18(%arg0: i32) -> (i32, i32) {
    %c0_i32 = arith.constant 0 : i32
    %c0_i32_0 = arith.constant 0 : i32
    %c0_i32_1 = arith.constant 0 : i32
    return %c0_i32, %c0_i32_0 : i32, i32
  }
  func.func @transform_19(%arg0: i32) -> (i32, i32) {
    %c0_i32 = arith.constant 0 : i32
    %c0_i32_0 = arith.constant 0 : i32
    return %arg0, %c0_i32 : i32, i32
  }
}

</mosaic_0001>

<bundles_post_ra>
// kernel: lenet2_forward.1
= control target key start
LH: loop header
LB: loop body
LE: loop exit
PB: predicated region body
PF: predicated region fallthrough
CT: control target
= control target key end

     0   :  { %s6729_s0 = inlined_call_operand.vmem [shape: bf16[2,28,160], index: 0, kind: input, shape index: {}]   ;;  %s6730_s1 = inlined_call_operand.vmem [shape: bf16[160,224], index: 1, kind: input, shape index: {}]   ;;  %s6731_s2 = inlined_call_operand.vmem [shape: f32[1,224], index: 2, kind: input, shape index: {}]   ;;  %s6732_s3 = inlined_call_operand.vmem [shape: bf16[14,28], index: 3, kind: input, shape index: {}]   ;;  %s6733_s4 = inlined_call_operand.vmem [shape: bf16[14,28], index: 4, kind: input, shape index: {}]   ;;  %s6734_s5 = inlined_call_operand.vmem [shape: bf16[224,112], index: 5, kind: input, shape index: {}]   ;;  %s6735_s6 = inlined_call_operand.vmem [shape: bf16[224,112], index: 6, kind: input, shape index: {}]   ;;  %s6736_s7 = inlined_call_operand.vmem [shape: bf16[5,112,160], index: 7, kind: input, shape index: {}]   ;;  %s6737_s8 = inlined_call_operand.vmem [shape: f32[1,160], index: 8, kind: input, shape index: {}]   ;;  %s6738_s9 = inlined_call_operand.vmem [shape: bf16[5,10], index: 9, kind: input, shape index: {}]   ;;  %s6739_s10 = inlined_call_operand.vmem [shape: bf16[5,10], index: 10, kind: input, shape index: {}]   ;;  %s6740_s11 = inlined_call_operand.vmem [shape: bf16[160,80], index: 11, kind: input, shape index: {}]   ;;  %s6741_s12 = inlined_call_operand.vmem [shape: bf16[160,80], index: 12, kind: input, shape index: {}]   ;;  %s6742_s13 = inlined_call_operand.vmem [shape: bf16[5,80,128], index: 13, kind: input, shape index: {}]   ;;  %s6743_s14 = inlined_call_operand.vmem [shape: f32[1,128], index: 14, kind: input, shape index: {}]   ;;  %s6744_s15 = inlined_call_operand.vmem [shape: bf16[128,128], index: 15, kind: input, shape index: {}]   ;;  %s6745_s16 = inlined_call_operand.vmem [shape: f32[1,128], index: 16, kind: input, shape index: {}]   ;;  %s6746_s17 = inlined_call_operand.vmem [shape: bf16[128,128], index: 17, kind: input, shape index: {}]   ;;  %s6747_s18 = inlined_call_operand.vmem [shape: f32[1,128], index: 18, kind: input, shape index: {}]   ;;  %s6748_s19 = inlined_call_operand.hbm [shape: f32[2,128], index: 19, kind: output, shape index: {}]  }
   0x1   :  { %6753 = sst [smem:[#allocation7_spill]] %s6729_s0 }
   0x2   :  { %6754 = sst [smem:[#allocation8_spill]] %s6730_s1 }
   0x3   :  { %6755 = sst [smem:[#allocation9_spill]] %s6731_s2 }
   0x4   :  { %6756 = sst [smem:[#allocation10_spill]] %s6732_s3 }
   0x5   :  { %s6757_s20 = sld [smem:[#allocation8_spill]]  ;;  %vm218_vm0 = vcmask 261120   ;;  %s6758_s23 = sld [smem:[#allocation7_spill]]  ;;  %v5357_v24 = vmov 0   ;;  %v4945_v25 = vld [vmem:[%s6735_s6] sm:$0xff]   ;;  %v4947_v26 = vld [vmem:[%s6735_s6 + $0x8] sm:$0xff]  }
   0x6   :  { %340 = vmatprep.mubr.bf16.mxu1 %v5357_v24  ;;  %v4949_v27 = vld [vmem:[%s6735_s6 + $0x10] sm:$0xff]   ;;  %v4951_v28 = vld [vmem:[%s6735_s6 + $0x18] sm:$0xff]  }
   0xb   :  { %v4906_v0 = vld [vmem:[%s6757_s20 + $0x4] ss:$8 sps:$4 sm:$0xff]   ;;  %v4908_v1 = vld [vmem:[%s6757_s20] ss:$8 sps:$4 sm:$0xff]   ;;  %v4909_v2 = vld [vmem:[%s6757_s20 + $0x14] ss:$8 sps:$4 sm:$0xff]  }
   0xc   :  { %225 = vmatprep.subr.bf16.mxu0 %v4906_v0  ;;  %v4911_v3 = vld [vmem:[%s6757_s20 + $0x10] ss:$8 sps:$4 sm:$0xff]   ;;  %v4912_v4 = vld [vmem:[%s6757_s20 + $0x24] ss:$8 sps:$4 sm:$0xff]   ;;  %v4914_v5 = vld [vmem:[%s6757_s20 + $0x20] ss:$8 sps:$4 sm:$0xff]  }
   0xd   :  { %226 = vmatpush1.bf16.msra.mxu0 %v4908_v1  ;;  %v4915_v6 = vld [vmem:[%s6757_s20 + $0x34] ss:$8 sps:$4 sm:$0xff]   ;;  %v4917_v7 = vld [vmem:[%s6757_s20 + $0x30] ss:$8 sps:$4 sm:$0xff]   ;;  %v4918_v8 = vld [vmem:[%s6757_s20 + $0x44] ss:$8 sps:$4 sm:$0xff]  }
   0xe   :  { %227 = vmatprep.subr.bf16.mxu0 %v4909_v2  ;;  %v4938_v9 = vld [vmem:[%s6758_s23 + $0x4] ss:$8 sps:$4 sm:$0xff]   ;;  %v4920_v10 = vld [vmem:[%s6757_s20 + $0x40] ss:$8 sps:$4 sm:$0xff]   ;;  %v4921_v11 = vld [vmem:[%s6757_s20 + $0x54] ss:$8 sps:$4 sm:$0xff]  }
   0xf   :  { %4205 = vmatprep.mubr.msk.bf16.mxu0 %vm218_vm0, %v4938_v9  ;;  %v4923_v12 = vld [vmem:[%s6757_s20 + $0x50] ss:$8 sps:$4 sm:$0xff]   ;;  %v4924_v13 = vld [vmem:[%s6757_s20 + $0x64] ss:$8 sps:$4 sm:$0xff]   ;;  %v4926_v14 = vld [vmem:[%s6757_s20 + $0x60] ss:$8 sps:$4 sm:$0xff]  }
  0x10   :  { %v4927_v15 = vld [vmem:[%s6757_s20 + $0x74] ss:$8 sps:$4 sm:$0xff]   ;;  %v4929_v16 = vld [vmem:[%s6757_s20 + $0x70] ss:$8 sps:$4 sm:$0xff]   ;;  %v4930_v17 = vld [vmem:[%s6757_s20 + $0x84] ss:$8 sps:$4 sm:$0xff]  }
  0x11   :  { %228 = vmatpush1.bf16.msra.mxu0 %v4911_v3  ;;  %v4932_v18 = vld [vmem:[%s6757_s20 + $0x80] ss:$8 sps:$4 sm:$0xff]   ;;  %v4933_v19 = vld [vmem:[%s6757_s20 + $0x94] ss:$8 sps:$4 sm:$0xff]   ;;  %v4935_v20 = vld [vmem:[%s6757_s20 + $0x90] ss:$8 sps:$4 sm:$0xff]  }
  0x12   :  { %229 = vmatprep.subr.bf16.mxu0 %v4912_v4  ;;  %v4936_v21 = vld [vmem:[%s6758_s23] ss:$8 sps:$4 sm:$0xff]   ;;  %v4939_v22 = vld [vmem:[%s6758_s23 + $0x14] ss:$8 sps:$4 sm:$0x3f]  }
  0x13   :  { %v4941_v23 = vld [vmem:[%s6758_s23 + $0x10] ss:$8 sps:$4 sm:$0x3f]  }
  0x15   :  { %230 = vmatpush1.bf16.msra.mxu0 %v4914_v5 }
  0x16   :  { %231 = vmatprep.subr.bf16.mxu0 %v4915_v6 }
  0x19   :  { %232 = vmatpush1.bf16.msra.mxu0 %v4917_v7 }
  0x1a   :  { %233 = vmatprep.subr.bf16.mxu0 %v4918_v8 }
  0x1d   :  { %234 = vmatpush1.bf16.msra.mxu0 %v4920_v10 }
  0x1e   :  { %235 = vmatprep.subr.bf16.mxu0 %v4921_v11 }
  0x21   :  { %236 = vmatpush1.bf16.msra.mxu0 %v4923_v12 }
  0x22   :  { %237 = vmatprep.subr.bf16.mxu0 %v4924_v13 }
  0x25   :  { %238 = vmatpush1.bf16.msra.mxu0 %v4926_v14 }
  0x26   :  { %239 = vmatprep.subr.bf16.mxu0 %v4927_v15 }
  0x29   :  { %240 = vmatpush1.bf16.msra.mxu0 %v4929_v16 }
  0x2a   :  { %241 = vmatprep.subr.bf16.mxu0 %v4930_v17 }
  0x2d   :  { %242 = vmatpush1.bf16.msra.mxu0 %v4932_v18 }
  0x2e   :  { %243 = vmatprep.subr.bf16.mxu0 %v4933_v19 }
  0x31   :  { %244 = vmatpush1.bf16.msra.mxu0 %v4935_v20 }
  0x32   :  { %679 = vmatprep.subr.bf16.mxu0 %v5357_v24 }
  0x34   :  { %258 = vmatmul.mubr.bf16.vlgmr.msra.gmra.mrb[0].mxu0 %v4936_v21 }
  0x35   :  { %4206 = vmatprep.mubr.msk.bf16.mxu0 %vm218_vm0, %v4939_v22  ;;  %680 = vmatpush1.bf16.msra.mxu0 %v4945_v25 }
  0x36   :  { %681 = vmatprep.subr.bf16.mxu0 %v5357_v24 }
  0x39   :  { %682 = vmatpush1.bf16.msra.mxu0 %v4947_v26 }
  0x3a   :  { %683 = vmatprep.subr.bf16.mxu0 %v5357_v24 }
  0x3c   :  { %268 = vmatmul.mubr.bf16.gmra.mrb[4].mxu0 %v4941_v23 }
  0x3d   :  { %684 = vmatpush1.bf16.msra.mxu0 %v4949_v27 }
  0x3e   :  { %685 = vmatprep.subr.bf16.mxu0 %v5357_v24 }
  0x3f   :  { %24 = vsyncpa [#allocation5], 0  ;;  %v4953_v29 = vld [vmem:[%s6735_s6 + $0x20] sm:$0xff]   ;;  %v4955_v30 = vld [vmem:[%s6735_s6 + $0x28] sm:$0xff]   ;;  %v90_v35 = vlaneseq  ;;  %s6759_s22 = sld [smem:[#allocation9_spill]]  ;;  %vm301_vm1 = vcmask 1045504  }
  0x40   :  { %v4957_v31 = vld [vmem:[%s6735_s6 + $0x30] sm:$0xff]   ;;  %v4959_v32 = vld [vmem:[%s6735_s6 + $0x38] sm:$0xff]   ;;  %v4961_v33 = vld [vmem:[%s6735_s6 + $0x40] sm:$0xff]   ;;  %s6760_s25 = sld [smem:[#allocation10_spill]]  ;;  %vm297_vm2 = vcmask 228352   ;;  %vm522_vm3 = vcmask 785408  }
  0x41   :  { %686 = vmatpush1.bf16.msra.mxu0 %v4951_v28  ;;  %v4963_v34 = vld [vmem:[%s6735_s6 + $0x48] sm:$0xff]   ;;  %v91_v36 = vshrl.u32 %v90_v35, 7  ;;  %v4943_v8 = vld [vmem:[%s6733_s4] sm:$0x7f]   ;;  %v4948_v11 = vld [vmem:[%s6734_s5 + $0x10] sm:$0xff]   ;;  %vm722_vm4 = vcmask 916480  }
  0x42   :  { %687 = vmatprep.subr.bf16.mxu0 %v5357_v24  ;;  %v4944_v9 = vld [vmem:[%s6734_s5] sm:$0xff]   ;;  %v4946_v10 = vld [vmem:[%s6734_s5 + $0x8] sm:$0xff]   ;;  %v4950_v12 = vld [vmem:[%s6734_s5 + $0x18] sm:$0xff]   ;;  %vm724_vm5 = vcmask 914432   ;;  %vm1434_vm6 = vcmask 1044480   ;;  %vm1430_vm7 = vcmask 80896  }
  0x43   :  { %v5578_v37 = vsub.s32 0, %v91_v36  ;;  %v5583_v39 = vsub.s32 1, %v91_v36  ;;  %v4952_v13 = vld [vmem:[%s6734_s5 + $0x20] sm:$0xff]   ;;  %v4954_v14 = vld [vmem:[%s6734_s5 + $0x28] sm:$0xff]   ;;  %v4956_v15 = vld [vmem:[%s6734_s5 + $0x30] sm:$0xff]   ;;  %vm1775_vm8 = vcmask 651264  }
  0x44   :  { %v4958_v16 = vld [vmem:[%s6734_s5 + $0x38] sm:$0xff]   ;;  %v4960_v17 = vld [vmem:[%s6734_s5 + $0x40] sm:$0xff]   ;;  %v4962_v18 = vld [vmem:[%s6734_s5 + $0x48] sm:$0xff]   ;;  %vm5359_vm9 = vmmov 0   ;;  %vm3535_vm10 = vcmask 654336   ;;  %vm4154_vm12 = vcmask 1041408  }
  0x45   :  { %688 = vmatpush1.bf16.msra.mxu0 %v4953_v29  ;;  %v88_v38 = vld [vmem:[%s6759_s22] sm:$0x3]  ;;  %v4964_v19 = vld [vmem:[%s6734_s5 + $0x50] sm:$0xff]   ;;  %v4966_v21 = vld [vmem:[%s6734_s5 + $0x58] sm:$0xff]  }
  0x46   :  { %689 = vmatprep.subr.bf16.mxu0 %v5357_v24  ;;  %v93_v40 = vrot.slane %v88_v38, %v5578_v37  ;;  %v97_v41 = vrot.slane %v88_v38, %v5583_v39  ;;  %v4942_v7 = vld [vmem:[%s6760_s25] sm:$0x7f]   ;;  %v4965_v20 = vld [vmem:[%s6735_s6 + $0x50] sm:$0xff]   ;;  %v4967_v22 = vld [vmem:[%s6735_s6 + $0x58] sm:$0xff]  }
  0x47   :  { %v4968_v23 = vld [vmem:[%s6734_s5 + $0x60] sm:$0xff]   ;;  %v4970_v26 = vld [vmem:[%s6734_s5 + $0x68] sm:$0xff]   ;;  %v4974_v28 = vld [vmem:[%s6736_s7 + $0x74] ss:$8 sps:$4 sm:$0xff]  }
  0x48   :  { %v4969_v25 = vld [vmem:[%s6735_s6 + $0x60] sm:$0xff]   ;;  %v4971_v27 = vld [vmem:[%s6735_s6 + $0x68] sm:$0xff]  }
  0x49   :  { %690 = vmatpush1.bf16.msra.mxu0 %v4955_v30 }
  0x4a   :  { %691 = vmatprep.subr.bf16.mxu0 %v5357_v24 }
  0x4d   :  { %692 = vmatpush1.bf16.msra.mxu0 %v4957_v31 }
  0x4e   :  { %693 = vmatprep.subr.bf16.mxu0 %v5357_v24 }
  0x51   :  { %694 = vmatpush1.bf16.msra.mxu0 %v4959_v32 }
  0x52   :  { %695 = vmatprep.subr.bf16.mxu0 %v5357_v24 }
  0x55   :  { %696 = vmatpush1.bf16.msra.mxu0 %v4961_v33 }
  0x56   :  { %697 = vmatprep.subr.bf16.mxu0 %v5357_v24 }
  0x59   :  { %698 = vmatpush1.bf16.msra.mxu0 %v4963_v34 }
  0x5a   :  { %699 = vmatprep.subr.bf16.mxu0 %v5357_v24 }
  0x5d   :  { %700 = vmatpush1.bf16.msra.mxu0 %v4965_v20  ;;  %v5013_v20 = vld [vmem:[%s6736_s7 + $0x64] ss:$8 sps:$4 sm:$0xff]  }
  0x5e   :  { %701 = vmatprep.subr.bf16.mxu0 %v5357_v24 }
  0x61   :  { %702 = vmatpush1.bf16.msra.mxu0 %v4967_v22  ;;  %v5016_v22 = vld [vmem:[%s6736_s7 + $0xe4] ss:$8 sps:$4 sm:$0xff]  }
  0x62   :  { %703 = vmatprep.subr.bf16.mxu0 %v5357_v24 }
  0x65   :  { %704 = vmatpush1.bf16.msra.mxu0 %v4969_v25 }
  0x66   :  { %705 = vmatprep.subr.bf16.mxu0 %v5357_v24 }
  0x69   :  { %706 = vmatpush1.bf16.msra.mxu0 %v4971_v27 }
 0x107   :  { %v259_v42 = vpop.f32.mrb[0].mxu0 }
 0x108   :  { %v260_v43 = vadd.f32 %v259_v42, %v93_v40  ;;  %v261_v44 = vpop.f32.mrb[1].mxu0 }
 0x109   :  { %v262_v45 = vadd.f32 %v261_v44, %v97_v41  ;;  %v263_v46 = vpop.f32.mrb[2].mxu0 }
 0x10a   :  { %v264_v47 = vadd.f32 %v263_v46, %v93_v40  ;;  %v265_v48 = vpop.f32.mrb[3].mxu0  ;;  %v278_v50 = vmax.f32 %v260_v43, 0.0  ;;  %v4972_v46 = vld [vmem:[%s6736_s7 + $0x70] ss:$8 sps:$4 sm:$0xff]  }
 0x10b   :  { %v266_v49 = vadd.f32 %v265_v48, %v97_v41  ;;  %v279_v52 = vmax.f32 %v262_v45, 0.0  ;;  %v4975_v48 = vld [vmem:[%s6736_s7 + $0x80] ss:$8 sps:$4 sm:$0xff]  }
 0x10c   :  { %v280_v51 = vmax.f32 %v264_v47, 0.0  ;;  %v4977_v47 = vld [vmem:[%s6736_s7 + $0x84] ss:$8 sps:$4 sm:$0xff]  }
 0x10d   :  { %v281_v53 = vmax.f32 %v266_v49, 0.0  ;;  %v4980_v49 = vld [vmem:[%s6736_s7 + $0x94] ss:$8 sps:$4 sm:$0xff]  }
 0x10e   :  { %v286_v54 = vpack.c.bf16 %v280_v51, %v278_v50  ;;  %v4978_v50 = vld [vmem:[%s6736_s7 + $0x90] ss:$8 sps:$4 sm:$0xff]   ;;  %v4983_v51 = vld [vmem:[%s6736_s7 + $0xa4] ss:$8 sps:$4 sm:$0xff]  }
 0x10f   :  { %v269_v55 = vpop.f32.mrb[4].mxu0  ;;  %v287_v56 = vpack.c.bf16 %v281_v53, %v279_v52  ;;  %v4981_v52 = vld [vmem:[%s6736_s7 + $0xa0] ss:$8 sps:$4 sm:$0xff]   ;;  %v4986_v53 = vld [vmem:[%s6736_s7 + $0xb4] ss:$8 sps:$4 sm:$0xff]  }
 0x110   :  { %v270_v57 = vadd.f32 %v269_v55, %v93_v40  ;;  %v271_v58 = vpop.f32.mrb[5].mxu0  ;;  %v4989_v55 = vld [vmem:[%s6736_s7 + $0xc4] ss:$8 sps:$4 sm:$0xff]  }
 0x111   :  { %v272_v59 = vadd.f32 %v271_v58, %v97_v41  ;;  %v273_v60 = vpop.f32.mrb[6].mxu0  ;;  %308 = vmatprep.subr.bf16.mxu1 %v287_v56  ;;  %v4990_v58 = vld [vmem:[%s6736_s7 + $0xd0] ss:$8 sps:$4 sm:$0xff]  }
 0x112   :  { %v274_v61 = vadd.f32 %v273_v60, %v93_v40  ;;  %v275_v62 = vpop.f32.mrb[7].mxu0  ;;  %309 = vmatpush1.bf16.msra.mxu1 %v286_v54  ;;  %v282_v0 = vmax.f32 %v270_v57, 0.0  ;;  %v4992_v57 = vld [vmem:[%s6736_s7 + $0xd4] ss:$8 sps:$4 sm:$0xff]  }
 0x113   :  { %v276_v63 = vadd.f32 %v275_v62, %v97_v41  ;;  %v283_v2 = vmax.f32 %v272_v59, 0.0  ;;  %v4995_v59 = vld [vmem:[%s6736_s7 + $0x4] ss:$8 sps:$4 sm:$0xff]  }
 0x114   :  { %v284_v1 = vmax.f32 %v274_v61, 0.0 }
 0x115   :  { %v285_v3 = vmax.f32 %v276_v63, 0.0 }
 0x116   :  { %v288_v4 = vpack.c.bf16 %v284_v1, %v282_v0 }
 0x117   :  { %v289_v5 = vpack.c.bf16 %v285_v3, %v283_v2 }
 0x118   :  { %v303_v6 = vsel %vm301_vm1, %v288_v4, 0 }
 0x119   :  { %4208 = vmatprep.subr.msk.bf16.mxu1 %vm301_vm1, %v289_v5 }
 0x11a   :  { %311 = vmatpush1.bf16.msra.mxu1 %v303_v6 }
 0x11b   :  { %361 = vmatprep.subr.bf16.mxu1 %v287_v56  ;;  %v4987_v56 = vld [vmem:[%s6736_s7 + $0xc0] ss:$8 sps:$4 sm:$0xff]  }
 0x11d   :  { %4209 = vmatmul.mubr.msk.bf16.vlgmr.msra.gmra.mrb[0].mxu1 %vm297_vm2, %v4942_v7 }
 0x11e   :  { %362 = vmatpush1.bf16.msra.mxu1 %v286_v54  ;;  %393 = vmatprep.mubr.bf16.mxu1 %v5357_v24  ;;  %v4984_v54 = vld [vmem:[%s6736_s7 + $0xb0] ss:$8 sps:$4 sm:$0xff]  }
 0x11f   :  { %4211 = vmatprep.subr.msk.bf16.mxu1 %vm301_vm1, %v289_v5 }
 0x122   :  { %364 = vmatpush1.bf16.msra.mxu1 %v303_v6  ;;  %v4993_v6 = vld [vmem:[%s6736_s7] ss:$8 sps:$4 sm:$0xff]  }
 0x123   :  { %526 = vmatprep.subr.bf16.mxu1 %v5357_v24 }
 0x125   :  { %4212 = vmatmul.mubr.msk.bf16.vlgmr.msra.gmra.mrb[4].mxu1 %vm297_vm2, %v4943_v8 }
 0x126   :  { %527 = vmatpush1.bf16.msra.mxu1 %v4944_v9 }
 0x127   :  { %528 = vmatprep.subr.bf16.mxu1 %v5357_v24 }
 0x12a   :  { %529 = vmatpush1.bf16.msra.mxu1 %v4946_v10  ;;  %v4998_v10 = vld [vmem:[%s6736_s7 + $0x14] ss:$8 sps:$4 sm:$0xff]  }
 0x12b   :  { %530 = vmatprep.subr.bf16.mxu1 %v5357_v24 }
 0x12e   :  { %531 = vmatpush1.bf16.msra.mxu1 %v4948_v11  ;;  %v4996_v11 = vld [vmem:[%s6736_s7 + $0x10] ss:$8 sps:$4 sm:$0xff]  }
 0x12f   :  { %532 = vmatprep.subr.bf16.mxu1 %v5357_v24 }
 0x132   :  { %533 = vmatpush1.bf16.msra.mxu1 %v4950_v12  ;;  %v5001_v12 = vld [vmem:[%s6736_s7 + $0x24] ss:$8 sps:$4 sm:$0xff]  }
 0x133   :  { %534 = vmatprep.subr.bf16.mxu1 %v5357_v24 }
 0x136   :  { %535 = vmatpush1.bf16.msra.mxu1 %v4952_v13  ;;  %v4999_v13 = vld [vmem:[%s6736_s7 + $0x20] ss:$8 sps:$4 sm:$0xff]  }
 0x137   :  { %536 = vmatprep.subr.bf16.mxu1 %v5357_v24 }
 0x13a   :  { %537 = vmatpush1.bf16.msra.mxu1 %v4954_v14  ;;  %v5004_v14 = vld [vmem:[%s6736_s7 + $0x34] ss:$8 sps:$4 sm:$0xff]  }
 0x13b   :  { %538 = vmatprep.subr.bf16.mxu1 %v5357_v24 }
 0x13e   :  { %539 = vmatpush1.bf16.msra.mxu1 %v4956_v15  ;;  %v5002_v15 = vld [vmem:[%s6736_s7 + $0x30] ss:$8 sps:$4 sm:$0xff]  }
 0x13f   :  { %540 = vmatprep.subr.bf16.mxu1 %v5357_v24 }
 0x142   :  { %541 = vmatpush1.bf16.msra.mxu1 %v4958_v16  ;;  %v5007_v16 = vld [vmem:[%s6736_s7 + $0x44] ss:$8 sps:$4 sm:$0xff]  }
 0x143   :  { %542 = vmatprep.subr.bf16.mxu1 %v5357_v24 }
 0x146   :  { %543 = vmatpush1.bf16.msra.mxu1 %v4960_v17  ;;  %v5005_v17 = vld [vmem:[%s6736_s7 + $0x40] ss:$8 sps:$4 sm:$0xff]  }
 0x147   :  { %544 = vmatprep.subr.bf16.mxu1 %v5357_v24 }
 0x14a   :  { %545 = vmatpush1.bf16.msra.mxu1 %v4962_v18  ;;  %v5010_v18 = vld [vmem:[%s6736_s7 + $0x54] ss:$8 sps:$4 sm:$0xff]  }
 0x14b   :  { %546 = vmatprep.subr.bf16.mxu1 %v5357_v24 }
 0x14e   :  { %547 = vmatpush1.bf16.msra.mxu1 %v4964_v19  ;;  %v5008_v19 = vld [vmem:[%s6736_s7 + $0x50] ss:$8 sps:$4 sm:$0xff]  }
 0x14f   :  { %548 = vmatprep.subr.bf16.mxu1 %v5357_v24 }
 0x152   :  { %549 = vmatpush1.bf16.msra.mxu1 %v4966_v21  ;;  %v5011_v21 = vld [vmem:[%s6736_s7 + $0x60] ss:$8 sps:$4 sm:$0xff]  }
 0x153   :  { %550 = vmatprep.subr.bf16.mxu1 %v5357_v24 }
 0x156   :  { %551 = vmatpush1.bf16.msra.mxu1 %v4968_v23 }
 0x157   :  { %552 = vmatprep.subr.bf16.mxu1 %v5357_v24 }
 0x15a   :  { %553 = vmatpush1.bf16.msra.mxu1 %v4970_v26  ;;  %v5014_v26 = vld [vmem:[%s6736_s7 + $0xe0] ss:$8 sps:$4 sm:$0xff]  }
 0x15b   :  { %834 = vmatprep.subr.bf16.mxu1 %v4974_v28  ;;  %v5019_v28 = vld [vmem:[%s6736_s7 + $0xf4] ss:$8 sps:$4 sm:$0xff]  }
 0x1f0   :  { %v342_v29 = vpop.f32.mrb[0].mxu1 }
 0x1f1   :  { %v344_v30 = vpop.f32.mrb[1].mxu1 }
 0x1f2   :  { %v346_v31 = vpop.f32.mrb[2].mxu1 }
 0x1f3   :  { %v348_v32 = vpop.f32.mrb[3].mxu1 }
 0x1f8   :  { %v395_v33 = vpop.f32.mrb[4].mxu1 }
 0x1f9   :  { %v404_v34 = vmax.f32 %v342_v29, %v395_v33  ;;  %v397_v36 = vpop.f32.mrb[5].mxu1  ;;  %v5017_v29 = vld [vmem:[%s6736_s7 + $0xf0] ss:$8 sps:$4 sm:$0xff]  }
 0x1fa   :  { %v405_v38 = vmax.f32 %v344_v30, %v397_v36  ;;  %v399_v40 = vpop.f32.mrb[6].mxu1  ;;  %v5022_v30 = vld [vmem:[%s6736_s7 + $0x104] ss:$8 sps:$4 sm:$0xff]   ;;  %v5023_v33 = vld [vmem:[%s6736_s7 + $0x110] ss:$8 sps:$4 sm:$0xff]  }
 0x1fb   :  { %v406_v41 = vmax.f32 %v346_v31, %v399_v40  ;;  %v401_v42 = vpop.f32.mrb[7].mxu1  ;;  %v5020_v31 = vld [vmem:[%s6736_s7 + $0x100] ss:$8 sps:$4 sm:$0xff]   ;;  %v5029_v40 = vld [vmem:[%s6736_s7 + $0x130] ss:$8 sps:$4 sm:$0xff]  }
 0x1fc   :  { %v407_v43 = vmax.f32 %v348_v32, %v401_v42  ;;  %v5025_v32 = vld [vmem:[%s6736_s7 + $0x114] ss:$8 sps:$4 sm:$0xff]   ;;  %v5026_v36 = vld [vmem:[%s6736_s7 + $0x120] ss:$8 sps:$4 sm:$0xff]  }
 0x1fd   :  { %v408_v44 = vpack.c.bf16 %v406_v41, %v404_v34  ;;  %v5028_v34 = vld [vmem:[%s6736_s7 + $0x124] ss:$8 sps:$4 sm:$0xff]   ;;  %v5032_v42 = vld [vmem:[%s6736_s7 + $0x140] ss:$8 sps:$4 sm:$0xff]  }
 0x1fe   :  { %v409_v45 = vpack.c.bf16 %v407_v43, %v405_v38  ;;  %v5031_v38 = vld [vmem:[%s6736_s7 + $0x134] ss:$8 sps:$4 sm:$0xff]   ;;  %v5034_v41 = vld [vmem:[%s6736_s7 + $0x144] ss:$8 sps:$4 sm:$0xff]  }
 0x1ff   :  { %v5037_v43 = vld [vmem:[%s6736_s7 + $0x154] ss:$8 sps:$4 sm:$0xff]  }
 0x200   :  { %4227 = vmatprep.mubr.msk.bf16.mxu1 %vm522_vm3, %v409_v45  ;;  %4242 = vmatprep.mubr.msk.bf16.mxu0 %vm522_vm3, %v409_v45 }
 0x201   :  { %559 = vmatmul.mubr.bf16.vlgmr.msra.gmra.mrb[8].mxu1 %v408_v44  ;;  %712 = vmatmul.mubr.bf16.vlgmr.msra.gmra.mrb[8].mxu0 %v408_v44 }
 0x202   :  { %835 = vmatpush1.bf16.msra.mxu1 %v4972_v46  ;;  %866 = vmatprep.mubr.bf16.mxu1 %v5357_v24  ;;  %v5035_v46 = vld [vmem:[%s6736_s7 + $0x150] ss:$8 sps:$4 sm:$0xff]  }
 0x203   :  { %836 = vmatprep.subr.bf16.mxu1 %v4977_v47  ;;  %1518 = vmatprep.mubr.bf16.mxu0 %v5357_v24 }
 0x206   :  { %837 = vmatpush1.bf16.msra.mxu1 %v4975_v48  ;;  %v5040_v48 = vld [vmem:[%s6736_s7 + $0x164] ss:$8 sps:$4 sm:$0xff]  }
 0x207   :  { %838 = vmatprep.subr.bf16.mxu1 %v4980_v49  ;;  %v5038_v49 = vld [vmem:[%s6736_s7 + $0x160] ss:$8 sps:$4 sm:$0xff]  }
 0x20a   :  { %839 = vmatpush1.bf16.msra.mxu1 %v4978_v50  ;;  %v5043_v50 = vld [vmem:[%s6736_s7 + $0x174] ss:$8 sps:$4 sm:$0xff]  }
 0x20b   :  { %840 = vmatprep.subr.bf16.mxu1 %v4983_v51  ;;  %v5041_v51 = vld [vmem:[%s6736_s7 + $0x170] ss:$8 sps:$4 sm:$0xff]  }
 0x20e   :  { %841 = vmatpush1.bf16.msra.mxu1 %v4981_v52  ;;  %v5046_v52 = vld [vmem:[%s6736_s7 + $0x184] ss:$8 sps:$4 sm:$0xff]  }
 0x20f   :  { %842 = vmatprep.subr.bf16.mxu1 %v4986_v53  ;;  %v5044_v53 = vld [vmem:[%s6736_s7 + $0x180] ss:$8 sps:$4 sm:$0xff]  }
 0x212   :  { %843 = vmatpush1.bf16.msra.mxu1 %v4984_v54  ;;  %v5049_v54 = vld [vmem:[%s6736_s7 + $0x194] ss:$8 sps:$4 sm:$0xff]  }
 0x213   :  { %844 = vmatprep.subr.bf16.mxu1 %v4989_v55  ;;  %v5047_v55 = vld [vmem:[%s6736_s7 + $0x190] ss:$8 sps:$4 sm:$0xff]  }
 0x216   :  { %845 = vmatpush1.bf16.msra.mxu1 %v4987_v56  ;;  %v5052_v56 = vld [vmem:[%s6736_s7 + $0x1a4] ss:$8 sps:$4 sm:$0xff]  }
 0x217   :  { %846 = vmatprep.subr.bf16.mxu1 %v4992_v57  ;;  %v5050_v57 = vld [vmem:[%s6736_s7 + $0x1a0] ss:$8 sps:$4 sm:$0xff]  }
 0x21a   :  { %847 = vmatpush1.bf16.msra.mxu1 %v4990_v58  ;;  %v5055_v58 = vld [vmem:[%s6736_s7 + $0x1b4] ss:$8 sps:$4 sm:$0xff]  }
 0x21b   :  { %950 = vmatprep.subr.bf16.mxu1 %v4995_v59  ;;  %v5053_v59 = vld [vmem:[%s6736_s7 + $0x1b0] ss:$8 sps:$4 sm:$0xff]  }
 0x2d4   :  { %v560_v60 = vpop.f32.mrb[8].mxu1  ;;  %v713_v61 = vpop.f32.mrb[8].mxu0 }
 0x2d5   :  { %v720_v62 = vmax.f32 %v560_v60, %v713_v61  ;;  %v562_v63 = vpop.f32.mrb[9].mxu1  ;;  %v715_v0 = vpop.f32.mrb[9].mxu0  ;;  %v5058_v60 = vld [vmem:[%s6736_s7 + $0x1c4] ss:$8 sps:$4 sm:$0xff]  }
 0x2d6   :  { %v563_v1 = vpop.f32.mrb[10].mxu1  ;;  %v716_v2 = vpop.f32.mrb[10].mxu0  ;;  %v5056_v63 = vld [vmem:[%s6736_s7 + $0x1c0] ss:$8 sps:$4 sm:$0xff]  }
 0x2d7   :  { %723 = vst.msk [vmem:[#allocation2] sm:$0xff] %vm722_vm4, %v720_v62  ;;  %v721_v3 = vmax.f32 %v563_v1, %v716_v2  ;;  %v565_v4 = vpop.f32.mrb[11].mxu1  ;;  %v718_v5 = vpop.f32.mrb[11].mxu0  ;;  %v5061_v1 = vld [vmem:[%s6736_s7 + $0x1d4] ss:$8 sps:$4 sm:$0xff]  }
 0x2d8   :  { %v5059_v2 = vld [vmem:[%s6736_s7 + $0x1d0] ss:$8 sps:$4 sm:$0xff]   ;;  %v5062_v4 = vld [vmem:[%s6736_s7 + $0x1e0] ss:$8 sps:$4 sm:$0xff]   ;;  %v5067_v5 = vld [vmem:[%s6736_s7 + $0x1f4] ss:$8 sps:$4 sm:$0xff]  }
 0x2d9   :  { %725 = vst.msk [vmem:[#allocation2 + $0x8] sm:$0x3f] %vm724_vm5, %v721_v3  ;;  %v5064_v3 = vld [vmem:[%s6736_s7 + $0x1e4] ss:$8 sps:$4 sm:$0xff]  }
 0x2de   :  { %v726_v25 = vld [vmem:[#allocation2] sm:$0xff] }
 0x2e0   :  { %v743_v7 = vld [vmem:[#allocation2 + $0x1] sm:$0xff]  ;;  %v744_v8 = vld [vmem:[#allocation2 + $0x9] sm:$0x3]  ;;  %v1132_v62 = vld [vmem:[#allocation2 + $0xb] sm:$0x3] }
 0x2e1   :  { %v745_v9 = vpack.c.bf16 %v744_v8, %v743_v7  ;;  %v727_v23 = vld [vmem:[#allocation2 + $0x8] sm:$0x3]  ;;  %v994_v45 = vld [vmem:[#allocation2 + $0xa] sm:$0x3]  ;;  %v5070_v7 = vld [vmem:[%s6736_s7 + $0x204] ss:$8 sps:$4 sm:$0xff]  }
 0x2e2   :  { %v728_v27 = vpack.c.bf16 %v727_v23, %v726_v25  ;;  %v993_v44 = vld [vmem:[#allocation2 + $0x2] sm:$0xff] }
 0x2e3   :  { %4271 = vmatmul.mubr.msk.bf16.vlgmr.msra.gmra.mrb[12].mxu1 %vm722_vm4, %v745_v9  ;;  %v995_v47 = vpack.c.bf16 %v994_v45, %v993_v44  ;;  %v1131_v61 = vld [vmem:[#allocation2 + $0x3] sm:$0xff]  ;;  %v5073_v9 = vld [vmem:[%s6736_s7 + $0x214] ss:$8 sps:$4 sm:$0xff]  }
 0x2e4   :  { %951 = vmatpush1.bf16.msra.mxu1 %v4993_v6  ;;  %982 = vmatprep.mubr.bf16.mxu1 %v5357_v24  ;;  %v1133_v0 = vpack.c.bf16 %v1132_v62, %v1131_v61  ;;  %v5065_v6 = vld [vmem:[%s6736_s7 + $0x1f0] ss:$8 sps:$4 sm:$0xff]   ;;  %v5068_v8 = vld [vmem:[%s6736_s7 + $0x200] ss:$8 sps:$4 sm:$0xff]  }
 0x2e5   :  { %952 = vmatprep.subr.bf16.mxu1 %v4998_v10  ;;  %v5071_v10 = vld [vmem:[%s6736_s7 + $0x210] ss:$8 sps:$4 sm:$0xff]   ;;  %v5081_v44 = vld [vmem:[%s6740_s11 + $0x20] sm:$0xff]   ;;  %v5082_v45 = vld [vmem:[%s6740_s11 + $0x28] sm:$0xff]  }
 0x2e6   :  { %v5087_v61 = vld [vmem:[%s6741_s12] sm:$0xff]  }
 0x2e8   :  { %953 = vmatpush1.bf16.msra.mxu1 %v4996_v11  ;;  %v5076_v11 = vld [vmem:[%s6736_s7 + $0x224] ss:$8 sps:$4 sm:$0xff]  }
 0x2e9   :  { %954 = vmatprep.subr.bf16.mxu1 %v5001_v12  ;;  %v5074_v12 = vld [vmem:[%s6736_s7 + $0x220] ss:$8 sps:$4 sm:$0xff]  }
 0x2ec   :  { %955 = vmatpush1.bf16.msra.mxu1 %v4999_v13  ;;  %v1269_v13 = vld [vmem:[#allocation2 + $0x4] sm:$0xff] }
 0x2ed   :  { %956 = vmatprep.subr.bf16.mxu1 %v5004_v14  ;;  %v1270_v14 = vld [vmem:[#allocation2 + $0xc] sm:$0x3] }
 0x2f0   :  { %957 = vmatpush1.bf16.msra.mxu1 %v5002_v15  ;;  %v1271_v15 = vpack.c.bf16 %v1270_v14, %v1269_v13  ;;  %v5105_v13 = vld [vmem:[%s6757_s20 + $0x24] ss:$8 sps:$4 sm:$0xff]   ;;  %v5103_v14 = vld [vmem:[%s6757_s20 + $0x20] ss:$8 sps:$4 sm:$0xff]  }
 0x2f1   :  { %958 = vmatprep.subr.bf16.mxu1 %v5007_v16  ;;  %v1407_v16 = vld [vmem:[%s6737_s8] sm:$0x3] }
 0x2f4   :  { %959 = vmatpush1.bf16.msra.mxu1 %v5005_v17  ;;  %v1412_v17 = vrot.slane %v1407_v16, %v5578_v37 }
 0x2f5   :  { %960 = vmatprep.subr.bf16.mxu1 %v5010_v18  ;;  %v1416_v18 = vrot.slane %v1407_v16, %v5583_v39  ;;  %v5106_v16 = vld [vmem:[%s6757_s20 + $0x30] ss:$8 sps:$4 sm:$0xff]  }
 0x2f8   :  { %961 = vmatpush1.bf16.msra.mxu1 %v5008_v19 }
 0x2f9   :  { %962 = vmatprep.subr.bf16.mxu1 %v5013_v20 }
 0x2fc   :  { %963 = vmatpush1.bf16.msra.mxu1 %v5011_v21 }
 0x2fd   :  { %1084 = vmatprep.subr.bf16.mxu1 %v5016_v22 }
 0x2ff   :  { %4286 = vmatmul.mubr.msk.bf16.vlgmr.msra.gmra.mrb[12].mxu1 %vm722_vm4, %v728_v27 }
 0x300   :  { %1085 = vmatpush1.bf16.msra.mxu1 %v5014_v26  ;;  %1116 = vmatprep.mubr.bf16.mxu1 %v5357_v24 }
 0x301   :  { %1086 = vmatprep.subr.bf16.mxu1 %v5019_v28 }
 0x304   :  { %1087 = vmatpush1.bf16.msra.mxu1 %v5017_v29 }
 0x305   :  { %1088 = vmatprep.subr.bf16.mxu1 %v5022_v30 }
 0x308   :  { %1089 = vmatpush1.bf16.msra.mxu1 %v5020_v31 }
 0x309   :  { %1090 = vmatprep.subr.bf16.mxu1 %v5025_v32 }
 0x30c   :  { %1091 = vmatpush1.bf16.msra.mxu1 %v5023_v33 }
 0x30d   :  { %1092 = vmatprep.subr.bf16.mxu1 %v5028_v34 }
 0x310   :  { %1093 = vmatpush1.bf16.msra.mxu1 %v5026_v36  ;;  %v1429_v36 = vld [vmem:[%s6738_s9] sm:$0x7] }
 0x311   :  { %1094 = vmatprep.subr.bf16.mxu1 %v5031_v38  ;;  %v1482_v38 = vld [vmem:[%s6739_s10] sm:$0x7] }
 0x314   :  { %1095 = vmatpush1.bf16.msra.mxu1 %v5029_v40  ;;  %v5077_v40 = vld [vmem:[%s6740_s11] sm:$0xff]  }
 0x315   :  { %1096 = vmatprep.subr.bf16.mxu1 %v5034_v41  ;;  %v5078_v41 = vld [vmem:[%s6740_s11 + $0x8] sm:$0xff]  }
 0x318   :  { %1097 = vmatpush1.bf16.msra.mxu1 %v5032_v42  ;;  %v5079_v42 = vld [vmem:[%s6740_s11 + $0x10] sm:$0xff]  }
 0x319   :  { %1222 = vmatprep.subr.bf16.mxu1 %v5037_v43  ;;  %v5080_v43 = vld [vmem:[%s6740_s11 + $0x18] sm:$0xff]  }
 0x31b   :  { %4315 = vmatmul.mubr.msk.bf16.vlgmr.msra.gmra.mrb[12].mxu1 %vm722_vm4, %v995_v47  ;;  %v5084_v47 = vld [vmem:[%s6740_s11 + $0x38] sm:$0xff]  }
 0x31c   :  { %1223 = vmatpush1.bf16.msra.mxu1 %v5035_v46  ;;  %1254 = vmatprep.mubr.bf16.mxu1 %v5357_v24  ;;  %v5083_v46 = vld [vmem:[%s6740_s11 + $0x30] sm:$0xff]  }
 0x31d   :  { %1224 = vmatprep.subr.bf16.mxu1 %v5040_v48  ;;  %v5085_v48 = vld [vmem:[%s6740_s11 + $0x40] sm:$0xff]  }
 0x320   :  { %1225 = vmatpush1.bf16.msra.mxu1 %v5038_v49  ;;  %v5086_v49 = vld [vmem:[%s6740_s11 + $0x48] sm:$0xff]  }
 0x321   :  { %1226 = vmatprep.subr.bf16.mxu1 %v5043_v50 }
 0x324   :  { %1227 = vmatpush1.bf16.msra.mxu1 %v5041_v51 }
 0x325   :  { %1228 = vmatprep.subr.bf16.mxu1 %v5046_v52 }
 0x328   :  { %1229 = vmatpush1.bf16.msra.mxu1 %v5044_v53 }
 0x329   :  { %1230 = vmatprep.subr.bf16.mxu1 %v5049_v54 }
 0x32c   :  { %1231 = vmatpush1.bf16.msra.mxu1 %v5047_v55 }
 0x32d   :  { %1232 = vmatprep.subr.bf16.mxu1 %v5052_v56 }
 0x330   :  { %1233 = vmatpush1.bf16.msra.mxu1 %v5050_v57 }
 0x331   :  { %1234 = vmatprep.subr.bf16.mxu1 %v5055_v58 }
 0x334   :  { %1235 = vmatpush1.bf16.msra.mxu1 %v5053_v59 }
 0x335   :  { %1360 = vmatprep.subr.bf16.mxu1 %v5058_v60 }
 0x337   :  { %4344 = vmatmul.mubr.msk.bf16.vlgmr.msra.gmra.mrb[12].mxu1 %vm722_vm4, %v1133_v0  ;;  %v5089_v0 = vld [vmem:[%s6741_s12 + $0x10] sm:$0xff]  }
 0x338   :  { %1361 = vmatpush1.bf16.msra.mxu1 %v5056_v63  ;;  %1392 = vmatprep.mubr.bf16.mxu1 %v5357_v24  ;;  %v5088_v63 = vld [vmem:[%s6741_s12 + $0x8] sm:$0xff]  }
 0x339   :  { %1362 = vmatprep.subr.bf16.mxu1 %v5061_v1  ;;  %v5090_v1 = vld [vmem:[%s6741_s12 + $0x18] sm:$0xff]  }
 0x33c   :  { %1363 = vmatpush1.bf16.msra.mxu1 %v5059_v2  ;;  %v5091_v2 = vld [vmem:[%s6741_s12 + $0x20] sm:$0xff]  }
 0x33d   :  { %1364 = vmatprep.subr.bf16.mxu1 %v5064_v3  ;;  %v5092_v3 = vld [vmem:[%s6741_s12 + $0x28] sm:$0xff]  }
 0x340   :  { %1365 = vmatpush1.bf16.msra.mxu1 %v5062_v4  ;;  %v5093_v4 = vld [vmem:[%s6741_s12 + $0x30] sm:$0xff]  }
 0x341   :  { %1366 = vmatprep.subr.bf16.mxu1 %v5067_v5  ;;  %v5094_v5 = vld [vmem:[%s6741_s12 + $0x38] sm:$0xff]  }
 0x344   :  { %1367 = vmatpush1.bf16.msra.mxu1 %v5065_v6  ;;  %v5095_v6 = vld [vmem:[%s6741_s12 + $0x40] sm:$0xff]  }
 0x345   :  { %1368 = vmatprep.subr.bf16.mxu1 %v5070_v7  ;;  %v5096_v7 = vld [vmem:[%s6741_s12 + $0x48] sm:$0xff]  }
 0x348   :  { %1369 = vmatpush1.bf16.msra.mxu1 %v5068_v8  ;;  %v5099_v8 = vld [vmem:[%s6757_s20 + $0x4] ss:$8 sps:$4 sm:$0xff]  }
 0x349   :  { %1370 = vmatprep.subr.bf16.mxu1 %v5073_v9  ;;  %v5097_v9 = vld [vmem:[%s6757_s20] ss:$8 sps:$4 sm:$0xff]  }
 0x34c   :  { %1371 = vmatpush1.bf16.msra.mxu1 %v5071_v10  ;;  %v5127_v10 = vld [vmem:[%s6758_s23 + $0x24] ss:$8 sps:$4 sm:$0xff]  }
 0x34d   :  { %1372 = vmatprep.subr.bf16.mxu1 %v5076_v11  ;;  %v5102_v11 = vld [vmem:[%s6757_s20 + $0x14] ss:$8 sps:$4 sm:$0xff]  }
 0x350   :  { %1373 = vmatpush1.bf16.msra.mxu1 %v5074_v12  ;;  %v5100_v12 = vld [vmem:[%s6757_s20 + $0x10] ss:$8 sps:$4 sm:$0xff]  }
 0x353   :  { %4373 = vmatmul.mubr.msk.bf16.vlgmr.msra.gmra.mrb[12].mxu1 %vm722_vm4, %v1271_v15  ;;  %v5108_v15 = vld [vmem:[%s6757_s20 + $0x34] ss:$8 sps:$4 sm:$0xff]  }
 0x354   :  { %1473 = vmatprep.mubr.bf16.mxu1 %v5357_v24 }
 0x426   :  { %v1394_v19 = vpop.f32.mrb[12].mxu1 }
 0x427   :  { %v1419_v20 = vadd.f32 %v1412_v17, %v1394_v19  ;;  %v1396_v21 = vpop.f32.mrb[13].mxu1  ;;  %v5114_v19 = vld [vmem:[%s6757_s20 + $0x54] ss:$8 sps:$4 sm:$0xff]  }
 0x428   :  { %v1420_v22 = vadd.f32 %v1416_v18, %v1396_v21  ;;  %v1398_v23 = vpop.f32.mrb[14].mxu1  ;;  %v5117_v21 = vld [vmem:[%s6757_s20 + $0x64] ss:$8 sps:$4 sm:$0xff]  }
 0x429   :  { %v1421_v25 = vadd.f32 %v1412_v17, %v1398_v23  ;;  %v1400_v26 = vpop.f32.mrb[15].mxu1  ;;  %v1423_v28 = vmax.f32 %v1419_v20, 0.0  ;;  %v5111_v17 = vld [vmem:[%s6757_s20 + $0x44] ss:$8 sps:$4 sm:$0xff]   ;;  %v5112_v20 = vld [vmem:[%s6757_s20 + $0x50] ss:$8 sps:$4 sm:$0xff]  }
 0x42a   :  { %v1422_v27 = vadd.f32 %v1416_v18, %v1400_v26  ;;  %v1424_v30 = vmax.f32 %v1420_v22, 0.0  ;;  %v5109_v18 = vld [vmem:[%s6757_s20 + $0x40] ss:$8 sps:$4 sm:$0xff]   ;;  %v5120_v23 = vld [vmem:[%s6757_s20 + $0x74] ss:$8 sps:$4 sm:$0xff]  }
 0x42b   :  { %v1425_v29 = vmax.f32 %v1421_v25, 0.0  ;;  %v5115_v22 = vld [vmem:[%s6757_s20 + $0x60] ss:$8 sps:$4 sm:$0xff]   ;;  %v5118_v25 = vld [vmem:[%s6757_s20 + $0x70] ss:$8 sps:$4 sm:$0xff]  }
 0x42c   :  { %v1426_v31 = vmax.f32 %v1422_v27, 0.0  ;;  %v5123_v26 = vld [vmem:[%s6757_s20 + $0x84] ss:$8 sps:$4 sm:$0xff]   ;;  %v5121_v27 = vld [vmem:[%s6757_s20 + $0x80] ss:$8 sps:$4 sm:$0xff]  }
 0x42d   :  { %v1427_v32 = vpack.c.bf16 %v1425_v29, %v1423_v28  ;;  %v5126_v28 = vld [vmem:[%s6757_s20 + $0x94] ss:$8 sps:$4 sm:$0xff]   ;;  %v5124_v29 = vld [vmem:[%s6757_s20 + $0x90] ss:$8 sps:$4 sm:$0xff]  }
 0x42e   :  { %v1428_v33 = vpack.c.bf16 %v1426_v31, %v1424_v30  ;;  %v5129_v30 = vld [vmem:[%s6758_s23 + $0x20] ss:$8 sps:$4 sm:$0xff]   ;;  %v5130_v31 = vld [vmem:[%s6758_s23 + $0x34] ss:$8 sps:$4 sm:$0x3f]  }
 0x42f   :  { %v1436_v34 = vsel %vm1434_vm6, %v1427_v32, 0  ;;  %v5132_v32 = vld [vmem:[%s6758_s23 + $0x30] ss:$8 sps:$4 sm:$0x3f]  }
 0x430   :  { %4374 = vmatprep.subr.msk.bf16.mxu1 %vm1434_vm6, %v1428_v33  ;;  %4376 = vmatprep.subr.msk.bf16.mxu0 %vm1434_vm6, %v1428_v33  ;;  %v5136_v33 = vld [vmem:[%s6735_s6] sm:$0xff]  }
 0x431   :  { %1442 = vmatpush1.bf16.msra.mxu1 %v1436_v34  ;;  %1487 = vmatpush1.bf16.msra.mxu0 %v1436_v34  ;;  %v5138_v34 = vld [vmem:[%s6735_s6 + $0x8] sm:$0xff]  }
 0x432   :  { %1614 = vmatprep.subr.bf16.mxu0 %v5357_v24 }
 0x434   :  { %4375 = vmatmul.mubr.msk.bf16.vlgmr.msra.gmra.mrb[16].mxu1 %vm1430_vm7, %v1429_v36  ;;  %4377 = vmatmul.mubr.msk.bf16.vlgmr.msra.gmra.mrb[12].mxu0 %vm1430_vm7, %v1482_v38  ;;  %v5140_v36 = vld [vmem:[%s6735_s6 + $0x10] sm:$0xff]   ;;  %v5142_v38 = vld [vmem:[%s6735_s6 + $0x18] sm:$0xff]  }
 0x435   :  { %1615 = vmatpush1.bf16.msra.mxu0 %v5077_v40  ;;  %2051 = vmatprep.mubr.bf16.mxu1 %v5357_v24  ;;  %v5144_v40 = vld [vmem:[%s6735_s6 + $0x20] sm:$0xff]  }
 0x436   :  { %1616 = vmatprep.subr.bf16.mxu0 %v5357_v24 }
 0x439   :  { %1617 = vmatpush1.bf16.msra.mxu0 %v5078_v41 }
 0x43a   :  { %1618 = vmatprep.subr.bf16.mxu0 %v5357_v24 }
 0x43d   :  { %1619 = vmatpush1.bf16.msra.mxu0 %v5079_v42 }
 0x43e   :  { %1620 = vmatprep.subr.bf16.mxu0 %v5357_v24 }
 0x441   :  { %1621 = vmatpush1.bf16.msra.mxu0 %v5080_v43 }
 0x442   :  { %1622 = vmatprep.subr.bf16.mxu0 %v5357_v24 }
 0x445   :  { %1623 = vmatpush1.bf16.msra.mxu0 %v5081_v44 }
 0x446   :  { %1624 = vmatprep.subr.bf16.mxu0 %v5357_v24 }
 0x449   :  { %1625 = vmatpush1.bf16.msra.mxu0 %v5082_v45  ;;  %v5146_v45 = vld [vmem:[%s6735_s6 + $0x28] sm:$0xff]  }
 0x44a   :  { %1626 = vmatprep.subr.bf16.mxu0 %v5357_v24 }
 0x44d   :  { %1627 = vmatpush1.bf16.msra.mxu0 %v5083_v46  ;;  %v5148_v46 = vld [vmem:[%s6735_s6 + $0x30] sm:$0xff]  }
 0x44e   :  { %1628 = vmatprep.subr.bf16.mxu0 %v5357_v24 }
 0x451   :  { %1629 = vmatpush1.bf16.msra.mxu0 %v5084_v47  ;;  %v5150_v47 = vld [vmem:[%s6735_s6 + $0x38] sm:$0xff]  }
 0x452   :  { %1630 = vmatprep.subr.bf16.mxu0 %v5357_v24 }
 0x455   :  { %1631 = vmatpush1.bf16.msra.mxu0 %v5085_v48  ;;  %v5152_v48 = vld [vmem:[%s6735_s6 + $0x40] sm:$0xff]  }
 0x456   :  { %1632 = vmatprep.subr.bf16.mxu0 %v5357_v24 }
 0x459   :  { %1633 = vmatpush1.bf16.msra.mxu0 %v5086_v49  ;;  %v5154_v49 = vld [vmem:[%s6735_s6 + $0x48] sm:$0xff]  }
 0x45a   :  { %1734 = vmatprep.subr.bf16.mxu0 %v5357_v24 }
 0x507   :  { %v1475_v50 = vpop.f32.mrb[16].mxu1  ;;  %v1520_v51 = vpop.f32.mrb[12].mxu0 }
 0x508   :  { %v1527_v52 = vmax.f32 %v1475_v50, %v1520_v51  ;;  %v1477_v53 = vpop.f32.mrb[17].mxu1  ;;  %v1522_v54 = vpop.f32.mrb[13].mxu0 }
 0x509   :  { %v1528_v55 = vmax.f32 %v1477_v53, %v1522_v54  ;;  %v1479_v56 = vpop.f32.mrb[18].mxu1  ;;  %v1524_v57 = vpop.f32.mrb[14].mxu0 }
 0x50a   :  { %v1480_v58 = vpop.f32.mrb[19].mxu1  ;;  %v1525_v59 = vpop.f32.mrb[15].mxu0  ;;  %v1529_v62 = vpack.c.bf16 %v1527_v52, %v1527_v52 }
 0x50b   :  { %v1530_v60 = vpack.c.bf16 %v1528_v55, %v1528_v55  ;;  %v1802_v55 = vld [vmem:[%s6759_s22] sm:$0x3] }
 0x50c   :  { %v1807_v56 = vrot.slane %v1802_v55, %v5578_v37  ;;  %v1811_v57 = vrot.slane %v1802_v55, %v5583_v39 }
 0x50d   :  { %4388 = vmatprep.mubr.msk.bf16.mxu0 %vm218_vm0, %v1530_v60 }
 0x50e   :  { %1647 = vmatmul.mubr.bf16.vlgmr.msra.gmra.mrb[16].mxu0 %v1529_v62 }
 0x50f   :  { %1735 = vmatpush1.bf16.msra.mxu0 %v5087_v61  ;;  %4399 = vmatprep.mubr.msk.bf16.mxu0 %vm218_vm0, %v1530_v60 }
 0x510   :  { %1736 = vmatprep.subr.bf16.mxu0 %v5357_v24 }
 0x513   :  { %1737 = vmatpush1.bf16.msra.mxu0 %v5088_v63 }
 0x514   :  { %1738 = vmatprep.subr.bf16.mxu0 %v5357_v24 }
 0x517   :  { %1739 = vmatpush1.bf16.msra.mxu0 %v5089_v0 }
 0x518   :  { %1740 = vmatprep.subr.bf16.mxu0 %v5357_v24 }
 0x51b   :  { %1741 = vmatpush1.bf16.msra.mxu0 %v5090_v1 }
 0x51c   :  { %1742 = vmatprep.subr.bf16.mxu0 %v5357_v24 }
 0x51f   :  { %1743 = vmatpush1.bf16.msra.mxu0 %v5091_v2 }
 0x520   :  { %1744 = vmatprep.subr.bf16.mxu0 %v5357_v24 }
 0x523   :  { %1745 = vmatpush1.bf16.msra.mxu0 %v5092_v3 }
 0x524   :  { %1746 = vmatprep.subr.bf16.mxu0 %v5357_v24 }
 0x527   :  { %1747 = vmatpush1.bf16.msra.mxu0 %v5093_v4 }
 0x528   :  { %1748 = vmatprep.subr.bf16.mxu0 %v5357_v24 }
 0x52b   :  { %1749 = vmatpush1.bf16.msra.mxu0 %v5094_v5 }
 0x52c   :  { %1750 = vmatprep.subr.bf16.mxu0 %v5357_v24 }
 0x52f   :  { %1751 = vmatpush1.bf16.msra.mxu0 %v5095_v6 }
 0x530   :  { %1752 = vmatprep.subr.bf16.mxu0 %v5357_v24 }
 0x533   :  { %1753 = vmatpush1.bf16.msra.mxu0 %v5096_v7 }
 0x534   :  { %1938 = vmatprep.subr.bf16.mxu0 %v5099_v8 }
 0x536   :  { %1767 = vmatmul.mubr.bf16.vlgmr.msra.gmra.mrb[20].mxu0 %v1529_v62 }
 0x537   :  { %1939 = vmatpush1.bf16.msra.mxu0 %v5097_v9  ;;  %4428 = vmatprep.mubr.msk.bf16.mxu0 %vm218_vm0, %v5127_v10 }
 0x538   :  { %1940 = vmatprep.subr.bf16.mxu0 %v5102_v11 }
 0x53b   :  { %1941 = vmatpush1.bf16.msra.mxu0 %v5100_v12 }
 0x53c   :  { %1942 = vmatprep.subr.bf16.mxu0 %v5105_v13 }
 0x53f   :  { %1943 = vmatpush1.bf16.msra.mxu0 %v5103_v14 }
 0x540   :  { %1944 = vmatprep.subr.bf16.mxu0 %v5108_v15 }
 0x543   :  { %1945 = vmatpush1.bf16.msra.mxu0 %v5106_v16 }
 0x544   :  { %1946 = vmatprep.subr.bf16.mxu0 %v5111_v17 }
 0x547   :  { %1947 = vmatpush1.bf16.msra.mxu0 %v5109_v18 }
 0x548   :  { %1948 = vmatprep.subr.bf16.mxu0 %v5114_v19 }
 0x54b   :  { %1949 = vmatpush1.bf16.msra.mxu0 %v5112_v20 }
 0x54c   :  { %1950 = vmatprep.subr.bf16.mxu0 %v5117_v21 }
 0x54f   :  { %1951 = vmatpush1.bf16.msra.mxu0 %v5115_v22 }
 0x550   :  { %1952 = vmatprep.subr.bf16.mxu0 %v5120_v23  ;;  %v5133_v23 = vld [vmem:[%s6760_s25] sm:$0x7f]  }
 0x553   :  { %1953 = vmatpush1.bf16.msra.mxu0 %v5118_v25  ;;  %v5134_v25 = vld [vmem:[%s6733_s4] sm:$0x7f]  }
 0x554   :  { %1954 = vmatprep.subr.bf16.mxu0 %v5123_v26  ;;  %v5135_v26 = vld [vmem:[%s6734_s5] sm:$0xff]  }
 0x557   :  { %1955 = vmatpush1.bf16.msra.mxu0 %v5121_v27  ;;  %v5137_v27 = vld [vmem:[%s6734_s5 + $0x8] sm:$0xff]  }
 0x558   :  { %1956 = vmatprep.subr.bf16.mxu0 %v5126_v28  ;;  %v5139_v28 = vld [vmem:[%s6734_s5 + $0x10] sm:$0xff]  }
 0x55b   :  { %1957 = vmatpush1.bf16.msra.mxu0 %v5124_v29  ;;  %v5141_v29 = vld [vmem:[%s6734_s5 + $0x18] sm:$0xff]  }
 0x55c   :  { %2389 = vmatprep.subr.bf16.mxu0 %v5357_v24 }
 0x55e   :  { %1971 = vmatmul.mubr.bf16.vlgmr.msra.gmra.mrb[24].mxu0 %v5129_v30  ;;  %v5143_v30 = vld [vmem:[%s6734_s5 + $0x20] sm:$0xff]  }
 0x55f   :  { %4429 = vmatprep.mubr.msk.bf16.mxu0 %vm218_vm0, %v5130_v31  ;;  %2390 = vmatpush1.bf16.msra.mxu0 %v5136_v33  ;;  %v5145_v31 = vld [vmem:[%s6734_s5 + $0x28] sm:$0xff]   ;;  %v5149_v33 = vld [vmem:[%s6734_s5 + $0x38] sm:$0xff]  }
 0x560   :  { %2391 = vmatprep.subr.bf16.mxu0 %v5357_v24 }
 0x563   :  { %2392 = vmatpush1.bf16.msra.mxu0 %v5138_v34  ;;  %v5151_v34 = vld [vmem:[%s6734_s5 + $0x40] sm:$0xff]  }
 0x564   :  { %2393 = vmatprep.subr.bf16.mxu0 %v5357_v24 }
 0x566   :  { %1981 = vmatmul.mubr.bf16.gmra.mrb[28].mxu0 %v5132_v32  ;;  %v5147_v32 = vld [vmem:[%s6734_s5 + $0x30] sm:$0xff]  }
 0x567   :  { %2394 = vmatpush1.bf16.msra.mxu0 %v5140_v36  ;;  %v5153_v36 = vld [vmem:[%s6734_s5 + $0x48] sm:$0xff]  }
 0x568   :  { %2395 = vmatprep.subr.bf16.mxu0 %v5357_v24 }
 0x56b   :  { %2396 = vmatpush1.bf16.msra.mxu0 %v5142_v38  ;;  %v5155_v38 = vld [vmem:[%s6734_s5 + $0x50] sm:$0xff]  }
 0x56c   :  { %2397 = vmatprep.subr.bf16.mxu0 %v5357_v24 }
 0x56f   :  { %2398 = vmatpush1.bf16.msra.mxu0 %v5144_v40  ;;  %v5156_v40 = vld [vmem:[%s6735_s6 + $0x50] sm:$0xff]  }
 0x570   :  { %2399 = vmatprep.subr.bf16.mxu0 %v5357_v24 }
 0x573   :  { %2400 = vmatpush1.bf16.msra.mxu0 %v5146_v45  ;;  %v5161_v45 = vld [vmem:[%s6734_s5 + $0x68] sm:$0xff]  }
 0x574   :  { %2401 = vmatprep.subr.bf16.mxu0 %v5357_v24 }
 0x577   :  { %2402 = vmatpush1.bf16.msra.mxu0 %v5148_v46  ;;  %v5162_v46 = vld [vmem:[%s6735_s6 + $0x68] sm:$0xff]  }
 0x578   :  { %2403 = vmatprep.subr.bf16.mxu0 %v5357_v24 }
 0x57b   :  { %2404 = vmatpush1.bf16.msra.mxu0 %v5150_v47  ;;  %v5165_v47 = vld [vmem:[%s6736_s7 + $0x74] ss:$8 sps:$4 sm:$0xff]  }
 0x57c   :  { %2405 = vmatprep.subr.bf16.mxu0 %v5357_v24 }
 0x57f   :  { %2406 = vmatpush1.bf16.msra.mxu0 %v5152_v48 }
 0x580   :  { %2407 = vmatprep.subr.bf16.mxu0 %v5357_v24 }
 0x583   :  { %2408 = vmatpush1.bf16.msra.mxu0 %v5154_v49 }
 0x584   :  { %2409 = vmatprep.subr.bf16.mxu0 %v5357_v24 }
 0x587   :  { %2410 = vmatpush1.bf16.msra.mxu0 %v5156_v40  ;;  %v5204_v40 = vld [vmem:[%s6736_s7 + $0x64] ss:$8 sps:$4 sm:$0xff]  }
 0x588   :  { %2411 = vmatprep.subr.bf16.mxu0 %v5357_v24 }
 0x5e1   :  { %v1648_v41 = vpop.f32.mrb[16].mxu0 }
 0x5e2   :  { %v1650_v42 = vpop.f32.mrb[17].mxu0 }
 0x5e3   :  { %v1651_v43 = vpop.f32.mrb[18].mxu0  ;;  %v5158_v42 = vld [vmem:[%s6735_s6 + $0x58] sm:$0xff]  }
 0x5e4   :  { %v1652_v44 = vpop.f32.mrb[19].mxu0  ;;  %2412 = vmatpush1.bf16.msra.mxu0 %v5158_v42  ;;  %v5159_v43 = vld [vmem:[%s6734_s5 + $0x60] sm:$0xff]  }
 0x5e5   :  { %2413 = vmatprep.subr.bf16.mxu0 %v5357_v24  ;;  %v5160_v44 = vld [vmem:[%s6735_s6 + $0x60] sm:$0xff]  }
 0x5e6   :  { %v5207_v42 = vld [vmem:[%s6736_s7 + $0xe4] ss:$8 sps:$4 sm:$0xff]  }
 0x5e8   :  { %2414 = vmatpush1.bf16.msra.mxu0 %v5160_v44 }
 0x5e9   :  { %2415 = vmatprep.subr.bf16.mxu0 %v5357_v24 }
 0x5ec   :  { %2416 = vmatpush1.bf16.msra.mxu0 %v5162_v46 }
 0x609   :  { %v1768_v50 = vpop.f32.mrb[20].mxu0 }
 0x60a   :  { %v1774_v51 = vmax.f32 %v1648_v41, %v1768_v50  ;;  %v1770_v52 = vpop.f32.mrb[21].mxu0  ;;  %v5157_v41 = vld [vmem:[%s6734_s5 + $0x58] sm:$0xff]  }
 0x60b   :  { %v1771_v53 = vpop.f32.mrb[22].mxu0 }
 0x60c   :  { %1776 = vst.msk [vmem:[#allocation3] sm:$0x1f] %vm1775_vm8, %v1774_v51  ;;  %v1772_v54 = vpop.f32.mrb[23].mxu0 }
 0x631   :  { %v1972_v58 = vpop.f32.mrb[24].mxu0 }
 0x632   :  { %v1973_v59 = vadd.f32 %v1972_v58, %v1807_v56  ;;  %v1974_v60 = vpop.f32.mrb[25].mxu0 }
 0x633   :  { %v1975_v61 = vadd.f32 %v1974_v60, %v1811_v57  ;;  %v1976_v62 = vpop.f32.mrb[26].mxu0 }
 0x634   :  { %v1977_v63 = vadd.f32 %v1976_v62, %v1807_v56  ;;  %v1978_v0 = vpop.f32.mrb[27].mxu0  ;;  %v1991_v2 = vmax.f32 %v1973_v59, 0.0  ;;  %v5163_v62 = vld [vmem:[%s6736_s7 + $0x70] ss:$8 sps:$4 sm:$0xff]  }
 0x635   :  { %v1979_v1 = vadd.f32 %v1978_v0, %v1811_v57  ;;  %v1992_v4 = vmax.f32 %v1975_v61, 0.0  ;;  %v5166_v0 = vld [vmem:[%s6736_s7 + $0x80] ss:$8 sps:$4 sm:$0xff]  }
 0x636   :  { %v1993_v3 = vmax.f32 %v1977_v63, 0.0  ;;  %v5168_v63 = vld [vmem:[%s6736_s7 + $0x84] ss:$8 sps:$4 sm:$0xff]  }
 0x637   :  { %v1994_v5 = vmax.f32 %v1979_v1, 0.0  ;;  %v5171_v1 = vld [vmem:[%s6736_s7 + $0x94] ss:$8 sps:$4 sm:$0xff]  }
 0x638   :  { %v1999_v6 = vpack.c.bf16 %v1993_v3, %v1991_v2  ;;  %v5169_v2 = vld [vmem:[%s6736_s7 + $0x90] ss:$8 sps:$4 sm:$0xff]   ;;  %v5174_v3 = vld [vmem:[%s6736_s7 + $0xa4] ss:$8 sps:$4 sm:$0xff]  }
 0x639   :  { %v2000_v7 = vpack.c.bf16 %v1994_v5, %v1992_v4  ;;  %v1982_v8 = vpop.f32.mrb[28].mxu0  ;;  %v5172_v4 = vld [vmem:[%s6736_s7 + $0xa0] ss:$8 sps:$4 sm:$0xff]   ;;  %v5177_v5 = vld [vmem:[%s6736_s7 + $0xb4] ss:$8 sps:$4 sm:$0xff]  }
 0x63a   :  { %v1983_v9 = vadd.f32 %v1982_v8, %v1807_v56  ;;  %v1984_v10 = vpop.f32.mrb[29].mxu0  ;;  %v5178_v8 = vld [vmem:[%s6736_s7 + $0xc0] ss:$8 sps:$4 sm:$0xff]  }
 0x63b   :  { %v1985_v11 = vadd.f32 %v1984_v10, %v1811_v57  ;;  %v1986_v12 = vpop.f32.mrb[30].mxu0  ;;  %2019 = vmatprep.subr.bf16.mxu1 %v2000_v7  ;;  %v5181_v10 = vld [vmem:[%s6736_s7 + $0xd0] ss:$8 sps:$4 sm:$0xff]  }
 0x63c   :  { %v1987_v13 = vadd.f32 %v1986_v12, %v1807_v56  ;;  %v1988_v14 = vpop.f32.mrb[31].mxu0  ;;  %2020 = vmatpush1.bf16.msra.mxu1 %v1999_v6  ;;  %v1995_v16 = vmax.f32 %v1983_v9, 0.0  ;;  %v5183_v9 = vld [vmem:[%s6736_s7 + $0xd4] ss:$8 sps:$4 sm:$0xff]  }
 0x63d   :  { %v1989_v15 = vadd.f32 %v1988_v14, %v1811_v57  ;;  %v1996_v18 = vmax.f32 %v1985_v11, 0.0  ;;  %v5186_v11 = vld [vmem:[%s6736_s7 + $0x4] ss:$8 sps:$4 sm:$0xff]  }
 0x63e   :  { %v1997_v17 = vmax.f32 %v1987_v13, 0.0 }
 0x63f   :  { %v1998_v19 = vmax.f32 %v1989_v15, 0.0 }
 0x640   :  { %v2001_v20 = vpack.c.bf16 %v1997_v17, %v1995_v16 }
 0x641   :  { %v2002_v21 = vpack.c.bf16 %v1998_v19, %v1996_v18 }
 0x642   :  { %v2014_v22 = vsel %vm301_vm1, %v2001_v20, 0 }
 0x643   :  { %4431 = vmatprep.subr.msk.bf16.mxu1 %vm301_vm1, %v2002_v21 }
 0x644   :  { %2022 = vmatpush1.bf16.msra.mxu1 %v2014_v22 }
 0x645   :  { %2072 = vmatprep.subr.bf16.mxu1 %v2000_v7  ;;  %v5180_v7 = vld [vmem:[%s6736_s7 + $0xc4] ss:$8 sps:$4 sm:$0xff]  }
 0x647   :  { %4432 = vmatmul.mubr.msk.bf16.vlgmr.msra.gmra.mrb[20].mxu1 %vm297_vm2, %v5133_v23 }
 0x648   :  { %2073 = vmatpush1.bf16.msra.mxu1 %v1999_v6  ;;  %2104 = vmatprep.mubr.bf16.mxu1 %v5357_v24  ;;  %v5175_v6 = vld [vmem:[%s6736_s7 + $0xb0] ss:$8 sps:$4 sm:$0xff]  }
 0x649   :  { %4434 = vmatprep.subr.msk.bf16.mxu1 %vm301_vm1, %v2002_v21 }
 0x64c   :  { %2075 = vmatpush1.bf16.msra.mxu1 %v2014_v22  ;;  %v5184_v22 = vld [vmem:[%s6736_s7] ss:$8 sps:$4 sm:$0xff]  }
 0x64d   :  { %2236 = vmatprep.subr.bf16.mxu1 %v5357_v24 }
 0x64f   :  { %4435 = vmatmul.mubr.msk.bf16.vlgmr.msra.gmra.mrb[24].mxu1 %vm297_vm2, %v5134_v25 }
 0x650   :  { %2237 = vmatpush1.bf16.msra.mxu1 %v5135_v26 }
 0x651   :  { %2238 = vmatprep.subr.bf16.mxu1 %v5357_v24 }
 0x654   :  { %2239 = vmatpush1.bf16.msra.mxu1 %v5137_v27  ;;  %v5189_v27 = vld [vmem:[%s6736_s7 + $0x14] ss:$8 sps:$4 sm:$0xff]  }
 0x655   :  { %2240 = vmatprep.subr.bf16.mxu1 %v5357_v24 }
 0x658   :  { %2241 = vmatpush1.bf16.msra.mxu1 %v5139_v28  ;;  %v5187_v28 = vld [vmem:[%s6736_s7 + $0x10] ss:$8 sps:$4 sm:$0xff]  }
 0x659   :  { %2242 = vmatprep.subr.bf16.mxu1 %v5357_v24 }
 0x65c   :  { %2243 = vmatpush1.bf16.msra.mxu1 %v5141_v29  ;;  %v5192_v29 = vld [vmem:[%s6736_s7 + $0x24] ss:$8 sps:$4 sm:$0xff]  }
 0x65d   :  { %2244 = vmatprep.subr.bf16.mxu1 %v5357_v24 }
 0x660   :  { %2245 = vmatpush1.bf16.msra.mxu1 %v5143_v30  ;;  %v5190_v30 = vld [vmem:[%s6736_s7 + $0x20] ss:$8 sps:$4 sm:$0xff]  }
 0x661   :  { %2246 = vmatprep.subr.bf16.mxu1 %v5357_v24 }
 0x664   :  { %2247 = vmatpush1.bf16.msra.mxu1 %v5145_v31  ;;  %v5195_v31 = vld [vmem:[%s6736_s7 + $0x34] ss:$8 sps:$4 sm:$0xff]  }
 0x665   :  { %2248 = vmatprep.subr.bf16.mxu1 %v5357_v24 }
 0x668   :  { %2249 = vmatpush1.bf16.msra.mxu1 %v5147_v32  ;;  %v5193_v32 = vld [vmem:[%s6736_s7 + $0x30] ss:$8 sps:$4 sm:$0xff]  }
 0x669   :  { %2250 = vmatprep.subr.bf16.mxu1 %v5357_v24 }
 0x66c   :  { %2251 = vmatpush1.bf16.msra.mxu1 %v5149_v33  ;;  %v5198_v33 = vld [vmem:[%s6736_s7 + $0x44] ss:$8 sps:$4 sm:$0xff]  }
 0x66d   :  { %2252 = vmatprep.subr.bf16.mxu1 %v5357_v24 }
 0x670   :  { %2253 = vmatpush1.bf16.msra.mxu1 %v5151_v34  ;;  %v5196_v34 = vld [vmem:[%s6736_s7 + $0x40] ss:$8 sps:$4 sm:$0xff]  }
 0x671   :  { %2254 = vmatprep.subr.bf16.mxu1 %v5357_v24 }
 0x674   :  { %2255 = vmatpush1.bf16.msra.mxu1 %v5153_v36  ;;  %v5201_v36 = vld [vmem:[%s6736_s7 + $0x54] ss:$8 sps:$4 sm:$0xff]  }
 0x675   :  { %2256 = vmatprep.subr.bf16.mxu1 %v5357_v24 }
 0x678   :  { %2257 = vmatpush1.bf16.msra.mxu1 %v5155_v38  ;;  %v5199_v38 = vld [vmem:[%s6736_s7 + $0x50] ss:$8 sps:$4 sm:$0xff]  }
 0x679   :  { %2258 = vmatprep.subr.bf16.mxu1 %v5357_v24 }
 0x67c   :  { %2259 = vmatpush1.bf16.msra.mxu1 %v5157_v41  ;;  %v5202_v41 = vld [vmem:[%s6736_s7 + $0x60] ss:$8 sps:$4 sm:$0xff]  }
 0x67d   :  { %2260 = vmatprep.subr.bf16.mxu1 %v5357_v24 }
 0x680   :  { %2261 = vmatpush1.bf16.msra.mxu1 %v5159_v43 }
 0x681   :  { %2262 = vmatprep.subr.bf16.mxu1 %v5357_v24 }
 0x684   :  { %2263 = vmatpush1.bf16.msra.mxu1 %v5161_v45  ;;  %v5205_v45 = vld [vmem:[%s6736_s7 + $0xe0] ss:$8 sps:$4 sm:$0xff]  }
 0x685   :  { %2542 = vmatprep.subr.bf16.mxu1 %v5165_v47  ;;  %v5210_v47 = vld [vmem:[%s6736_s7 + $0xf4] ss:$8 sps:$4 sm:$0xff]  }
 0x71a   :  { %v2053_v48 = vpop.f32.mrb[20].mxu1 }
 0x71b   :  { %v2055_v49 = vpop.f32.mrb[21].mxu1 }
 0x71c   :  { %v2057_v50 = vpop.f32.mrb[22].mxu1 }
 0x71d   :  { %v2059_v51 = vpop.f32.mrb[23].mxu1 }
 0x722   :  { %v2106_v52 = vpop.f32.mrb[24].mxu1 }
 0x723   :  { %v2115_v53 = vmax.f32 %v2053_v48, %v2106_v52  ;;  %v2108_v54 = vpop.f32.mrb[25].mxu1  ;;  %v5208_v48 = vld [vmem:[%s6736_s7 + $0xf0] ss:$8 sps:$4 sm:$0xff]  }
 0x724   :  { %v2116_v55 = vmax.f32 %v2055_v49, %v2108_v54  ;;  %v2110_v56 = vpop.f32.mrb[26].mxu1  ;;  %v5213_v49 = vld [vmem:[%s6736_s7 + $0x104] ss:$8 sps:$4 sm:$0xff]   ;;  %v5214_v52 = vld [vmem:[%s6736_s7 + $0x110] ss:$8 sps:$4 sm:$0xff]  }
 0x725   :  { %v2117_v57 = vmax.f32 %v2057_v50, %v2110_v56  ;;  %v2112_v58 = vpop.f32.mrb[27].mxu1  ;;  %v5211_v50 = vld [vmem:[%s6736_s7 + $0x100] ss:$8 sps:$4 sm:$0xff]   ;;  %v5220_v56 = vld [vmem:[%s6736_s7 + $0x130] ss:$8 sps:$4 sm:$0xff]  }
 0x726   :  { %v2118_v59 = vmax.f32 %v2059_v51, %v2112_v58  ;;  %v5216_v51 = vld [vmem:[%s6736_s7 + $0x114] ss:$8 sps:$4 sm:$0xff]   ;;  %v5217_v54 = vld [vmem:[%s6736_s7 + $0x120] ss:$8 sps:$4 sm:$0xff]  }
 0x727   :  { %v2119_v60 = vpack.c.bf16 %v2117_v57, %v2115_v53  ;;  %v5219_v53 = vld [vmem:[%s6736_s7 + $0x124] ss:$8 sps:$4 sm:$0xff]   ;;  %v5223_v58 = vld [vmem:[%s6736_s7 + $0x140] ss:$8 sps:$4 sm:$0xff]  }
 0x728   :  { %v2120_v61 = vpack.c.bf16 %v2118_v59, %v2116_v55  ;;  %v5222_v55 = vld [vmem:[%s6736_s7 + $0x134] ss:$8 sps:$4 sm:$0xff]   ;;  %v5225_v57 = vld [vmem:[%s6736_s7 + $0x144] ss:$8 sps:$4 sm:$0xff]  }
 0x729   :  { %v5228_v59 = vld [vmem:[%s6736_s7 + $0x154] ss:$8 sps:$4 sm:$0xff]  }
 0x72a   :  { %4450 = vmatprep.mubr.msk.bf16.mxu1 %vm522_vm3, %v2120_v61  ;;  %4465 = vmatprep.mubr.msk.bf16.mxu0 %vm522_vm3, %v2120_v61 }
 0x72b   :  { %2269 = vmatmul.mubr.bf16.vlgmr.msra.gmra.mrb[28].mxu1 %v2119_v60  ;;  %2422 = vmatmul.mubr.bf16.vlgmr.msra.gmra.mrb[32].mxu0 %v2119_v60 }
 0x72c   :  { %2543 = vmatpush1.bf16.msra.mxu1 %v5163_v62  ;;  %2574 = vmatprep.mubr.bf16.mxu1 %v5357_v24  ;;  %v5226_v62 = vld [vmem:[%s6736_s7 + $0x150] ss:$8 sps:$4 sm:$0xff]  }
 0x72d   :  { %2544 = vmatprep.subr.bf16.mxu1 %v5168_v63  ;;  %3176 = vmatprep.mubr.bf16.mxu0 %v5357_v24 }
 0x730   :  { %2545 = vmatpush1.bf16.msra.mxu1 %v5166_v0  ;;  %v5231_v0 = vld [vmem:[%s6736_s7 + $0x164] ss:$8 sps:$4 sm:$0xff]  }
 0x731   :  { %2546 = vmatprep.subr.bf16.mxu1 %v5171_v1  ;;  %v5229_v1 = vld [vmem:[%s6736_s7 + $0x160] ss:$8 sps:$4 sm:$0xff]  }
 0x734   :  { %2547 = vmatpush1.bf16.msra.mxu1 %v5169_v2  ;;  %v5234_v2 = vld [vmem:[%s6736_s7 + $0x174] ss:$8 sps:$4 sm:$0xff]  }
 0x735   :  { %2548 = vmatprep.subr.bf16.mxu1 %v5174_v3  ;;  %v5232_v3 = vld [vmem:[%s6736_s7 + $0x170] ss:$8 sps:$4 sm:$0xff]  }
 0x738   :  { %2549 = vmatpush1.bf16.msra.mxu1 %v5172_v4  ;;  %v5237_v4 = vld [vmem:[%s6736_s7 + $0x184] ss:$8 sps:$4 sm:$0xff]  }
 0x739   :  { %2550 = vmatprep.subr.bf16.mxu1 %v5177_v5  ;;  %v5235_v5 = vld [vmem:[%s6736_s7 + $0x180] ss:$8 sps:$4 sm:$0xff]  }
 0x73c   :  { %2551 = vmatpush1.bf16.msra.mxu1 %v5175_v6  ;;  %v5240_v6 = vld [vmem:[%s6736_s7 + $0x194] ss:$8 sps:$4 sm:$0xff]  }
 0x73d   :  { %2552 = vmatprep.subr.bf16.mxu1 %v5180_v7  ;;  %v5238_v7 = vld [vmem:[%s6736_s7 + $0x190] ss:$8 sps:$4 sm:$0xff]  }
 0x740   :  { %2553 = vmatpush1.bf16.msra.mxu1 %v5178_v8  ;;  %v5243_v8 = vld [vmem:[%s6736_s7 + $0x1a4] ss:$8 sps:$4 sm:$0xff]  }
 0x741   :  { %2554 = vmatprep.subr.bf16.mxu1 %v5183_v9  ;;  %v5241_v9 = vld [vmem:[%s6736_s7 + $0x1a0] ss:$8 sps:$4 sm:$0xff]  }
 0x744   :  { %2555 = vmatpush1.bf16.msra.mxu1 %v5181_v10  ;;  %v5246_v10 = vld [vmem:[%s6736_s7 + $0x1b4] ss:$8 sps:$4 sm:$0xff]  }
 0x745   :  { %2658 = vmatprep.subr.bf16.mxu1 %v5186_v11  ;;  %v5244_v11 = vld [vmem:[%s6736_s7 + $0x1b0] ss:$8 sps:$4 sm:$0xff]  }
 0x7fe   :  { %v2270_v12 = vpop.f32.mrb[28].mxu1  ;;  %v2423_v13 = vpop.f32.mrb[32].mxu0 }
 0x7ff   :  { %v2430_v14 = vmax.f32 %v2270_v12, %v2423_v13  ;;  %v2272_v15 = vpop.f32.mrb[29].mxu1  ;;  %v2425_v16 = vpop.f32.mrb[33].mxu0  ;;  %v5249_v12 = vld [vmem:[%s6736_s7 + $0x1c4] ss:$8 sps:$4 sm:$0xff]  }
 0x800   :  { %v2273_v17 = vpop.f32.mrb[30].mxu1  ;;  %v2426_v18 = vpop.f32.mrb[34].mxu0  ;;  %v5247_v15 = vld [vmem:[%s6736_s7 + $0x1c0] ss:$8 sps:$4 sm:$0xff]  }
 0x801   :  { %2433 = vst.msk [vmem:[#allocation2 + $0x10] sm:$0xff] %vm722_vm4, %v2430_v14  ;;  %v2431_v19 = vmax.f32 %v2273_v17, %v2426_v18  ;;  %v2275_v20 = vpop.f32.mrb[31].mxu1  ;;  %v2428_v21 = vpop.f32.mrb[35].mxu0  ;;  %v5252_v17 = vld [vmem:[%s6736_s7 + $0x1d4] ss:$8 sps:$4 sm:$0xff]  }
 0x802   :  { %v5250_v18 = vld [vmem:[%s6736_s7 + $0x1d0] ss:$8 sps:$4 sm:$0xff]   ;;  %v5253_v20 = vld [vmem:[%s6736_s7 + $0x1e0] ss:$8 sps:$4 sm:$0xff]   ;;  %v5258_v21 = vld [vmem:[%s6736_s7 + $0x1f4] ss:$8 sps:$4 sm:$0xff]  }
 0x803   :  { %2434 = vst.msk [vmem:[#allocation2 + $0x18] sm:$0x3f] %vm724_vm5, %v2431_v19  ;;  %v5255_v19 = vld [vmem:[%s6736_s7 + $0x1e4] ss:$8 sps:$4 sm:$0xff]  }
 0x808   :  { %v2435_v44 = vld [vmem:[#allocation2 + $0x10] sm:$0xff] }
 0x80a   :  { %v2452_v23 = vld [vmem:[#allocation2 + $0x11] sm:$0xff]  ;;  %v2453_v25 = vld [vmem:[#allocation2 + $0x19] sm:$0x3]  ;;  %v2839_v14 = vld [vmem:[#allocation2 + $0x1b] sm:$0x3] }
 0x80b   :  { %v2454_v26 = vpack.c.bf16 %v2453_v25, %v2452_v23  ;;  %v2436_v43 = vld [vmem:[#allocation2 + $0x18] sm:$0x3]  ;;  %v2702_v61 = vld [vmem:[#allocation2 + $0x1a] sm:$0x3]  ;;  %v5261_v23 = vld [vmem:[%s6736_s7 + $0x204] ss:$8 sps:$4 sm:$0xff]  }
 0x80c   :  { %v2437_v46 = vpack.c.bf16 %v2436_v43, %v2435_v44  ;;  %v2701_v60 = vld [vmem:[#allocation2 + $0x12] sm:$0xff]  ;;  %v5259_v25 = vld [vmem:[%s6736_s7 + $0x200] ss:$8 sps:$4 sm:$0xff]  }
 0x80d   :  { %4494 = vmatmul.mubr.msk.bf16.vlgmr.msra.gmra.mrb[32].mxu1 %vm722_vm4, %v2454_v26  ;;  %v2703_v63 = vpack.c.bf16 %v2702_v61, %v2701_v60  ;;  %v2838_v13 = vld [vmem:[#allocation2 + $0x13] sm:$0xff] }
 0x80e   :  { %2659 = vmatpush1.bf16.msra.mxu1 %v5184_v22  ;;  %2690 = vmatprep.mubr.bf16.mxu1 %v5357_v24  ;;  %v2840_v16 = vpack.c.bf16 %v2839_v14, %v2838_v13  ;;  %v5256_v22 = vld [vmem:[%s6736_s7 + $0x1f0] ss:$8 sps:$4 sm:$0xff]   ;;  %v5264_v26 = vld [vmem:[%s6736_s7 + $0x214] ss:$8 sps:$4 sm:$0xff]   ;;  %v5279_v13 = vld [vmem:[%s6741_s12 + $0x8] sm:$0xff]  }
 0x80f   :  { %2660 = vmatprep.subr.bf16.mxu1 %v5189_v27  ;;  %v5262_v27 = vld [vmem:[%s6736_s7 + $0x210] ss:$8 sps:$4 sm:$0xff]  }
 0x810   :  { %v5274_v60 = vld [vmem:[%s6740_s11 + $0x30] sm:$0xff]   ;;  %v5275_v61 = vld [vmem:[%s6740_s11 + $0x38] sm:$0xff]  }
 0x811   :  { %v5280_v14 = vld [vmem:[%s6741_s12 + $0x10] sm:$0xff]  }
 0x812   :  { %2661 = vmatpush1.bf16.msra.mxu1 %v5187_v28  ;;  %v5267_v28 = vld [vmem:[%s6736_s7 + $0x224] ss:$8 sps:$4 sm:$0xff]  }
 0x813   :  { %2662 = vmatprep.subr.bf16.mxu1 %v5192_v29  ;;  %v5265_v29 = vld [vmem:[%s6736_s7 + $0x220] ss:$8 sps:$4 sm:$0xff]  }
 0x816   :  { %2663 = vmatpush1.bf16.msra.mxu1 %v5190_v30  ;;  %v2975_v30 = vld [vmem:[#allocation2 + $0x14] sm:$0xff] }
 0x817   :  { %2664 = vmatprep.subr.bf16.mxu1 %v5195_v31  ;;  %v2976_v31 = vld [vmem:[#allocation2 + $0x1c] sm:$0x3] }
 0x81a   :  { %2665 = vmatpush1.bf16.msra.mxu1 %v5193_v32  ;;  %v2977_v32 = vpack.c.bf16 %v2976_v31, %v2975_v30  ;;  %v5295_v30 = vld [vmem:[%s6742_s13 + $0x90] sm:$0xff]   ;;  %v5296_v31 = vld [vmem:[%s6742_s13 + $0x48] sm:$0xff]  }
 0x81b   :  { %2666 = vmatprep.subr.bf16.mxu1 %v5198_v33  ;;  %v3112_v33 = vld [vmem:[%s6737_s8] sm:$0x3] }
 0x81e   :  { %2667 = vmatpush1.bf16.msra.mxu1 %v5196_v34  ;;  %v3117_v34 = vrot.slane %v3112_v33, %v5578_v37  ;;  %v3134_v37 = vld [vmem:[%s6738_s9] sm:$0x7] }
 0x81f   :  { %2668 = vmatprep.subr.bf16.mxu1 %v5201_v36  ;;  %v3121_v36 = vrot.slane %v3112_v33, %v5583_v39  ;;  %v3185_v39 = vld [vmem:[%s6739_s10] sm:$0x7] }
 0x822   :  { %2669 = vmatpush1.bf16.msra.mxu1 %v5199_v38 }
 0x823   :  { %2670 = vmatprep.subr.bf16.mxu1 %v5204_v40 }
 0x826   :  { %2671 = vmatpush1.bf16.msra.mxu1 %v5202_v41 }
 0x827   :  { %2791 = vmatprep.subr.bf16.mxu1 %v5207_v42 }
 0x829   :  { %4509 = vmatmul.mubr.msk.bf16.vlgmr.msra.gmra.mrb[32].mxu1 %vm722_vm4, %v2437_v46 }
 0x82a   :  { %2792 = vmatpush1.bf16.msra.mxu1 %v5205_v45  ;;  %2823 = vmatprep.mubr.bf16.mxu1 %v5357_v24 }
 0x82b   :  { %2793 = vmatprep.subr.bf16.mxu1 %v5210_v47 }
 0x82e   :  { %2794 = vmatpush1.bf16.msra.mxu1 %v5208_v48 }
 0x82f   :  { %2795 = vmatprep.subr.bf16.mxu1 %v5213_v49 }
 0x832   :  { %2796 = vmatpush1.bf16.msra.mxu1 %v5211_v50 }
 0x833   :  { %2797 = vmatprep.subr.bf16.mxu1 %v5216_v51 }
 0x836   :  { %2798 = vmatpush1.bf16.msra.mxu1 %v5214_v52 }
 0x837   :  { %2799 = vmatprep.subr.bf16.mxu1 %v5219_v53 }
 0x83a   :  { %2800 = vmatpush1.bf16.msra.mxu1 %v5217_v54  ;;  %v5268_v54 = vld [vmem:[%s6740_s11] sm:$0xff]  }
 0x83b   :  { %2801 = vmatprep.subr.bf16.mxu1 %v5222_v55  ;;  %v5269_v55 = vld [vmem:[%s6740_s11 + $0x8] sm:$0xff]  }
 0x83e   :  { %2802 = vmatpush1.bf16.msra.mxu1 %v5220_v56  ;;  %v5270_v56 = vld [vmem:[%s6740_s11 + $0x10] sm:$0xff]  }
 0x83f   :  { %2803 = vmatprep.subr.bf16.mxu1 %v5225_v57  ;;  %v5271_v57 = vld [vmem:[%s6740_s11 + $0x18] sm:$0xff]  }
 0x842   :  { %2804 = vmatpush1.bf16.msra.mxu1 %v5223_v58  ;;  %v5272_v58 = vld [vmem:[%s6740_s11 + $0x20] sm:$0xff]  }
 0x843   :  { %2928 = vmatprep.subr.bf16.mxu1 %v5228_v59  ;;  %v5273_v59 = vld [vmem:[%s6740_s11 + $0x28] sm:$0xff]  }
 0x845   :  { %4538 = vmatmul.mubr.msk.bf16.vlgmr.msra.gmra.mrb[32].mxu1 %vm722_vm4, %v2703_v63  ;;  %v5277_v63 = vld [vmem:[%s6740_s11 + $0x48] sm:$0xff]  }
 0x846   :  { %2929 = vmatpush1.bf16.msra.mxu1 %v5226_v62  ;;  %2960 = vmatprep.mubr.bf16.mxu1 %v5357_v24  ;;  %v5276_v62 = vld [vmem:[%s6740_s11 + $0x40] sm:$0xff]  }
 0x847   :  { %2930 = vmatprep.subr.bf16.mxu1 %v5231_v0 }
 0x84a   :  { %2931 = vmatpush1.bf16.msra.mxu1 %v5229_v1 }
 0x84b   :  { %2932 = vmatprep.subr.bf16.mxu1 %v5234_v2 }
 0x84e   :  { %2933 = vmatpush1.bf16.msra.mxu1 %v5232_v3 }
 0x84f   :  { %2934 = vmatprep.subr.bf16.mxu1 %v5237_v4 }
 0x852   :  { %2935 = vmatpush1.bf16.msra.mxu1 %v5235_v5 }
 0x853   :  { %2936 = vmatprep.subr.bf16.mxu1 %v5240_v6 }
 0x856   :  { %2937 = vmatpush1.bf16.msra.mxu1 %v5238_v7 }
 0x857   :  { %2938 = vmatprep.subr.bf16.mxu1 %v5243_v8 }
 0x85a   :  { %2939 = vmatpush1.bf16.msra.mxu1 %v5241_v9 }
 0x85b   :  { %2940 = vmatprep.subr.bf16.mxu1 %v5246_v10 }
 0x85e   :  { %2941 = vmatpush1.bf16.msra.mxu1 %v5244_v11  ;;  %v5278_v11 = vld [vmem:[%s6741_s12] sm:$0xff]  }
 0x85f   :  { %3065 = vmatprep.subr.bf16.mxu1 %v5249_v12 }
 0x861   :  { %4567 = vmatmul.mubr.msk.bf16.vlgmr.msra.gmra.mrb[32].mxu1 %vm722_vm4, %v2840_v16  ;;  %v5282_v16 = vld [vmem:[%s6741_s12 + $0x20] sm:$0xff]  }
 0x862   :  { %3066 = vmatpush1.bf16.msra.mxu1 %v5247_v15  ;;  %3097 = vmatprep.mubr.bf16.mxu1 %v5357_v24  ;;  %v5281_v15 = vld [vmem:[%s6741_s12 + $0x18] sm:$0xff]  }
 0x863   :  { %3067 = vmatprep.subr.bf16.mxu1 %v5252_v17  ;;  %v5283_v17 = vld [vmem:[%s6741_s12 + $0x28] sm:$0xff]  }
 0x866   :  { %3068 = vmatpush1.bf16.msra.mxu1 %v5250_v18  ;;  %v5284_v18 = vld [vmem:[%s6741_s12 + $0x30] sm:$0xff]  }
 0x867   :  { %3069 = vmatprep.subr.bf16.mxu1 %v5255_v19  ;;  %v5285_v19 = vld [vmem:[%s6741_s12 + $0x38] sm:$0xff]  }
 0x86a   :  { %3070 = vmatpush1.bf16.msra.mxu1 %v5253_v20  ;;  %v5286_v20 = vld [vmem:[%s6741_s12 + $0x40] sm:$0xff]  }
 0x86b   :  { %3071 = vmatprep.subr.bf16.mxu1 %v5258_v21  ;;  %v5287_v21 = vld [vmem:[%s6741_s12 + $0x48] sm:$0xff]  }
 0x86e   :  { %3072 = vmatpush1.bf16.msra.mxu1 %v5256_v22  ;;  %v5288_v22 = vld [vmem:[%s6742_s13 + $0x28] sm:$0xff]  }
 0x86f   :  { %3073 = vmatprep.subr.bf16.mxu1 %v5261_v23  ;;  %v5289_v23 = vld [vmem:[%s6742_s13 + $0x78] sm:$0xff]  }
 0x872   :  { %3074 = vmatpush1.bf16.msra.mxu1 %v5259_v25  ;;  %v5358_v25 = vmov 0.0  }
 0x873   :  { %3075 = vmatprep.subr.bf16.mxu1 %v5264_v26  ;;  %v5291_v26 = vld [vmem:[%s6742_s13 + $0x80] sm:$0xff]  }
 0x876   :  { %3076 = vmatpush1.bf16.msra.mxu1 %v5262_v27  ;;  %v5292_v27 = vld [vmem:[%s6742_s13 + $0x38] sm:$0xff]  }
 0x877   :  { %3077 = vmatprep.subr.bf16.mxu1 %v5267_v28  ;;  %v5293_v28 = vld [vmem:[%s6742_s13 + $0x88] sm:$0xff]  }
 0x87a   :  { %3078 = vmatpush1.bf16.msra.mxu1 %v5265_v29  ;;  %v5294_v29 = vld [vmem:[%s6742_s13 + $0x40] sm:$0xff]  }
 0x87b   :  { %4802 = vmatprep.subr.bf16.mxu1 %v5358_v25 }
 0x87d   :  { %4596 = vmatmul.mubr.msk.bf16.vlgmr.msra.gmra.mrb[32].mxu1 %vm722_vm4, %v2977_v32  ;;  %v5297_v32 = vld [vmem:[%s6742_s13 + $0x98] sm:$0xff]  }
 0x87e   :  { %4803 = vmatpush3.bf16.msra.mxu1 %v5289_v23  ;;  %4812 = vmatprep.mubr.msk.bf16.mxu1 %vm5359_vm9, %v5358_v25 }
 0x87f   :  { %4804 = vmatprep.subr.bf16.mxu1 %v5358_v25 }
 0x882   :  { %4805 = vmatpush3.bf16.msra.mxu1 %v5291_v26 }
 0x883   :  { %4806 = vmatprep.subr.bf16.mxu1 %v5358_v25 }
 0x886   :  { %4807 = vmatpush3.bf16.msra.mxu1 %v5293_v28 }
 0x887   :  { %4808 = vmatprep.subr.bf16.mxu1 %v5358_v25 }
 0x88a   :  { %4809 = vmatpush3.bf16.msra.mxu1 %v5295_v30 }
 0x88b   :  { %4810 = vmatprep.subr.bf16.mxu1 %v5358_v25 }
 0x88e   :  { %4811 = vmatpush3.bf16.msra.mxu1 %v5297_v32 }
 0x88f   :  { %4830 = vmatprep.subr.bf16.mxu1 %v5358_v25 }
 0x950   :  { %v3099_v38 = vpop.f32.mrb[32].mxu1 }
 0x951   :  { %v3124_v40 = vadd.f32 %v3117_v34, %v3099_v38  ;;  %v3101_v41 = vpop.f32.mrb[33].mxu1 }
 0x952   :  { %v3125_v42 = vadd.f32 %v3121_v36, %v3101_v41  ;;  %v3103_v43 = vpop.f32.mrb[34].mxu1 }
 0x953   :  { %v3126_v44 = vadd.f32 %v3117_v34, %v3103_v43  ;;  %v3105_v45 = vpop.f32.mrb[35].mxu1  ;;  %v3128_v47 = vmax.f32 %v3124_v40, 0.0 }
 0x954   :  { %v3127_v46 = vadd.f32 %v3121_v36, %v3105_v45  ;;  %v3129_v49 = vmax.f32 %v3125_v42, 0.0  ;;  %v5298_v45 = vld [vmem:[%s6742_s13] sm:$0xff]  }
 0x955   :  { %v3130_v48 = vmax.f32 %v3126_v44, 0.0 }
 0x956   :  { %v3131_v50 = vmax.f32 %v3127_v46, 0.0 }
 0x957   :  { %v3132_v51 = vpack.c.bf16 %v3130_v48, %v3128_v47 }
 0x958   :  { %v3133_v52 = vpack.c.bf16 %v3131_v50, %v3129_v49  ;;  %v5299_v50 = vld [vmem:[%s6742_s13 + $0x8] sm:$0xff]  }
 0x959   :  { %v3139_v53 = vsel %vm1434_vm6, %v3132_v51, 0  ;;  %v5300_v51 = vld [vmem:[%s6742_s13 + $0x10] sm:$0xff]  }
 0x95a   :  { %4597 = vmatprep.subr.msk.bf16.mxu0 %vm1434_vm6, %v3133_v52 }
 0x95b   :  { %3145 = vmatpush1.bf16.msra.mxu0 %v3139_v53 }
 0x95c   :  { %4599 = vmatprep.subr.msk.bf16.mxu0 %vm1434_vm6, %v3133_v52  ;;  %v5301_v52 = vld [vmem:[%s6742_s13 + $0x18] sm:$0xff]  }
 0x95e   :  { %4598 = vmatmul.mubr.msk.bf16.vlgmr.msra.gmra.mrb[36].mxu0 %vm1430_vm7, %v3134_v37 }
 0x95f   :  { %3190 = vmatpush1.bf16.msra.mxu0 %v3139_v53  ;;  %3221 = vmatprep.mubr.bf16.mxu0 %v5357_v24  ;;  %v5302_v53 = vld [vmem:[%s6742_s13 + $0x20] sm:$0xff]  }
 0x960   :  { %3317 = vmatprep.subr.bf16.mxu0 %v5357_v24 }
 0x966   :  { %4600 = vmatmul.mubr.msk.bf16.vlgmr.msra.gmra.mrb[40].mxu0 %vm1430_vm7, %v3185_v39  ;;  %v5303_v39 = vld [vmem:[%s6742_s13 + $0x50] sm:$0xff]  }
 0x967   :  { %3318 = vmatpush1.bf16.msra.mxu0 %v5268_v54 }
 0x968   :  { %3319 = vmatprep.subr.bf16.mxu0 %v5357_v24 }
 0x96b   :  { %3320 = vmatpush1.bf16.msra.mxu0 %v5269_v55  ;;  %v5304_v55 = vld [vmem:[%s6742_s13 + $0x58] sm:$0xff]  }
 0x96c   :  { %3321 = vmatprep.subr.bf16.mxu0 %v5357_v24 }
 0x96f   :  { %3322 = vmatpush1.bf16.msra.mxu0 %v5270_v56  ;;  %v5305_v56 = vld [vmem:[%s6742_s13 + $0x60] sm:$0xff]  }
 0x970   :  { %3323 = vmatprep.subr.bf16.mxu0 %v5357_v24 }
 0x973   :  { %3324 = vmatpush1.bf16.msra.mxu0 %v5271_v57  ;;  %v5306_v57 = vld [vmem:[%s6742_s13 + $0x68] sm:$0xff]  }
 0x974   :  { %3325 = vmatprep.subr.bf16.mxu0 %v5357_v24 }
 0x977   :  { %3326 = vmatpush1.bf16.msra.mxu0 %v5272_v58  ;;  %v5307_v58 = vld [vmem:[%s6742_s13 + $0x70] sm:$0xff]  }
 0x978   :  { %3327 = vmatprep.subr.bf16.mxu0 %v5357_v24 }
 0x97b   :  { %3328 = vmatpush1.bf16.msra.mxu0 %v5273_v59 }
 0x97c   :  { %3329 = vmatprep.subr.bf16.mxu0 %v5357_v24 }
 0x97f   :  { %3330 = vmatpush1.bf16.msra.mxu0 %v5274_v60  ;;  %v5308_v60 = vld [vmem:[%s6742_s13 + $0xa0] sm:$0xff]  }
 0x980   :  { %3331 = vmatprep.subr.bf16.mxu0 %v5357_v24 }
 0x983   :  { %3332 = vmatpush1.bf16.msra.mxu0 %v5275_v61 }
 0x984   :  { %3333 = vmatprep.subr.bf16.mxu0 %v5357_v24 }
 0x987   :  { %3334 = vmatpush1.bf16.msra.mxu0 %v5276_v62  ;;  %v5309_v62 = vld [vmem:[%s6742_s13 + $0xa8] sm:$0xff]  }
 0x988   :  { %3335 = vmatprep.subr.bf16.mxu0 %v5357_v24 }
 0x98b   :  { %3336 = vmatpush1.bf16.msra.mxu0 %v5277_v63  ;;  %v5310_v63 = vld [vmem:[%s6742_s13 + $0xb0] sm:$0xff]  }
 0x98c   :  { %3437 = vmatprep.subr.bf16.mxu0 %v5357_v24 }
 0xa31   :  { %v3178_v0 = vpop.f32.mrb[36].mxu0 }
 0xa32   :  { %v3180_v1 = vpop.f32.mrb[37].mxu0 }
 0xa33   :  { %v3182_v2 = vpop.f32.mrb[38].mxu0 }
 0xa34   :  { %v3183_v3 = vpop.f32.mrb[39].mxu0 }
 0xa39   :  { %v3223_v4 = vpop.f32.mrb[40].mxu0 }
 0xa3a   :  { %v3230_v5 = vmax.f32 %v3178_v0, %v3223_v4  ;;  %v3225_v6 = vpop.f32.mrb[41].mxu0  ;;  %v5311_v0 = vld [vmem:[%s6742_s13 + $0xb8] sm:$0xff]   ;;  %v5313_v4 = vld [vmem:[%s6744_s15] sm:$0xff]  }
 0xa3b   :  { %v3231_v7 = vmax.f32 %v3180_v1, %v3225_v6  ;;  %v3227_v8 = vpop.f32.mrb[42].mxu0  ;;  %v5312_v1 = vld [vmem:[%s6742_s13 + $0xc0] sm:$0xff]   ;;  %v5315_v6 = vld [vmem:[%s6744_s15 + $0x10] sm:$0xff]  }
 0xa3c   :  { %v3228_v9 = vpop.f32.mrb[43].mxu0  ;;  %v3232_v12 = vpack.c.bf16 %v3230_v5, %v3230_v5  ;;  %v5314_v5 = vld [vmem:[%s6744_s15 + $0x8] sm:$0xff]   ;;  %v5317_v8 = vld [vmem:[%s6744_s15 + $0x20] sm:$0xff]  }
 0xa3d   :  { %v3233_v10 = vpack.c.bf16 %v3231_v7, %v3231_v7  ;;  %v5316_v7 = vld [vmem:[%s6744_s15 + $0x18] sm:$0xff]   ;;  %v5318_v9 = vld [vmem:[%s6744_s15 + $0x28] sm:$0xff]  }
 0xa3f   :  { %4611 = vmatprep.mubr.msk.bf16.mxu0 %vm218_vm0, %v3233_v10 }
 0xa40   :  { %3350 = vmatmul.mubr.bf16.vlgmr.msra.gmra.mrb[44].mxu0 %v3232_v12 }
 0xa41   :  { %3438 = vmatpush1.bf16.msra.mxu0 %v5278_v11  ;;  %4622 = vmatprep.mubr.msk.bf16.mxu0 %vm218_vm0, %v3233_v10  ;;  %v5319_v10 = vld [vmem:[%s6744_s15 + $0x30] sm:$0xff]   ;;  %v5320_v11 = vld [vmem:[%s6744_s15 + $0x38] sm:$0xff]  }
 0xa42   :  { %3439 = vmatprep.subr.bf16.mxu0 %v5357_v24 }
 0xa45   :  { %3440 = vmatpush1.bf16.msra.mxu0 %v5279_v13  ;;  %v5322_v13 = vld [vmem:[%s6746_s17 + $0x8] sm:$0xff]  }
 0xa46   :  { %3441 = vmatprep.subr.bf16.mxu0 %v5357_v24 }
 0xa49   :  { %3442 = vmatpush1.bf16.msra.mxu0 %v5280_v14  ;;  %v5323_v14 = vld [vmem:[%s6746_s17 + $0x10] sm:$0xff]  }
 0xa4a   :  { %3443 = vmatprep.subr.bf16.mxu0 %v5357_v24 }
 0xa4d   :  { %3444 = vmatpush1.bf16.msra.mxu0 %v5281_v15  ;;  %v5324_v15 = vld [vmem:[%s6746_s17 + $0x18] sm:$0xff]  }
 0xa4e   :  { %3445 = vmatprep.subr.bf16.mxu0 %v5357_v24 }
 0xa51   :  { %3446 = vmatpush1.bf16.msra.mxu0 %v5282_v16  ;;  %v5325_v16 = vld [vmem:[%s6746_s17 + $0x20] sm:$0xff]  }
 0xa52   :  { %3447 = vmatprep.subr.bf16.mxu0 %v5357_v24 }
 0xa55   :  { %3448 = vmatpush1.bf16.msra.mxu0 %v5283_v17  ;;  %v5326_v17 = vld [vmem:[%s6746_s17 + $0x28] sm:$0xff]  }
 0xa56   :  { %3449 = vmatprep.subr.bf16.mxu0 %v5357_v24 }
 0xa59   :  { %3450 = vmatpush1.bf16.msra.mxu0 %v5284_v18 }
 0xa5a   :  { %3451 = vmatprep.subr.bf16.mxu0 %v5357_v24 }
 0xa5d   :  { %3452 = vmatpush1.bf16.msra.mxu0 %v5285_v19 }
 0xa5e   :  { %3453 = vmatprep.subr.bf16.mxu0 %v5357_v24 }
 0xa61   :  { %3454 = vmatpush1.bf16.msra.mxu0 %v5286_v20 }
 0xa62   :  { %3455 = vmatprep.subr.bf16.mxu0 %v5357_v24  ;;  %v5290_v24 = vld [vmem:[%s6742_s13 + $0x30] sm:$0xff]  }
 0xa65   :  { %3456 = vmatpush1.bf16.msra.mxu0 %v5287_v21 }
 0xa66   :  { %4760 = vmatprep.subr.bf16.mxu0 %v5358_v25 }
 0xa68   :  { %3470 = vmatmul.mubr.bf16.vlgmr.msra.gmra.mrb[48].mxu0 %v3232_v12  ;;  %v5321_v12 = vld [vmem:[%s6746_s17] sm:$0xff]  }
 0xa69   :  { %4761 = vmatpush3.bf16.msra.mxu0 %v5288_v22  ;;  %4770 = vmatprep.mubr.msk.bf16.mxu0 %vm5359_vm9, %v5358_v25 }
 0xa6a   :  { %4762 = vmatprep.subr.bf16.mxu0 %v5358_v25 }
 0xa6d   :  { %4763 = vmatpush3.bf16.msra.mxu0 %v5290_v24 }
 0xa6e   :  { %4764 = vmatprep.subr.bf16.mxu0 %v5358_v25 }
 0xa71   :  { %4765 = vmatpush3.bf16.msra.mxu0 %v5292_v27 }
 0xa72   :  { %4766 = vmatprep.subr.bf16.mxu0 %v5358_v25 }
 0xa75   :  { %4767 = vmatpush3.bf16.msra.mxu0 %v5294_v29 }
 0xa76   :  { %4768 = vmatprep.subr.bf16.mxu0 %v5358_v25 }
 0xa79   :  { %4769 = vmatpush3.bf16.msra.mxu0 %v5296_v31 }
 0xa7a   :  { %4774 = vmatprep.subr.bf16.mxu0 %v5358_v25 }
 0xb13   :  { %v3351_v33 = vpop.f32.mrb[44].mxu0 }
 0xb14   :  { %v3353_v34 = vpop.f32.mrb[45].mxu0 }
 0xb15   :  { %v3354_v36 = vpop.f32.mrb[46].mxu0 }
 0xb16   :  { %v3355_v38 = vpop.f32.mrb[47].mxu0 }
 0xb3b   :  { %v3471_v40 = vpop.f32.mrb[48].mxu0 }
 0xb3c   :  { %v3477_v41 = vmax.f32 %v3351_v33, %v3471_v40  ;;  %v3473_v42 = vpop.f32.mrb[49].mxu0 }
 0xb3d   :  { %v3474_v43 = vpop.f32.mrb[50].mxu0  ;;  %v4693_v42 = vld [vmem:[%s6743_s14] ss:$0 sm:$0xff] }
 0xb3e   :  { %3478 = vst.msk [vmem:[#allocation3 + $0x5] sm:$0x1f] %vm1775_vm8, %v3477_v41  ;;  %v3475_v44 = vpop.f32.mrb[51].mxu0 }
 0xb45   :  { %v3492_v46 = vld [vmem:[#allocation3 + $0x1] ss:$5 sm:$0x3]  ;;  %v3741_v47 = vld [vmem:[#allocation3 + $0x3] ss:$5 sm:$0x3] }
 0xb46   :  { %v3493_v48 = vpack.c.bf16 %v3492_v46, %v3492_v46  ;;  %v3742_v49 = vpack.c.bf16 %v3741_v47, %v3741_v47  ;;  %v3479_v37 = vld [vmem:[#allocation3] ss:$5 sm:$0x3]  ;;  %v3653_v59 = vld [vmem:[#allocation3 + $0x2] ss:$5 sm:$0x3] }
 0xb47   :  { %v3480_v54 = vpack.c.bf16 %v3479_v37, %v3479_v37  ;;  %v3654_v61 = vpack.c.bf16 %v3653_v59, %v3653_v59  ;;  %v3829_v2 = vld [vmem:[#allocation3 + $0x4] ss:$5 sm:$0x3] }
 0xb48   :  { %4771 = vmatmul.mubr.msk.bf16.vlgmr.msra.gmra.mrb[52].mxu0 %vm3535_vm10, %v3493_v48  ;;  %4813 = vmatmul.mubr.msk.bf16.vlgmr.msra.gmra.mrb[36].mxu1 %vm3535_vm10, %v3742_v49  ;;  %v3830_v3 = vpack.c.bf16 %v3829_v2, %v3829_v2 }
 0xb49   :  { %4775 = vmatpush3.bf16.msra.mxu0 %v5298_v45  ;;  %4784 = vmatprep.mubr.msk.bf16.mxu0 %vm5359_vm9, %v5358_v25 }
 0xb4a   :  { %4776 = vmatprep.subr.bf16.mxu0 %v5358_v25  ;;  %4846 = vmatprep.mubr.msk.bf16.mxu1 %vm5359_vm9, %v5358_v25 }
 0xb4b   :  { %4831 = vmatpush3.bf16.msra.mxu1 %v5313_v4 }
 0xb4c   :  { %4832 = vmatprep.subr.bf16.mxu1 %v5358_v25 }
 0xb4d   :  { %4777 = vmatpush3.bf16.msra.mxu0 %v5299_v50  ;;  %v5327_v50 = vld [vmem:[%s6746_s17 + $0x30] sm:$0xff]  }
 0xb4e   :  { %4778 = vmatprep.subr.bf16.mxu0 %v5358_v25 }
 0xb4f   :  { %4833 = vmatpush3.bf16.msra.mxu1 %v5314_v5 }
 0xb50   :  { %4834 = vmatprep.subr.bf16.mxu1 %v5358_v25 }
 0xb51   :  { %4779 = vmatpush3.bf16.msra.mxu0 %v5300_v51  ;;  %v5328_v51 = vld [vmem:[%s6746_s17 + $0x38] sm:$0xff]  }
 0xb52   :  { %4780 = vmatprep.subr.bf16.mxu0 %v5358_v25 }
 0xb53   :  { %4835 = vmatpush3.bf16.msra.mxu1 %v5315_v6 }
 0xb54   :  { %4836 = vmatprep.subr.bf16.mxu1 %v5358_v25 }
 0xb55   :  { %4781 = vmatpush3.bf16.msra.mxu0 %v5301_v52  ;;  %v4694_v52 = vld [vmem:[%s6745_s16] ss:$0 sm:$0xff]  ;;  %s5360_s16 = smov [#allocation4]  }
 0xb56   :  { %4782 = vmatprep.subr.bf16.mxu0 %v5358_v25  ;;  %s4173_s17 = sshll.u32 %s5360_s16, 4  ;;  %s4174_s17 = int_to_ptr.vmem [resolvable:$true] %s4173_s17 }
 0xb57   :  { %4837 = vmatpush3.bf16.msra.mxu1 %v5316_v7  ;;  %p5338_p1 = scmp.lt.s32.totalorder %s4174_s17, %s4174_s17 }
 0xb58   :  { %4838 = vmatprep.subr.bf16.mxu1 %v5358_v25 }
 0xb59   :  { %4783 = vmatpush3.bf16.msra.mxu0 %v5302_v53 }
 0xb5a   :  { %4788 = vmatprep.subr.bf16.mxu0 %v5358_v25 }
 0xb5b   :  { %4839 = vmatpush3.bf16.msra.mxu1 %v5317_v8 }
 0xb5c   :  { %4785 = vmatmul.mubr.msk.bf16.vlgmr.msra.gmra.mrb[56].mxu0 %vm3535_vm10, %v3480_v54  ;;  %4840 = vmatprep.subr.bf16.mxu1 %v5358_v25 }
 0xb5d   :  { %4789 = vmatpush3.bf16.msra.mxu0 %v5303_v39  ;;  %4798 = vmatprep.mubr.msk.bf16.mxu0 %vm5359_vm9, %v5358_v25 }
 0xb5e   :  { %4790 = vmatprep.subr.bf16.mxu0 %v5358_v25 }
 0xb5f   :  { %4841 = vmatpush3.bf16.msra.mxu1 %v5318_v9 }
 0xb60   :  { %4842 = vmatprep.subr.bf16.mxu1 %v5358_v25 }
 0xb61   :  { %4791 = vmatpush3.bf16.msra.mxu0 %v5304_v55 }
 0xb62   :  { %4792 = vmatprep.subr.bf16.mxu0 %v5358_v25 }
 0xb63   :  { %4843 = vmatpush3.bf16.msra.mxu1 %v5319_v10 }
 0xb64   :  { %4844 = vmatprep.subr.bf16.mxu1 %v5358_v25 }
 0xb65   :  { %4793 = vmatpush3.bf16.msra.mxu0 %v5305_v56 }
 0xb66   :  { %4794 = vmatprep.subr.bf16.mxu0 %v5358_v25 }
 0xb67   :  { %4845 = vmatpush3.bf16.msra.mxu1 %v5320_v11 }
 0xb69   :  { %4795 = vmatpush3.bf16.msra.mxu0 %v5306_v57 }
 0xb6a   :  { %4796 = vmatprep.subr.bf16.mxu0 %v5358_v25 }
 0xb6d   :  { %4797 = vmatpush3.bf16.msra.mxu0 %v5307_v58  ;;  %v4151_v58 = vand.u32 127, %v90_v35 }
 0xb6e   :  { %4816 = vmatprep.subr.bf16.mxu0 %v5358_v25 }
 0xb6f   :  { %vm4152_vm11 = vcmp.lt.s32.totalorder %v4151_v58, 10 }
 0xb70   :  { %4799 = vmatmul.mubr.msk.bf16.vlgmr.msra.gmra.mrb[60].mxu0 %vm3535_vm10, %v3654_v61 }
 0xb71   :  { %4817 = vmatpush3.bf16.msra.mxu0 %v5308_v60  ;;  %4826 = vmatprep.mubr.msk.bf16.mxu0 %vm5359_vm9, %v5358_v25 }
 0xb72   :  { %4818 = vmatprep.subr.bf16.mxu0 %v5358_v25 }
 0xb75   :  { %4819 = vmatpush3.bf16.msra.mxu0 %v5309_v62 }
 0xb76   :  { %4820 = vmatprep.subr.bf16.mxu0 %v5358_v25 }
 0xb79   :  { %4821 = vmatpush3.bf16.msra.mxu0 %v5310_v63 }
 0xb7a   :  { %4822 = vmatprep.subr.bf16.mxu0 %v5358_v25 }
 0xb7d   :  { %4823 = vmatpush3.bf16.msra.mxu0 %v5311_v0 }
 0xb7e   :  { %4824 = vmatprep.subr.bf16.mxu0 %v5358_v25 }
 0xb81   :  { %4825 = vmatpush3.bf16.msra.mxu0 %v5312_v1 }
 0xb82   :  { %4850 = vmatprep.subr.bf16.mxu0 %v5358_v25 }
 0xb84   :  { %4827 = vmatmul.mubr.msk.bf16.vlgmr.msra.gmra.mrb[64].mxu0 %vm3535_vm10, %v3830_v3 }
 0xb85   :  { %4866 = vmatprep.mubr.msk.bf16.mxu0 %vm5359_vm9, %v5358_v25  ;;  %4851 = vmatpush3.bf16.msra.mxu0 %v5321_v12 }
 0xb86   :  { %4852 = vmatprep.subr.bf16.mxu0 %v5358_v25 }
 0xb89   :  { %4853 = vmatpush3.bf16.msra.mxu0 %v5322_v13 }
 0xb8a   :  { %4854 = vmatprep.subr.bf16.mxu0 %v5358_v25 }
 0xb8d   :  { %4855 = vmatpush3.bf16.msra.mxu0 %v5323_v14 }
 0xb8e   :  { %4856 = vmatprep.subr.bf16.mxu0 %v5358_v25 }
 0xb91   :  { %4857 = vmatpush3.bf16.msra.mxu0 %v5324_v15 }
 0xb92   :  { %4858 = vmatprep.subr.bf16.mxu0 %v5358_v25 }
 0xb95   :  { %4859 = vmatpush3.bf16.msra.mxu0 %v5325_v16 }
 0xb96   :  { %4860 = vmatprep.subr.bf16.mxu0 %v5358_v25 }
 0xb99   :  { %4861 = vmatpush3.bf16.msra.mxu0 %v5326_v17 }
 0xb9a   :  { %4862 = vmatprep.subr.bf16.mxu0 %v5358_v25 }
 0xb9d   :  { %4863 = vmatpush3.bf16.msra.mxu0 %v5327_v50 }
 0xb9e   :  { %4864 = vmatprep.subr.bf16.mxu0 %v5358_v25  ;;  %v4703_v25 = vld [vmem:[%s6747_s18] ss:$0 sm:$0xff]  ;;  %s5333_s18 = scalar_lea.vmem %s4174_s17, 32 }
 0xb9f   :  { %p5334_p0 = scmp.ne.s32.totalorder %s4174_s17, %s5333_s18  ;;  %p5339_p2 = scmp.lt.s32.totalorder %s5333_s18, %s5333_s18 }
 0xba1   :  { %4865 = vmatpush3.bf16.msra.mxu0 %v5328_v51  ;;  %p5340_p3 = por %p5339_p2, %p5338_p1 }
 0xba3   :  { %p5341_p4 = pnand %p5340_p3, %p5334_p0 }
 0xc1b   :  { %v3573_v18 = vpop.f32.mrb[52].mxu0  ;;  %v3821_v19 = vpop.f32.mrb[36].mxu1 }
 0xc1c   :  { %v4772_v20 = vpop.f32.mrb[53].mxu0  ;;  %v4814_v21 = vpop.f32.mrb[37].mxu1 }
 0xc1d   :  { %v3576_v22 = vpop.f32.mrb[54].mxu0  ;;  %v3824_v23 = vpop.f32.mrb[38].mxu1 }
 0xc1e   :  { %v4773_v24 = vpop.f32.mrb[55].mxu0  ;;  %v4815_v26 = vpop.f32.mrb[39].mxu1 }
 0xc2f   :  { %v3646_v27 = vpop.f32.mrb[56].mxu0 }
 0xc30   :  { %v3647_v28 = vadd.f32 %v3646_v27, %v3573_v18  ;;  %v4786_v29 = vpop.f32.mrb[57].mxu0 }
 0xc31   :  { %v3649_v30 = vpop.f32.mrb[58].mxu0 }
 0xc32   :  { %v4787_v31 = vpop.f32.mrb[59].mxu0 }
 0xc43   :  { %v3733_v32 = vpop.f32.mrb[60].mxu0 }
 0xc44   :  { %v3739_v33 = vadd.f32 %v3733_v32, %v3647_v28  ;;  %v4800_v34 = vpop.f32.mrb[61].mxu0 }
 0xc45   :  { %v3736_v36 = vpop.f32.mrb[62].mxu0 }
 0xc46   :  { %v4801_v38 = vpop.f32.mrb[63].mxu0  ;;  %v3827_v40 = vadd.f32 %v3821_v19, %v3739_v33 }
 0xc57   :  { %v3909_v41 = vpop.f32.mrb[64].mxu0 }
 0xc58   :  { %v3915_v43 = vadd.f32 %v3909_v41, %v3827_v40  ;;  %v4828_v44 = vpop.f32.mrb[65].mxu0 }
 0xc59   :  { %v3912_v45 = vpop.f32.mrb[66].mxu0 }
 0xc5a   :  { %v3923_v46 = vadd.f32 %v4693_v42, %v3915_v43  ;;  %v4829_v47 = vpop.f32.mrb[67].mxu0 }
 0xc5c   :  { %v3924_v48 = vmax.f32 %v3923_v46, 0.0 }
 0xc5e   :  { %v3925_v49 = vpack.c.bf16 %v3924_v48, %v3924_v48 }
 0xc60   :  { %4847 = vmatmul.mubr.bf16.vlgmr.msra.gmra.mrb[40].mxu1 %v3925_v49 }
 0xd33   :  { %v4031_v53 = vpop.f32.mrb[40].mxu1 }
 0xd34   :  { %v4032_v37 = vadd.f32 %v4694_v52, %v4031_v53  ;;  %v4848_v39 = vpop.f32.mrb[41].mxu1 }
 0xd35   :  { %v4034_v54 = vpop.f32.mrb[42].mxu1 }
 0xd36   :  { %v4037_v55 = vmax.f32 %v4032_v37, 0.0  ;;  %v4849_v56 = vpop.f32.mrb[43].mxu1 }
 0xd38   :  { %v4038_v57 = vpack.c.bf16 %v4037_v55, %v4037_v55 }
 0xd3a   :  { %4867 = vmatmul.mubr.bf16.vlgmr.msra.gmra.mrb[68].mxu0 %v4038_v57 }
 0xe0d   :  { %v4144_v59 = vpop.f32.mrb[68].mxu0 }
 0xe0e   :  { %v4145_v60 = vadd.f32 %v4703_v25, %v4144_v59  ;;  %v4868_v61 = vpop.f32.mrb[69].mxu0 }
 0xe0f   :  { %v4147_v62 = vpop.f32.mrb[70].mxu0 }
 0xe10   :  { %v4869_v63 = vpop.f32.mrb[71].mxu0  ;;  %v4153_v0 = vsel %vm4152_vm11, %v4145_v60, -inf }
 0xe11   :  { %v4155_v1 = vsel %vm4154_vm12, %v4153_v0, -inf }
 0xe12   :  { %4156 = vmax.xlane.f32.xlu0 %v4155_v1 }
 0xe9f   :  { %v4157_v2 = vpop.xlane.xlu0 %4156 }
 0xea0   :  { %v4158_v3 = vsub.f32 %v4153_v0, %v4157_v2 }
 0xea2   :  { %v4159_v4 = vmul.f32 1.442695, %v4158_v3 }
 0xea4   :  { %5329 = vpow2.f32 %v4159_v4 }
 0xeae   :  { %v5330_v5 = vpop.eup %5329 }
 0xeaf   :  { %v4161_v35 = vsel %vm4154_vm12, %v5330_v5, 0.0 }
 0xeb0   :  { %4162 = vadd.xlane.f32.xlu0 %v4161_v35 }
 0xf3d   :  { %v4163_v6 = vpop.xlane.xlu0 %4162 }
 0xf3e   :  { %5331 = vrcp.f32 %v4163_v6 }
 0xf48   :  { %v5332_v7 = vpop.eup %5331 }
 0xf49   :  { %v4165_v8 = vmul.f32 %v5332_v7, %v5330_v5 }
 0xf4b   :  { %4166 = vst [vmem:[#allocation4] sm:$0x3] %v4165_v8 }
 0xf4c   :  { %5344 = shalt.err (!%p5341_p4)
}
 0xf4d   :  { %s5345_s3 = scalar_lea.hbm %s6748_s19, 32 }
 0xf4e   :  { %p5346_p5 = scmp.ne.s32.totalorder %s6748_s19, %s5345_s3  ;;  %p5349_p6 = scmp.lt.u32.totalorder %s5345_s3, %s6748_s19 }
 0xf50   :  { %p5351_p7 = pnand %p5349_p6, %p5346_p5 }
 0xf52   :  { %5354 = shalt.err (!%p5351_p7)
}
 0xf53   :  { %4176 = dma.vmem_to_hbm [thread:$0]  %s4174_s17, 32, %s6748_s19, [#allocation5]  }
 0xf54   :  { %5355 = dma.done.wait [#allocation5], 32  }
 0xf55   :  { %5356 = vsyncadd [#allocation5], 4294967264 }
 0xf56   :  { %4180 = vsyncpa [#allocation5], 1 }

</bundles_post_ra>
